<compile_context>
chip_gen: v7x
topology: tpu7x:2x2x1
jax: 0.10.0
libtpu: 0.0.40
codegen_flags: <defaults>
</compile_context>

<pallas_src>
import functools

import jax
import jax.numpy as jnp
from jax.experimental import pallas as pl
from jax.experimental.pallas import tpu as pltpu


def _pick_c_tile(C, HW, itemsize):
    """Largest divisor of C whose f32 streamed chunk (c_tile, HW) stays <= ~64 KiB (~16 vregs)."""
    budget = 64 * 1024
    max_tile = max(1, budget // (HW * 4))
    max_tile = min(C, max_tile)
    pref = 16 if itemsize < 4 else 8        # prefer sublane-packing friendly multiples
    for t in range(max_tile, 0, -1):
        if C % t == 0 and (t == C or t % pref == 0 or t < pref):
            return t
    return 1


def _pick_block_batch(N, C, HW, itemsize, vmem_cap):
    """Samples per grid step: ~6 MB of in+out HBM traffic per step, VMEM- and grid-aware."""
    sample_bytes = C * HW * itemsize
    target_step_bytes = 6 << 20                          # in + out per step (~2 us on v7x)
    bn = max(1, target_step_bytes // (2 * sample_bytes))
    # Double-buffered in+out blocks (4 * block_bytes) kept to ~1/3 of physical VMEM.
    bn = min(bn, max(1, (vmem_cap // 3) // (4 * sample_bytes)))
    bn = min(bn, 32)                                     # review: ~8 (v5e) / 16 (v6e) / 32 (v7x)
    if N >= 2:
        bn = min(bn, N // 2)                             # keep grid >= 2 steps (megacore)
    bn = max(1, min(bn, N))
    while N % bn:                                        # use a divisor of N: no ragged blocks
        bn -= 1
    return int(bn)


def channel_gate_kernel(x_ref, w1t_ref, b1_ref, w2_ref, b2_ref, o_ref, gate_ref, *, c_tile):
    # x_ref   : (Bn, C, HW) VMEM block, lane-dense (HW on lanes)
    # w1t_ref : (C, Cr)     first Linear weight, transposed (= PyTorch w1.T)
    # b1_ref  : (1, Cr)     first Linear bias (row)
    # w2_ref  : (C, Cr)     second Linear weight (PyTorch layout (out=C, in=Cr))
    # b2_ref  : (C, 1)      second Linear bias (column)
    # o_ref   : (Bn, C, HW) VMEM output block
    # gate_ref: (C, Bn)     f32 scratch: pooled means, then the sigmoid gates
    bn, C, HW = x_ref.shape
    Cr = w1t_ref.shape[1]
    n_chunks = C // c_tile
    inv_hw = 1.0 / HW

    # Gate multiply dtype: bf16 inputs gate in bf16 (bf16 VALU on v6e/v7x), everything else f32.
    gate_dtype = jnp.bfloat16 if x_ref.dtype == jnp.bfloat16 else jnp.float32

    # ---- Phase 1: global average pool over the spatial (lane) axis, streamed over
    #      (sample, channel-chunk). All indices are static -> plain vld + lane reduce. ----
    for b in range(bn):
        for k in range(n_chunks):
            c0 = k * c_tile
            chunk = x_ref[b, c0:c0 + c_tile, :].astype(jnp.float32)       # (c_tile, HW)
            gate_ref[c0:c0 + c_tile, b:b + 1] = (
                jnp.sum(chunk, axis=1, keepdims=True) * inv_hw)           # (c_tile, 1)

    # ---- Phase 2: channel-attention MLP, ONCE for the whole (C, Bn) slab of samples.
    #      h[j, :]  = relu(sum_c w1t[c, j] * pooled[c, :] + b1[j])
    #      att[:, :]= sum_j w2[:, j] * h[j, :] + b2
    pooled = gate_ref[...]                                                # (C, Bn) f32
    acc = None
    for j in range(Cr):
        hj = jnp.sum(w1t_ref[:, j:j + 1] * pooled, axis=0, keepdims=True)  # (1, Bn)
        hj = jnp.maximum(hj + b1_ref[:, j:j + 1], 0.0)                     # (1, Bn)
        term = w2_ref[:, j:j + 1] * hj                                     # (C, Bn)
        acc = term if acc is None else acc + term
    att = acc + b2_ref[...]                                                # (C, Bn)
    gate_ref[...] = jax.nn.sigmoid(att)

    # ---- Phase 3: gate the input by the per-(sample, channel) sigmoid, streamed. ----
    for b in range(bn):
        for k in range(n_chunks):
            c0 = k * c_tile
            xc = x_ref[b, c0:c0 + c_tile, :].astype(gate_dtype)            # (c_tile, HW)
            sc = gate_ref[c0:c0 + c_tile, b:b + 1].astype(gate_dtype)      # (c_tile, 1)
            o_ref[b, c0:c0 + c_tile, :] = (xc * sc).astype(o_ref.dtype)


def channel_gate(x, w1, b1, w2, b2, *, block_batch=None, c_tile=None):
    """ChannelGate forward (pool_types=['avg']).

    x : (N, C, H, W)
    w1: (C//r, C), b1: (C//r,)   -- nn.Linear(gate_channels, gate_channels // r)
    w2: (C, C//r), b2: (C,)      -- nn.Linear(gate_channels // r, gate_channels)
    """
    N, C, H, W = x.shape
    Cr = w1.shape[0]
    assert w1.shape == (Cr, C) and w2.shape == (C, Cr) and Cr >= 1
    HW = H * W
    x_flat = x.reshape(N, C, HW)                         # lane-dense view (free reshape)
    itemsize = x.dtype.itemsize

    # Generation-aware physical VMEM (64 MiB/TC on v7x, 128 MiB on v5e/v6e).
    try:
        vmem_cap = int(getattr(pltpu.get_tpu_info(), "vmem_capacity_bytes",
                               64 * 1024 * 1024))
    except Exception:
        vmem_cap = 64 * 1024 * 1024

    if c_tile is None:
        c_tile = _pick_c_tile(C, HW, itemsize)
    assert C % c_tile == 0

    if block_batch is None:
        block_batch = _pick_block_batch(N, C, HW, itemsize, vmem_cap)
    bn = int(block_batch)
    assert N % bn == 0
    grid = (N // bn,)

    w1t = jnp.transpose(w1).astype(jnp.float32)          # (C, Cr)
    b1r = b1.reshape(1, Cr).astype(jnp.float32)          # (1, Cr)
    w2m = w2.astype(jnp.float32)                         # (C, Cr)
    b2c = b2.reshape(C, 1).astype(jnp.float32)           # (C, 1)

    # VMEM budget: double-buffered in+out blocks, resident params, lane-padded scratch.
    block_bytes = bn * C * HW * itemsize
    param_bytes = 4 * (w1t.size + b1r.size + w2m.size + b2c.size)
    scratch_bytes = C * (((bn + 127) // 128) * 128) * 4
    vmem_need = 4 * block_bytes + 2 * param_bytes + scratch_bytes
    vmem_limit = max(16 << 20, int(1.3 * vmem_need) + (4 << 20))
    vmem_limit = min(vmem_limit, (vmem_cap * 9) // 10)

    cost = pl.CostEstimate(
        flops=int(2 * N * C * HW + 4 * N * C * Cr),
        transcendentals=int(N * C),
        bytes_accessed=int(2 * N * C * HW * itemsize + param_bytes),
    )

    kernel = functools.partial(channel_gate_kernel, c_tile=c_tile)

    out_flat = pl.pallas_call(
        kernel,
        out_shape=jax.ShapeDtypeStruct((N, C, HW), x.dtype),
        grid=grid,
        in_specs=[
            pl.BlockSpec((bn, C, HW), lambda n: (n, 0, 0)),   # x: Bn samples per grid step
            pl.BlockSpec((C, Cr), lambda n: (0, 0)),          # w1.T (resident: same block every step)
            pl.BlockSpec((1, Cr), lambda n: (0, 0)),          # b1
            pl.BlockSpec((C, Cr), lambda n: (0, 0)),          # w2
            pl.BlockSpec((C, 1), lambda n: (0, 0)),           # b2
        ],
        out_specs=pl.BlockSpec((bn, C, HW), lambda n: (n, 0, 0)),
        scratch_shapes=[pltpu.VMEM((C, bn), jnp.float32)],
        compiler_params=pltpu.CompilerParams(
            dimension_semantics=("parallel",),
            vmem_limit_bytes=int(vmem_limit),
        ),
        cost_estimate=cost,
    )(x_flat, w1t, b1r, w2m, b2c)

    return out_flat.reshape(N, C, H, W)


def channel_gate_reference(x, w1, b1, w2, b2):
    pooled = jnp.mean(x, axis=(2, 3))                    # avg_pool2d over full HxW -> (N, C)
    h = jax.nn.relu(pooled @ w1.T + b1)                  # Linear + ReLU
    att = h @ w2.T + b2                                  # Linear
    scale = jax.nn.sigmoid(att)[:, :, None, None]
    return x * scale


if __name__ == "__main__":
    key = jax.random.PRNGKey(0)
    kx, k1, kb1, k2, kb2 = jax.random.split(key, 5)

    # Small shapes consistent with the module: gate_channels must be >= reduction_ratio (16).
    # N=4 exercises the batched path (Bn=2 samples per block, grid of 2 steps).
    N, C, H, W = 4, 128, 16, 16
    reduction_ratio = 16
    Cr = C // reduction_ratio

    x = jax.random.normal(kx, (N, C, H, W), dtype=jnp.float32)
    w1 = 0.1 * jax.random.normal(k1, (Cr, C), dtype=jnp.float32)
    b1 = 0.1 * jax.random.normal(kb1, (Cr,), dtype=jnp.float32)
    w2 = 0.1 * jax.random.normal(k2, (C, Cr), dtype=jnp.float32)
    b2 = 0.1 * jax.random.normal(kb2, (C,), dtype=jnp.float32)

    out = jax.block_until_ready(channel_gate(x, w1, b1, w2, b2))

    ref = channel_gate_reference(x, w1, b1, w2, b2)
    assert out.shape == x.shape
    max_err = float(jnp.max(jnp.abs(out - ref)))
    assert jnp.allclose(out, ref, atol=1e-5, rtol=1e-5), max_err

    print("KERNEL_OK")
</pallas_src>

<mosaic_0001>
module attributes {stable_mosaic.version = 11 : i64} {
  func.func @channel_gate_kernel(%arg0: i32, %arg1: memref<2x128x256xf32, #tpu.memory_space<vmem>>, %arg2: memref<128x8xf32, #tpu.memory_space<vmem>>, %arg3: memref<1x8xf32, #tpu.memory_space<vmem>>, %arg4: memref<128x8xf32, #tpu.memory_space<vmem>>, %arg5: memref<128x1xf32, #tpu.memory_space<vmem>>, %arg6: memref<2x128x256xf32, #tpu.memory_space<vmem>>, %arg7: memref<128x2xf32, #tpu.memory_space<vmem>>) attributes {dimension_semantics = [#tpu.dimension_semantics<parallel>], iteration_bounds = array<i64: 2>, scalar_prefetch = 0 : i64, scratch_operands = 1 : i64, tpu.core_type = #tpu.core_type<tc>, window_params = [{transform_indices = @transform_0, window_bounds = array<i64: 2, 128, 256>}, {pipeline_mode = #tpu.pipeline_mode<synchronous>, transform_indices = @transform_1, window_bounds = array<i64: 128, 8>}, {pipeline_mode = #tpu.pipeline_mode<synchronous>, transform_indices = @transform_2, window_bounds = array<i64: 1, 8>}, {pipeline_mode = #tpu.pipeline_mode<synchronous>, transform_indices = @transform_3, window_bounds = array<i64: 128, 8>}, {pipeline_mode = #tpu.pipeline_mode<synchronous>, transform_indices = @transform_4, window_bounds = array<i64: 128, 1>}, {transform_indices = @transform_5, window_bounds = array<i64: 2, 128, 256>}]} {
    %c0 = arith.constant 0 : index
    %c0_0 = arith.constant 0 : index
    %c0_1 = arith.constant 0 : index
    %0 = vector.load %arg1[%c0, %c0_0, %c0_1] : memref<2x128x256xf32, #tpu.memory_space<vmem>>, vector<1x64x256xf32>
    %1 = vector.shape_cast %0 : vector<1x64x256xf32> to vector<64x256xf32>
    %cst = arith.constant dense<0.000000e+00> : vector<64xf32>
    %2 = vector.multi_reduction <add>, %1, %cst [1] : vector<64x256xf32> to vector<64xf32>
    %3 = vector.shape_cast %2 : vector<64xf32> to vector<64x1xf32>
    %cst_2 = arith.constant 3.906250e-03 : f32
    %4 = vector.broadcast %cst_2 : f32 to vector<64x1xf32>
    %5 = arith.mulf %3, %4 : vector<64x1xf32>
    %c0_3 = arith.constant 0 : index
    %c0_4 = arith.constant 0 : index
    %6 = vector.load %arg7[%c0_3, %c0_4] : memref<128x2xf32, #tpu.memory_space<vmem>>, vector<64x1xf32>
    tpu.vector_store %arg7[%c0_3, %c0_4], %5 {strides = array<i32>} : memref<128x2xf32, #tpu.memory_space<vmem>>, vector<64x1xf32>,
    %c0_5 = arith.constant 0 : index
    %c64 = arith.constant 64 : index
    %c0_6 = arith.constant 0 : index
    %7 = vector.load %arg1[%c0_5, %c64, %c0_6] : memref<2x128x256xf32, #tpu.memory_space<vmem>>, vector<1x64x256xf32>
    %8 = vector.shape_cast %7 : vector<1x64x256xf32> to vector<64x256xf32>
    %cst_7 = arith.constant dense<0.000000e+00> : vector<64xf32>
    %9 = vector.multi_reduction <add>, %8, %cst_7 [1] : vector<64x256xf32> to vector<64xf32>
    %10 = vector.shape_cast %9 : vector<64xf32> to vector<64x1xf32>
    %cst_8 = arith.constant 3.906250e-03 : f32
    %11 = vector.broadcast %cst_8 : f32 to vector<64x1xf32>
    %12 = arith.mulf %10, %11 : vector<64x1xf32>
    %c64_9 = arith.constant 64 : index
    %c0_10 = arith.constant 0 : index
    %13 = vector.load %arg7[%c64_9, %c0_10] : memref<128x2xf32, #tpu.memory_space<vmem>>, vector<64x1xf32>
    tpu.vector_store %arg7[%c64_9, %c0_10], %12 {strides = array<i32>} : memref<128x2xf32, #tpu.memory_space<vmem>>, vector<64x1xf32>,
    %c1 = arith.constant 1 : index
    %c0_11 = arith.constant 0 : index
    %c0_12 = arith.constant 0 : index
    %14 = vector.load %arg1[%c1, %c0_11, %c0_12] : memref<2x128x256xf32, #tpu.memory_space<vmem>>, vector<1x64x256xf32>
    %15 = vector.shape_cast %14 : vector<1x64x256xf32> to vector<64x256xf32>
    %cst_13 = arith.constant dense<0.000000e+00> : vector<64xf32>
    %16 = vector.multi_reduction <add>, %15, %cst_13 [1] : vector<64x256xf32> to vector<64xf32>
    %17 = vector.shape_cast %16 : vector<64xf32> to vector<64x1xf32>
    %cst_14 = arith.constant 3.906250e-03 : f32
    %18 = vector.broadcast %cst_14 : f32 to vector<64x1xf32>
    %19 = arith.mulf %17, %18 : vector<64x1xf32>
    %c0_15 = arith.constant 0 : index
    %c1_16 = arith.constant 1 : index
    %20 = vector.load %arg7[%c0_15, %c1_16] : memref<128x2xf32, #tpu.memory_space<vmem>>, vector<64x1xf32>
    tpu.vector_store %arg7[%c0_15, %c1_16], %19 {strides = array<i32>} : memref<128x2xf32, #tpu.memory_space<vmem>>, vector<64x1xf32>,
    %c1_17 = arith.constant 1 : index
    %c64_18 = arith.constant 64 : index
    %c0_19 = arith.constant 0 : index
    %21 = vector.load %arg1[%c1_17, %c64_18, %c0_19] : memref<2x128x256xf32, #tpu.memory_space<vmem>>, vector<1x64x256xf32>
    %22 = vector.shape_cast %21 : vector<1x64x256xf32> to vector<64x256xf32>
    %cst_20 = arith.constant dense<0.000000e+00> : vector<64xf32>
    %23 = vector.multi_reduction <add>, %22, %cst_20 [1] : vector<64x256xf32> to vector<64xf32>
    %24 = vector.shape_cast %23 : vector<64xf32> to vector<64x1xf32>
    %cst_21 = arith.constant 3.906250e-03 : f32
    %25 = vector.broadcast %cst_21 : f32 to vector<64x1xf32>
    %26 = arith.mulf %24, %25 : vector<64x1xf32>
    %c64_22 = arith.constant 64 : index
    %c1_23 = arith.constant 1 : index
    %27 = vector.load %arg7[%c64_22, %c1_23] : memref<128x2xf32, #tpu.memory_space<vmem>>, vector<64x1xf32>
    tpu.vector_store %arg7[%c64_22, %c1_23], %26 {strides = array<i32>} : memref<128x2xf32, #tpu.memory_space<vmem>>, vector<64x1xf32>,
    %c0_24 = arith.constant 0 : index
    %c0_25 = arith.constant 0 : index
    %28 = vector.load %arg7[%c0_24, %c0_25] : memref<128x2xf32, #tpu.memory_space<vmem>>, vector<128x2xf32>
    %c0_26 = arith.constant 0 : index
    %c0_27 = arith.constant 0 : index
    %29 = vector.load %arg2[%c0_26, %c0_27] : memref<128x8xf32, #tpu.memory_space<vmem>>, vector<128x1xf32>
    %30 = vector.broadcast %29 : vector<128x1xf32> to vector<128x2xf32>
    %31 = arith.mulf %30, %28 : vector<128x2xf32>
    %cst_28 = arith.constant dense<0.000000e+00> : vector<2xf32>
    %32 = vector.multi_reduction <add>, %31, %cst_28 [0] : vector<128x2xf32> to vector<2xf32>
    %33 = vector.shape_cast %32 : vector<2xf32> to vector<1x2xf32>
    %c0_29 = arith.constant 0 : index
    %c0_30 = arith.constant 0 : index
    %34 = vector.load %arg3[%c0_29, %c0_30] : memref<1x8xf32, #tpu.memory_space<vmem>>, vector<1x1xf32>
    %35 = vector.broadcast %34 : vector<1x1xf32> to vector<1x2xf32>
    %36 = arith.addf %33, %35 : vector<1x2xf32>
    %cst_31 = arith.constant 0.000000e+00 : f32
    %37 = vector.broadcast %cst_31 : f32 to vector<1x2xf32>
    %38 = arith.maximumf %36, %37 : vector<1x2xf32>
    %c0_32 = arith.constant 0 : index
    %c0_33 = arith.constant 0 : index
    %39 = vector.load %arg4[%c0_32, %c0_33] : memref<128x8xf32, #tpu.memory_space<vmem>>, vector<128x1xf32>
    %40 = vector.broadcast %39 : vector<128x1xf32> to vector<128x2xf32>
    %41 = vector.broadcast %38 : vector<1x2xf32> to vector<128x2xf32>
    %42 = arith.mulf %40, %41 : vector<128x2xf32>
    %c0_34 = arith.constant 0 : index
    %c1_35 = arith.constant 1 : index
    %43 = vector.load %arg2[%c0_34, %c1_35] : memref<128x8xf32, #tpu.memory_space<vmem>>, vector<128x1xf32>
    %44 = vector.broadcast %43 : vector<128x1xf32> to vector<128x2xf32>
    %45 = arith.mulf %44, %28 : vector<128x2xf32>
    %cst_36 = arith.constant dense<0.000000e+00> : vector<2xf32>
    %46 = vector.multi_reduction <add>, %45, %cst_36 [0] : vector<128x2xf32> to vector<2xf32>
    %47 = vector.shape_cast %46 : vector<2xf32> to vector<1x2xf32>
    %c0_37 = arith.constant 0 : index
    %c1_38 = arith.constant 1 : index
    %48 = vector.load %arg3[%c0_37, %c1_38] : memref<1x8xf32, #tpu.memory_space<vmem>>, vector<1x1xf32>
    %49 = vector.broadcast %48 : vector<1x1xf32> to vector<1x2xf32>
    %50 = arith.addf %47, %49 : vector<1x2xf32>
    %cst_39 = arith.constant 0.000000e+00 : f32
    %51 = vector.broadcast %cst_39 : f32 to vector<1x2xf32>
    %52 = arith.maximumf %50, %51 : vector<1x2xf32>
    %c0_40 = arith.constant 0 : index
    %c1_41 = arith.constant 1 : index
    %53 = vector.load %arg4[%c0_40, %c1_41] : memref<128x8xf32, #tpu.memory_space<vmem>>, vector<128x1xf32>
    %54 = vector.broadcast %53 : vector<128x1xf32> to vector<128x2xf32>
    %55 = vector.broadcast %52 : vector<1x2xf32> to vector<128x2xf32>
    %56 = arith.mulf %54, %55 : vector<128x2xf32>
    %57 = arith.addf %42, %56 : vector<128x2xf32>
    %c0_42 = arith.constant 0 : index
    %c2 = arith.constant 2 : index
    %58 = vector.load %arg2[%c0_42, %c2] : memref<128x8xf32, #tpu.memory_space<vmem>>, vector<128x1xf32>
    %59 = vector.broadcast %58 : vector<128x1xf32> to vector<128x2xf32>
    %60 = arith.mulf %59, %28 : vector<128x2xf32>
    %cst_43 = arith.constant dense<0.000000e+00> : vector<2xf32>
    %61 = vector.multi_reduction <add>, %60, %cst_43 [0] : vector<128x2xf32> to vector<2xf32>
    %62 = vector.shape_cast %61 : vector<2xf32> to vector<1x2xf32>
    %c0_44 = arith.constant 0 : index
    %c2_45 = arith.constant 2 : index
    %63 = vector.load %arg3[%c0_44, %c2_45] : memref<1x8xf32, #tpu.memory_space<vmem>>, vector<1x1xf32>
    %64 = vector.broadcast %63 : vector<1x1xf32> to vector<1x2xf32>
    %65 = arith.addf %62, %64 : vector<1x2xf32>
    %cst_46 = arith.constant 0.000000e+00 : f32
    %66 = vector.broadcast %cst_46 : f32 to vector<1x2xf32>
    %67 = arith.maximumf %65, %66 : vector<1x2xf32>
    %c0_47 = arith.constant 0 : index
    %c2_48 = arith.constant 2 : index
    %68 = vector.load %arg4[%c0_47, %c2_48] : memref<128x8xf32, #tpu.memory_space<vmem>>, vector<128x1xf32>
    %69 = vector.broadcast %68 : vector<128x1xf32> to vector<128x2xf32>
    %70 = vector.broadcast %67 : vector<1x2xf32> to vector<128x2xf32>
    %71 = arith.mulf %69, %70 : vector<128x2xf32>
    %72 = arith.addf %57, %71 : vector<128x2xf32>
    %c0_49 = arith.constant 0 : index
    %c3 = arith.constant 3 : index
    %73 = vector.load %arg2[%c0_49, %c3] : memref<128x8xf32, #tpu.memory_space<vmem>>, vector<128x1xf32>
    %74 = vector.broadcast %73 : vector<128x1xf32> to vector<128x2xf32>
    %75 = arith.mulf %74, %28 : vector<128x2xf32>
    %cst_50 = arith.constant dense<0.000000e+00> : vector<2xf32>
    %76 = vector.multi_reduction <add>, %75, %cst_50 [0] : vector<128x2xf32> to vector<2xf32>
    %77 = vector.shape_cast %76 : vector<2xf32> to vector<1x2xf32>
    %c0_51 = arith.constant 0 : index
    %c3_52 = arith.constant 3 : index
    %78 = vector.load %arg3[%c0_51, %c3_52] : memref<1x8xf32, #tpu.memory_space<vmem>>, vector<1x1xf32>
    %79 = vector.broadcast %78 : vector<1x1xf32> to vector<1x2xf32>
    %80 = arith.addf %77, %79 : vector<1x2xf32>
    %cst_53 = arith.constant 0.000000e+00 : f32
    %81 = vector.broadcast %cst_53 : f32 to vector<1x2xf32>
    %82 = arith.maximumf %80, %81 : vector<1x2xf32>
    %c0_54 = arith.constant 0 : index
    %c3_55 = arith.constant 3 : index
    %83 = vector.load %arg4[%c0_54, %c3_55] : memref<128x8xf32, #tpu.memory_space<vmem>>, vector<128x1xf32>
    %84 = vector.broadcast %83 : vector<128x1xf32> to vector<128x2xf32>
    %85 = vector.broadcast %82 : vector<1x2xf32> to vector<128x2xf32>
    %86 = arith.mulf %84, %85 : vector<128x2xf32>
    %87 = arith.addf %72, %86 : vector<128x2xf32>
    %c0_56 = arith.constant 0 : index
    %c4 = arith.constant 4 : index
    %88 = vector.load %arg2[%c0_56, %c4] : memref<128x8xf32, #tpu.memory_space<vmem>>, vector<128x1xf32>
    %89 = vector.broadcast %88 : vector<128x1xf32> to vector<128x2xf32>
    %90 = arith.mulf %89, %28 : vector<128x2xf32>
    %cst_57 = arith.constant dense<0.000000e+00> : vector<2xf32>
    %91 = vector.multi_reduction <add>, %90, %cst_57 [0] : vector<128x2xf32> to vector<2xf32>
    %92 = vector.shape_cast %91 : vector<2xf32> to vector<1x2xf32>
    %c0_58 = arith.constant 0 : index
    %c4_59 = arith.constant 4 : index
    %93 = vector.load %arg3[%c0_58, %c4_59] : memref<1x8xf32, #tpu.memory_space<vmem>>, vector<1x1xf32>
    %94 = vector.broadcast %93 : vector<1x1xf32> to vector<1x2xf32>
    %95 = arith.addf %92, %94 : vector<1x2xf32>
    %cst_60 = arith.constant 0.000000e+00 : f32
    %96 = vector.broadcast %cst_60 : f32 to vector<1x2xf32>
    %97 = arith.maximumf %95, %96 : vector<1x2xf32>
    %c0_61 = arith.constant 0 : index
    %c4_62 = arith.constant 4 : index
    %98 = vector.load %arg4[%c0_61, %c4_62] : memref<128x8xf32, #tpu.memory_space<vmem>>, vector<128x1xf32>
    %99 = vector.broadcast %98 : vector<128x1xf32> to vector<128x2xf32>
    %100 = vector.broadcast %97 : vector<1x2xf32> to vector<128x2xf32>
    %101 = arith.mulf %99, %100 : vector<128x2xf32>
    %102 = arith.addf %87, %101 : vector<128x2xf32>
    %c0_63 = arith.constant 0 : index
    %c5 = arith.constant 5 : index
    %103 = vector.load %arg2[%c0_63, %c5] : memref<128x8xf32, #tpu.memory_space<vmem>>, vector<128x1xf32>
    %104 = vector.broadcast %103 : vector<128x1xf32> to vector<128x2xf32>
    %105 = arith.mulf %104, %28 : vector<128x2xf32>
    %cst_64 = arith.constant dense<0.000000e+00> : vector<2xf32>
    %106 = vector.multi_reduction <add>, %105, %cst_64 [0] : vector<128x2xf32> to vector<2xf32>
    %107 = vector.shape_cast %106 : vector<2xf32> to vector<1x2xf32>
    %c0_65 = arith.constant 0 : index
    %c5_66 = arith.constant 5 : index
    %108 = vector.load %arg3[%c0_65, %c5_66] : memref<1x8xf32, #tpu.memory_space<vmem>>, vector<1x1xf32>
    %109 = vector.broadcast %108 : vector<1x1xf32> to vector<1x2xf32>
    %110 = arith.addf %107, %109 : vector<1x2xf32>
    %cst_67 = arith.constant 0.000000e+00 : f32
    %111 = vector.broadcast %cst_67 : f32 to vector<1x2xf32>
    %112 = arith.maximumf %110, %111 : vector<1x2xf32>
    %c0_68 = arith.constant 0 : index
    %c5_69 = arith.constant 5 : index
    %113 = vector.load %arg4[%c0_68, %c5_69] : memref<128x8xf32, #tpu.memory_space<vmem>>, vector<128x1xf32>
    %114 = vector.broadcast %113 : vector<128x1xf32> to vector<128x2xf32>
    %115 = vector.broadcast %112 : vector<1x2xf32> to vector<128x2xf32>
    %116 = arith.mulf %114, %115 : vector<128x2xf32>
    %117 = arith.addf %102, %116 : vector<128x2xf32>
    %c0_70 = arith.constant 0 : index
    %c6 = arith.constant 6 : index
    %118 = vector.load %arg2[%c0_70, %c6] : memref<128x8xf32, #tpu.memory_space<vmem>>, vector<128x1xf32>
    %119 = vector.broadcast %118 : vector<128x1xf32> to vector<128x2xf32>
    %120 = arith.mulf %119, %28 : vector<128x2xf32>
    %cst_71 = arith.constant dense<0.000000e+00> : vector<2xf32>
    %121 = vector.multi_reduction <add>, %120, %cst_71 [0] : vector<128x2xf32> to vector<2xf32>
    %122 = vector.shape_cast %121 : vector<2xf32> to vector<1x2xf32>
    %c0_72 = arith.constant 0 : index
    %c6_73 = arith.constant 6 : index
    %123 = vector.load %arg3[%c0_72, %c6_73] : memref<1x8xf32, #tpu.memory_space<vmem>>, vector<1x1xf32>
    %124 = vector.broadcast %123 : vector<1x1xf32> to vector<1x2xf32>
    %125 = arith.addf %122, %124 : vector<1x2xf32>
    %cst_74 = arith.constant 0.000000e+00 : f32
    %126 = vector.broadcast %cst_74 : f32 to vector<1x2xf32>
    %127 = arith.maximumf %125, %126 : vector<1x2xf32>
    %c0_75 = arith.constant 0 : index
    %c6_76 = arith.constant 6 : index
    %128 = vector.load %arg4[%c0_75, %c6_76] : memref<128x8xf32, #tpu.memory_space<vmem>>, vector<128x1xf32>
    %129 = vector.broadcast %128 : vector<128x1xf32> to vector<128x2xf32>
    %130 = vector.broadcast %127 : vector<1x2xf32> to vector<128x2xf32>
    %131 = arith.mulf %129, %130 : vector<128x2xf32>
    %132 = arith.addf %117, %131 : vector<128x2xf32>
    %c0_77 = arith.constant 0 : index
    %c7 = arith.constant 7 : index
    %133 = vector.load %arg2[%c0_77, %c7] : memref<128x8xf32, #tpu.memory_space<vmem>>, vector<128x1xf32>
    %134 = vector.broadcast %133 : vector<128x1xf32> to vector<128x2xf32>
    %135 = arith.mulf %134, %28 : vector<128x2xf32>
    %cst_78 = arith.constant dense<0.000000e+00> : vector<2xf32>
    %136 = vector.multi_reduction <add>, %135, %cst_78 [0] : vector<128x2xf32> to vector<2xf32>
    %137 = vector.shape_cast %136 : vector<2xf32> to vector<1x2xf32>
    %c0_79 = arith.constant 0 : index
    %c7_80 = arith.constant 7 : index
    %138 = vector.load %arg3[%c0_79, %c7_80] : memref<1x8xf32, #tpu.memory_space<vmem>>, vector<1x1xf32>
    %139 = vector.broadcast %138 : vector<1x1xf32> to vector<1x2xf32>
    %140 = arith.addf %137, %139 : vector<1x2xf32>
    %cst_81 = arith.constant 0.000000e+00 : f32
    %141 = vector.broadcast %cst_81 : f32 to vector<1x2xf32>
    %142 = arith.maximumf %140, %141 : vector<1x2xf32>
    %c0_82 = arith.constant 0 : index
    %c7_83 = arith.constant 7 : index
    %143 = vector.load %arg4[%c0_82, %c7_83] : memref<128x8xf32, #tpu.memory_space<vmem>>, vector<128x1xf32>
    %144 = vector.broadcast %143 : vector<128x1xf32> to vector<128x2xf32>
    %145 = vector.broadcast %142 : vector<1x2xf32> to vector<128x2xf32>
    %146 = arith.mulf %144, %145 : vector<128x2xf32>
    %147 = arith.addf %132, %146 : vector<128x2xf32>
    %c0_84 = arith.constant 0 : index
    %c0_85 = arith.constant 0 : index
    %148 = vector.load %arg5[%c0_84, %c0_85] : memref<128x1xf32, #tpu.memory_space<vmem>>, vector<128x1xf32>
    %149 = vector.broadcast %148 : vector<128x1xf32> to vector<128x2xf32>
    %150 = arith.addf %147, %149 : vector<128x2xf32>
    %151 = arith.negf %150 : vector<128x2xf32>
    %152 = math.exp %151 : vector<128x2xf32>
    %cst_86 = arith.constant 1.000000e+00 : f32
    %153 = vector.broadcast %cst_86 : f32 to vector<128x2xf32>
    %154 = arith.addf %153, %152 : vector<128x2xf32>
    %155 = arith.divf %153, %154 : vector<128x2xf32>
    %c0_87 = arith.constant 0 : index
    %c0_88 = arith.constant 0 : index
    %156 = vector.load %arg7[%c0_87, %c0_88] : memref<128x2xf32, #tpu.memory_space<vmem>>, vector<128x2xf32>
    tpu.vector_store %arg7[%c0_87, %c0_88], %155 {strides = array<i32>} : memref<128x2xf32, #tpu.memory_space<vmem>>, vector<128x2xf32>,
    %c0_89 = arith.constant 0 : index
    %c0_90 = arith.constant 0 : index
    %c0_91 = arith.constant 0 : index
    %157 = vector.load %arg1[%c0_89, %c0_90, %c0_91] : memref<2x128x256xf32, #tpu.memory_space<vmem>>, vector<1x64x256xf32>
    %158 = vector.shape_cast %157 : vector<1x64x256xf32> to vector<64x256xf32>
    %c0_92 = arith.constant 0 : index
    %c0_93 = arith.constant 0 : index
    %159 = vector.load %arg7[%c0_92, %c0_93] : memref<128x2xf32, #tpu.memory_space<vmem>>, vector<64x1xf32>
    %160 = vector.broadcast %159 : vector<64x1xf32> to vector<64x256xf32>
    %161 = arith.mulf %158, %160 : vector<64x256xf32>
    %c0_94 = arith.constant 0 : index
    %c0_95 = arith.constant 0 : index
    %c0_96 = arith.constant 0 : index
    %162 = vector.load %arg6[%c0_94, %c0_95, %c0_96] : memref<2x128x256xf32, #tpu.memory_space<vmem>>, vector<1x64x256xf32>
    %163 = vector.shape_cast %162 : vector<1x64x256xf32> to vector<64x256xf32>
    %164 = vector.shape_cast %161 : vector<64x256xf32> to vector<1x64x256xf32>
    tpu.vector_store %arg6[%c0_94, %c0_95, %c0_96], %164 {strides = array<i32>} : memref<2x128x256xf32, #tpu.memory_space<vmem>>, vector<1x64x256xf32>,
    %c0_97 = arith.constant 0 : index
    %c64_98 = arith.constant 64 : index
    %c0_99 = arith.constant 0 : index
    %165 = vector.load %arg1[%c0_97, %c64_98, %c0_99] : memref<2x128x256xf32, #tpu.memory_space<vmem>>, vector<1x64x256xf32>
    %166 = vector.shape_cast %165 : vector<1x64x256xf32> to vector<64x256xf32>
    %c64_100 = arith.constant 64 : index
    %c0_101 = arith.constant 0 : index
    %167 = vector.load %arg7[%c64_100, %c0_101] : memref<128x2xf32, #tpu.memory_space<vmem>>, vector<64x1xf32>
    %168 = vector.broadcast %167 : vector<64x1xf32> to vector<64x256xf32>
    %169 = arith.mulf %166, %168 : vector<64x256xf32>
    %c0_102 = arith.constant 0 : index
    %c64_103 = arith.constant 64 : index
    %c0_104 = arith.constant 0 : index
    %170 = vector.load %arg6[%c0_102, %c64_103, %c0_104] : memref<2x128x256xf32, #tpu.memory_space<vmem>>, vector<1x64x256xf32>
    %171 = vector.shape_cast %170 : vector<1x64x256xf32> to vector<64x256xf32>
    %172 = vector.shape_cast %169 : vector<64x256xf32> to vector<1x64x256xf32>
    tpu.vector_store %arg6[%c0_102, %c64_103, %c0_104], %172 {strides = array<i32>} : memref<2x128x256xf32, #tpu.memory_space<vmem>>, vector<1x64x256xf32>,
    %c1_105 = arith.constant 1 : index
    %c0_106 = arith.constant 0 : index
    %c0_107 = arith.constant 0 : index
    %173 = vector.load %arg1[%c1_105, %c0_106, %c0_107] : memref<2x128x256xf32, #tpu.memory_space<vmem>>, vector<1x64x256xf32>
    %174 = vector.shape_cast %173 : vector<1x64x256xf32> to vector<64x256xf32>
    %c0_108 = arith.constant 0 : index
    %c1_109 = arith.constant 1 : index
    %175 = vector.load %arg7[%c0_108, %c1_109] : memref<128x2xf32, #tpu.memory_space<vmem>>, vector<64x1xf32>
    %176 = vector.broadcast %175 : vector<64x1xf32> to vector<64x256xf32>
    %177 = arith.mulf %174, %176 : vector<64x256xf32>
    %c1_110 = arith.constant 1 : index
    %c0_111 = arith.constant 0 : index
    %c0_112 = arith.constant 0 : index
    %178 = vector.load %arg6[%c1_110, %c0_111, %c0_112] : memref<2x128x256xf32, #tpu.memory_space<vmem>>, vector<1x64x256xf32>
    %179 = vector.shape_cast %178 : vector<1x64x256xf32> to vector<64x256xf32>
    %180 = vector.shape_cast %177 : vector<64x256xf32> to vector<1x64x256xf32>
    tpu.vector_store %arg6[%c1_110, %c0_111, %c0_112], %180 {strides = array<i32>} : memref<2x128x256xf32, #tpu.memory_space<vmem>>, vector<1x64x256xf32>,
    %c1_113 = arith.constant 1 : index
    %c64_114 = arith.constant 64 : index
    %c0_115 = arith.constant 0 : index
    %181 = vector.load %arg1[%c1_113, %c64_114, %c0_115] : memref<2x128x256xf32, #tpu.memory_space<vmem>>, vector<1x64x256xf32>
    %182 = vector.shape_cast %181 : vector<1x64x256xf32> to vector<64x256xf32>
    %c64_116 = arith.constant 64 : index
    %c1_117 = arith.constant 1 : index
    %183 = vector.load %arg7[%c64_116, %c1_117] : memref<128x2xf32, #tpu.memory_space<vmem>>, vector<64x1xf32>
    %184 = vector.broadcast %183 : vector<64x1xf32> to vector<64x256xf32>
    %185 = arith.mulf %182, %184 : vector<64x256xf32>
    %c1_118 = arith.constant 1 : index
    %c64_119 = arith.constant 64 : index
    %c0_120 = arith.constant 0 : index
    %186 = vector.load %arg6[%c1_118, %c64_119, %c0_120] : memref<2x128x256xf32, #tpu.memory_space<vmem>>, vector<1x64x256xf32>
    %187 = vector.shape_cast %186 : vector<1x64x256xf32> to vector<64x256xf32>
    %188 = vector.shape_cast %185 : vector<64x256xf32> to vector<1x64x256xf32>
    tpu.vector_store %arg6[%c1_118, %c64_119, %c0_120], %188 {strides = array<i32>} : memref<2x128x256xf32, #tpu.memory_space<vmem>>, vector<1x64x256xf32>,
    return
  }
  func.func @transform_0(%arg0: i32) -> (i32, i32, i32) {
    %c0_i32 = arith.constant 0 : i32
    %c0_i32_0 = arith.constant 0 : i32
    %c0_i32_1 = arith.constant 0 : i32
    return %arg0, %c0_i32, %c0_i32_0 : i32, i32, i32
  }
  func.func @transform_1(%arg0: i32) -> (i32, i32) {
    %c0_i32 = arith.constant 0 : i32
    %c0_i32_0 = arith.constant 0 : i32
    %c0_i32_1 = arith.constant 0 : i32
    return %c0_i32, %c0_i32_0 : i32, i32
  }
  func.func @transform_2(%arg0: i32) -> (i32, i32) {
    %c0_i32 = arith.constant 0 : i32
    %c0_i32_0 = arith.constant 0 : i32
    %c0_i32_1 = arith.constant 0 : i32
    return %c0_i32, %c0_i32_0 : i32, i32
  }
  func.func @transform_3(%arg0: i32) -> (i32, i32) {
    %c0_i32 = arith.constant 0 : i32
    %c0_i32_0 = arith.constant 0 : i32
    %c0_i32_1 = arith.constant 0 : i32
    return %c0_i32, %c0_i32_0 : i32, i32
  }
  func.func @transform_4(%arg0: i32) -> (i32, i32) {
    %c0_i32 = arith.constant 0 : i32
    %c0_i32_0 = arith.constant 0 : i32
    %c0_i32_1 = arith.constant 0 : i32
    return %c0_i32, %c0_i32_0 : i32, i32
  }
  func.func @transform_5(%arg0: i32) -> (i32, i32, i32) {
    %c0_i32 = arith.constant 0 : i32
    %c0_i32_0 = arith.constant 0 : i32
    %c0_i32_1 = arith.constant 0 : i32
    return %arg0, %c0_i32, %c0_i32_0 : i32, i32, i32
  }
}

</mosaic_0001>

<bundles_post_ra>
// kernel: tpu_custom_call.1
= control target key start
LH: loop header
LB: loop body
LE: loop exit
PB: predicated region body
PF: predicated region fallthrough
CT: control target
= control target key end

     0   :  { %10 = vsyncpa [#allocation4], 0  ;;  %s5865_s0 = inlined_call_operand.hbm [shape: f32[4,128,256], index: 0, kind: input, shape index: {}]   ;;  %s5866_s1 = inlined_call_operand.vmem [shape: f32[128,8], index: 1, kind: input, shape index: {}]   ;;  %s5867_s2 = inlined_call_operand.vmem [shape: f32[1,8], index: 2, kind: input, shape index: {}]   ;;  %s5868_s3 = inlined_call_operand.vmem [shape: f32[128,8], index: 3, kind: input, shape index: {}]   ;;  %s5869_s4 = inlined_call_operand.vmem [shape: f32[128,1], index: 4, kind: input, shape index: {}]   ;;  %s5870_s5 = inlined_call_operand.hbm [shape: f32[4,128,256], index: 5, kind: output, shape index: {}]  }
   0x1   :  { %12 = vsyncpa [#allocation4 + $0x1], 0 }
   0x2   :  { %13 = vsyncpa [#allocation5], 0 }
   0x3   :  { %15 = vsyncpa [#allocation5 + $0x1], 0  ;;  %s3475_s18 = smov 0   ;;  %s3477_s19 = smov 0  }
   0x4   :  { %s3479_s20 = smov 0   ;;  %s3481_s21 = smov 0  }
   0x5 LB: > { %s3496_s22 = sadd.s32 4294967295, %s3429_s21   ;;  %s3021_s23 = sadd.s32 4294967294, %s3429_s21   ;;  %s3429_s21 = sphi %s3481_s21, %s6378_s21   ;;  %s3425_s20 = sphi %s3479_s20, %s6377_s20   ;;  %s3421_s19 = sphi %s3477_s19, %s6376_s19   ;;  %s3417_s18 = sphi %s3475_s18, %s6375_s18  }
   0x6   : > { %s3500_s24 = sadd.s32 1, %s3429_s21   ;;  %s28_s25 = sadd.s32 1, %s3425_s20 }
   0x7   : > { %s25_s26 = ssub.s32 %s3429_s21, %s3500_s24  ;;  %p35_p0 = scmp.ne.s32.totalorder %s3425_s20, %s3421_s19 }
   0x8   : > { %p26_p1 = scmp.eq.s32.totalorder %s25_s26, 0  ;;  %p36_p2 = scmp.eq.s32.totalorder %s3429_s21, 0 }
   0x9   : > { %p41_p3 = scmp.ne.s32.totalorder %s3421_s19, %s3417_s18  ;;  %p42_p4 = scmp.eq.s32.totalorder %s3496_s22, 0 }
   0xa   : > { %s3512_s27 = scalar_select %p26_p1, %s3425_s20, %s28_s25  }
   0xb   : > { %p3514_p5 = por %p36_p2, %p35_p0  ;;  %p3518_p6 = por %p42_p4, %p41_p3 }
   0xc   : > { %p149_p7 = scmp.eq.s32.totalorder %s3496_s22, 1  ;;  %p155_p8 = scmp.eq.s32.totalorder %s3021_s23, 1 }
   0xd   : > { %p3165_p10 = scmp.lt.s32.totalorder %s3429_s21, 2  ;;  %s187_s7 = sand.u32 1, %s3425_s20  }
   0xe   : > { %p3525_p11 = por %p149_p7, %p35_p0  ;;  %p3529_p12 = por %p155_p8, %p41_p3 }
   0xf   : > { %s3150_s8 = sshll.u32 %s3429_s21, 13  ;;  %s3024_s9 = sshll.u32 %s187_s7, 9 }
  0x10   : > { %s5888_s30 = scalar_select %p3525_p11, 1, 0 }
  0x11   : > { %s5889_s6 = scalar_select %p3529_p12, 1, 0 }
  0x12   : > { %s3538_s12 = scalar_lea.hbm %s5865_s0, %s3150_s8  ;;  %s191_s13 = scalar_lea.vmem [#allocation3], %s3024_s9 }
  0x13   : > { %s199_s14 = sshll.u32 %s191_s13, 4  ;;  %p3542_p13 = pnand %p3165_p10, %p3514_p5  ;;  %s3546_s14 = int_to_ptr.vmem [resolvable:$true] %s199_s14 }
  0x14   : > { %s3548_s16 = scalar_lea.sflag [#allocation4], %s187_s7  ;;  %s3333_s17 = scalar_lea.hbm %s3538_s12, 8192 }
  0x15   : > { %p3334_p0 = scmp.ne.s32.totalorder %s3538_s12, %s3333_s17  ;;  %p3335_p1 = pneg %p3542_p13 }
  0x16   : > { %s3338_s26 = scalar_lea.hbm %s5865_s0, 16384  ;;  %p3339_p4 = scmp.lt.u32.totalorder %s3538_s12, %s5865_s0 }
  0x17   : > { %p3336_p2 = pnand %p3335_p1, %p3334_p0  ;;  %p3340_p5 = scmp.lt.u32.totalorder %s3338_s26, %s3333_s17 }
  0x18   : > { %p3342_p8 = scmp.lt.u32.totalorder %s3333_s17, %s3538_s12 }
  0x19   : > { %p3337_p3 = pneg %p3336_p2  ;;  %p3341_p7 = por %p3340_p5, %p3339_p4 }
  0x1b   : > { %p3343_p10 = por %p3342_p8, %p3341_p7 }
  0x1d   : > { %p3344_p9 = pnand %p3343_p10, %p3337_p3 }
  0x1f   : > { %3347 = shalt.err (!%p3344_p9)
}
  0x20   : > { %s3348_s7 = scalar_lea.vmem %s3546_s14, 8192  ;;  %s3431_s9 = smov [#allocation3]  }
  0x21   : > { %p3349_p0 = scmp.ne.s32.totalorder %s3546_s14, %s3348_s7  ;;  %s3353_s10 = sshll.u32 %s3431_s9, 4  ;;  %s3354_s10 = int_to_ptr.vmem [resolvable:$false] %s3353_s10 }
  0x22   : > { %s3355_s11 = scalar_lea.vmem %s3354_s10, 16384  ;;  %p3356_p11 = scmp.lt.s32.totalorder %s3546_s14, %s3354_s10 }
  0x23   : > { %p3351_p2 = pnand %p3349_p0, %p3335_p1  ;;  %p3357_p4 = scmp.lt.s32.totalorder %s3355_s11, %s3348_s7 }
  0x25   : > { %p3352_p12 = pneg %p3351_p2  ;;  %p3358_p5 = por %p3357_p4, %p3356_p11 }
  0x27   : > { %p3359_p7 = pnand %p3358_p5, %p3352_p12 }
  0x29   : > { %3362 = shalt.err (!%p3359_p7)
}
  0x2a   : > { %s3432_s13 = smov 256   ;;  %s3433_s17 = smov 16  }
  0x2b   : > { %3160 = dma.hbm_to_vmem [thread:$0]  (!%p3542_p13), %s3538_s12, 8192, %s3546_s14, %s3548_s16, %s3432_s13, %s3432_s13, %s3433_s17  }
  0x2c   : > { %p3028_p9 = scmp.ge.s32.totalorder %s3429_s21, 1  ;;  %p207_p1 = scmp.lt.s32.totalorder %s3429_s21, 3 }
  0x2e   : > { %p208_p3 = pnand %p3028_p9, %p207_p1 }
  0x30   : > { %211 = sbr.rel (%p208_p3) target bundleno = 1090 (0x442), region = 40 }
  0x37   : > { %s3579_s23 = sand.u32 1, %s3421_s19  }
  0x38   : > { %s3029_s25 = sshll.u32 %s3579_s23, 9  ;;  %s214_s26 = scalar_lea.sflag [#allocation4], %s3579_s23 }
  0x39   : > { %s3585_s28 = scalar_lea.vmem [#allocation3], %s3029_s25 }
  0x3a   : > { %3408 = dma.done.wait (%p3518_p6), %s214_s26, 8192  }
  0x3b   : > { %3410 = vsyncadd (%p3518_p6), %s214_s26, 4294959104  ;;  %v5874_v0 = vmov 0   ;;  %v5872_v1 = vmov 1   ;;  %v250_v2 = vld [vmem:[%s3585_s28 + $0x20] sm:$0xff]  ;;  %v251_v3 = vld [vmem:[%s3585_s28 + $0x28] sm:$0xff]  ;;  %vm294_vm0 = vcmask 7168  }
  0x3c   : > { %3211 = vset.pattern.permute.xlu1 %v5874_v0  ;;  %3212 = vset.pattern.permute.xlu0 %v5872_v1  ;;  %v246_v4 = vld [vmem:[%s3585_s28] sm:$0xff]  ;;  %v268_v5 = vadd.f32 %v251_v3, %v250_v2  ;;  %v247_v6 = vld [vmem:[%s3585_s28 + $0x8] sm:$0xff]  ;;  %v252_v7 = vld [vmem:[%s3585_s28 + $0x30] sm:$0xff]  ;;  %vm408_vm1 = vcmask 15368   ;;  %vm601_vm2 = vcmask 15360   ;;  %s5688_s14 = scalar_lea.vmem [#allocation6], %s3029_s25 }
  0x3d   : > { %v253_v8 = vld [vmem:[%s3585_s28 + $0x38] sm:$0xff]  ;;  %v262_v9 = vadd.f32 %v247_v6, %v246_v4  ;;  %v248_v10 = vld [vmem:[%s3585_s28 + $0x10] sm:$0xff]  ;;  %v254_v16 = vld [vmem:[%s3585_s28 + $0x40] sm:$0xff]  ;;  %s3152_s25 = sshll.u32 %s3496_s22, 13  ;;  %s2948_s15 = sshll.u32 %s5688_s14, 4  ;;  %s5819_s15 = int_to_ptr.vmem [resolvable:$true] %s2948_s15 }
  0x3e   : > { %v249_v11 = vld [vmem:[%s3585_s28 + $0x18] sm:$0xff]  ;;  %269 = vadd.xlane.f32.xlu1 %v268_v5  ;;  %v271_v12 = vadd.f32 %v253_v8, %v252_v7  ;;  %v256_v14 = vld [vmem:[%s3585_s28 + $0x50] sm:$0xff]  ;;  %v255_v17 = vld [vmem:[%s3585_s28 + $0x48] sm:$0xff]  ;;  %s5817_s7 = scalar_lea.hbm %s5870_s5, %s3152_s25  ;;  %s2934_s22 = scalar_lea.sflag [#allocation5], %s3579_s23 }
  0x3f   : > { %263 = vadd.xlane.f32.xlu0 %v262_v9  ;;  %v265_v13 = vadd.f32 %v249_v11, %v248_v10  ;;  %v257_v15 = vld [vmem:[%s3585_s28 + $0x58] sm:$0xff]  ;;  %v274_v19 = vadd.f32 %v255_v17, %v254_v16  ;;  %v260_v20 = vld [vmem:[%s3585_s28 + $0x70] sm:$0xff]  ;;  %v258_v22 = vld [vmem:[%s3585_s28 + $0x60] sm:$0xff]  ;;  %s3363_s9 = scalar_lea.vmem %s5819_s15, 8192  ;;  %p6372_p11 = scmp.ne.s32.totalorder %s5888_s30, 0 }
  0x40   : > { %v277_v18 = vadd.f32 %v257_v15, %v256_v14  ;;  %v261_v21 = vld [vmem:[%s3585_s28 + $0x78] sm:$0xff]  ;;  %v259_v23 = vld [vmem:[%s3585_s28 + $0x68] sm:$0xff]  ;;  %v305_v26 = vld [vmem:[%s3585_s28 + $0x90] sm:$0xff]  ;;  %p3364_p6 = scmp.ne.s32.totalorder %s5819_s15, %s3363_s9 }
  0x41   : > { %v283_v24 = vadd.f32 %v261_v21, %v260_v20  ;;  %v280_v25 = vadd.f32 %v259_v23, %v258_v22  ;;  %v306_v27 = vld [vmem:[%s3585_s28 + $0x98] sm:$0xff]  ;;  %v303_v28 = vld [vmem:[%s3585_s28 + $0x80] sm:$0xff]  ;;  %v304_v29 = vld [vmem:[%s3585_s28 + $0x88] sm:$0xff] }
  0x42   : > { %272 = vadd.xlane.f32.xlu1 %v271_v12  ;;  %v322_v30 = vadd.f32 %v306_v27, %v305_v26  ;;  %v319_v31 = vadd.f32 %v304_v29, %v303_v28  ;;  %v309_v32 = vld [vmem:[%s3585_s28 + $0xb0] sm:$0xff]  ;;  %v310_v33 = vld [vmem:[%s3585_s28 + $0xb8] sm:$0xff]  ;;  %v307_v34 = vld [vmem:[%s3585_s28 + $0xa0] sm:$0xff]  ;;  %p3365_p12 = pnand %p3364_p6, %p6372_p11 }
  0x43   : > { %266 = vadd.xlane.f32.xlu0 %v265_v13  ;;  %v308_v35 = vld [vmem:[%s3585_s28 + $0xa8] sm:$0xff]  ;;  %v328_v36 = vadd.f32 %v310_v33, %v309_v32  ;;  %v313_v38 = vld [vmem:[%s3585_s28 + $0xd0] sm:$0xff]  ;;  %v314_v39 = vld [vmem:[%s3585_s28 + $0xd8] sm:$0xff] }
  0x44   : > { %v325_v37 = vadd.f32 %v308_v35, %v307_v34  ;;  %v311_v40 = vld [vmem:[%s3585_s28 + $0xc0] sm:$0xff]  ;;  %v312_v41 = vld [vmem:[%s3585_s28 + $0xc8] sm:$0xff]  ;;  %v334_v42 = vadd.f32 %v314_v39, %v313_v38  ;;  %v317_v44 = vld [vmem:[%s3585_s28 + $0xf0] sm:$0xff]  ;;  %p3366_p13 = pneg %p3365_p12 }
  0x45   : > { %v331_v43 = vadd.f32 %v312_v41, %v311_v40  ;;  %v318_v45 = vld [vmem:[%s3585_s28 + $0xf8] sm:$0xff]  ;;  %v315_v46 = vld [vmem:[%s3585_s28 + $0xe0] sm:$0xff]  ;;  %v316_v47 = vld [vmem:[%s3585_s28 + $0xe8] sm:$0xff] }
  0x46   : > { %278 = vadd.xlane.f32.xlu1 %v277_v18  ;;  %v340_v48 = vadd.f32 %v318_v45, %v317_v44  ;;  %v337_v49 = vadd.f32 %v316_v47, %v315_v46  ;;  %v3033_v50 = vld [vmem:[%s3585_s28 + $0x110] sm:$0xff]  ;;  %v3034_v51 = vld [vmem:[%s3585_s28 + $0x118] sm:$0xff]  ;;  %v3031_v52 = vld [vmem:[%s3585_s28 + $0x100] sm:$0xff] }
  0x47   : > { %275 = vadd.xlane.f32.xlu0 %v274_v19  ;;  %v3032_v53 = vld [vmem:[%s3585_s28 + $0x108] sm:$0xff]  ;;  %v379_v54 = vadd.f32 %v3034_v51, %v3033_v50  ;;  %v3037_v56 = vld [vmem:[%s3585_s28 + $0x130] sm:$0xff]  ;;  %v3038_v57 = vld [vmem:[%s3585_s28 + $0x138] sm:$0xff] }
  0x48   : > { %v376_v55 = vadd.f32 %v3032_v53, %v3031_v52  ;;  %v3035_v58 = vld [vmem:[%s3585_s28 + $0x120] sm:$0xff]  ;;  %v3036_v59 = vld [vmem:[%s3585_s28 + $0x128] sm:$0xff]  ;;  %v385_v60 = vadd.f32 %v3038_v57, %v3037_v56  ;;  %v3041_v62 = vld [vmem:[%s3585_s28 + $0x150] sm:$0xff] }
  0x49   : > { %v382_v61 = vadd.f32 %v3036_v59, %v3035_v58  ;;  %v3042_v63 = vld [vmem:[%s3585_s28 + $0x158] sm:$0xff]  ;;  %v3039_v2 = vld [vmem:[%s3585_s28 + $0x140] sm:$0xff]  ;;  %v3040_v3 = vld [vmem:[%s3585_s28 + $0x148] sm:$0xff] }
  0x4a   : > { %284 = vadd.xlane.f32.xlu1 %v283_v24  ;;  %v391_v4 = vadd.f32 %v3042_v63, %v3041_v62  ;;  %v388_v5 = vadd.f32 %v3040_v3, %v3039_v2  ;;  %v3045_v6 = vld [vmem:[%s3585_s28 + $0x170] sm:$0xff]  ;;  %v3046_v7 = vld [vmem:[%s3585_s28 + $0x178] sm:$0xff]  ;;  %v3043_v8 = vld [vmem:[%s3585_s28 + $0x160] sm:$0xff] }
  0x4b   : > { %281 = vadd.xlane.f32.xlu0 %v280_v25  ;;  %v3044_v9 = vld [vmem:[%s3585_s28 + $0x168] sm:$0xff]  ;;  %v397_v10 = vadd.f32 %v3046_v7, %v3045_v6  ;;  %v3049_v12 = vld [vmem:[%s3585_s28 + $0x190] sm:$0xff]  ;;  %v3050_v13 = vld [vmem:[%s3585_s28 + $0x198] sm:$0xff] }
  0x4c   : > { %v394_v11 = vadd.f32 %v3044_v9, %v3043_v8  ;;  %v3047_v14 = vld [vmem:[%s3585_s28 + $0x180] sm:$0xff]  ;;  %v3048_v15 = vld [vmem:[%s3585_s28 + $0x188] sm:$0xff]  ;;  %v436_v16 = vadd.f32 %v3050_v13, %v3049_v12  ;;  %v3053_v18 = vld [vmem:[%s3585_s28 + $0x1b0] sm:$0xff]  ;;  %v3436_v13 = vmov 2  }
  0x4d   : > { %v433_v17 = vadd.f32 %v3048_v15, %v3047_v14  ;;  %v3054_v19 = vld [vmem:[%s3585_s28 + $0x1b8] sm:$0xff]  ;;  %v3051_v20 = vld [vmem:[%s3585_s28 + $0x1a0] sm:$0xff]  ;;  %v3052_v21 = vld [vmem:[%s3585_s28 + $0x1a8] sm:$0xff] }
  0x4e   : > { %323 = vadd.xlane.f32.xlu1 %v322_v30  ;;  %v442_v22 = vadd.f32 %v3054_v19, %v3053_v18  ;;  %v439_v23 = vadd.f32 %v3052_v21, %v3051_v20  ;;  %v3057_v24 = vld [vmem:[%s3585_s28 + $0x1d0] sm:$0xff]  ;;  %v3058_v25 = vld [vmem:[%s3585_s28 + $0x1d8] sm:$0xff]  ;;  %v3055_v26 = vld [vmem:[%s3585_s28 + $0x1c0] sm:$0xff] }
  0x4f   : > { %320 = vadd.xlane.f32.xlu0 %v319_v31  ;;  %v3056_v27 = vld [vmem:[%s3585_s28 + $0x1c8] sm:$0xff]  ;;  %v448_v28 = vadd.f32 %v3058_v25, %v3057_v24  ;;  %v3061_v30 = vld [vmem:[%s3585_s28 + $0x1f0] sm:$0xff]  ;;  %v3062_v31 = vld [vmem:[%s3585_s28 + $0x1f8] sm:$0xff] }
  0x50   : > { %v445_v29 = vadd.f32 %v3056_v27, %v3055_v26  ;;  %v3059_v32 = vld [vmem:[%s3585_s28 + $0x1e0] sm:$0xff]  ;;  %v3060_v33 = vld [vmem:[%s3585_s28 + $0x1e8] sm:$0xff]  ;;  %v454_v34 = vadd.f32 %v3062_v31, %v3061_v30  ;;  %v3677_v39 = vld [vmem:[%s5866_s1 + $0x18] sm:$0xff] }
  0x51   : > { %v451_v35 = vadd.f32 %v3060_v33, %v3059_v32  ;;  %v3671_v38 = vld [vmem:[%s5866_s1] sm:$0xff]  ;;  %v3690_v41 = vld [vmem:[%s5866_s1 + $0x28] sm:$0xff]  ;;  %v3716_v45 = vld [vmem:[%s5866_s1 + $0x58] sm:$0xff] }
  0x52   : > { %329 = vadd.xlane.f32.xlu1 %v328_v36  ;;  %v3660_v36 = vld [vmem:[%s5866_s1 + $0x8] sm:$0xff]  ;;  %v3684_v40 = vld [vmem:[%s5866_s1 + $0x20] sm:$0xff]  ;;  %v3758_v52 = vld [vmem:[%s5866_s1 + $0x70] sm:$0xff] }
  0x53   : > { %326 = vadd.xlane.f32.xlu0 %v325_v37  ;;  %v3666_v37 = vld [vmem:[%s5866_s1 + $0x10] sm:$0xff]  ;;  %v3709_v44 = vld [vmem:[%s5866_s1 + $0x48] sm:$0xff]  ;;  %v3722_v46 = vld [vmem:[%s5866_s1 + $0x40] sm:$0xff] }
  0x54   : > { %v3728_v47 = vld [vmem:[%s5866_s1 + $0x68] sm:$0xff]  ;;  %v3746_v50 = vld [vmem:[%s5866_s1 + $0x60] sm:$0xff]  ;;  %v3764_v53 = vld [vmem:[%s5868_s3 + $0x10] sm:$0xff] }
  0x55   : > { %v3752_v51 = vld [vmem:[%s5868_s3] sm:$0xff]  ;;  %v3782_v56 = vld [vmem:[%s5868_s3 + $0x8] sm:$0xff]  ;;  %v3788_v57 = vld [vmem:[%s5868_s3 + $0x30] sm:$0xff] }
  0x56   : > { %335 = vadd.xlane.f32.xlu1 %v334_v42  ;;  %v3697_v42 = vld [vmem:[%s5866_s1 + $0x38] sm:$0xff]  ;;  %v3800_v59 = vld [vmem:[%s5868_s3 + $0x40] sm:$0xff]  ;;  %v3830_v2 = vld [vmem:[%s5868_s3 + $0x48] sm:$0xff] }
  0x57   : > { %332 = vadd.xlane.f32.xlu0 %v331_v43  ;;  %v3703_v43 = vld [vmem:[%s5866_s1 + $0x30] sm:$0xff]  ;;  %v3794_v58 = vld [vmem:[%s5868_s3 + $0x18] sm:$0xff]  ;;  %v3824_v63 = vld [vmem:[%s5868_s3 + $0x60] sm:$0xff] }
  0x58   : > { %v3818_v62 = vld [vmem:[%s5868_s3 + $0x38] sm:$0xff]  ;;  %v3836_v3 = vld [vmem:[%s5868_s3 + $0x70] sm:$0xff] }
  0x59   : > { %v3842_v6 = vld [vmem:[%s5868_s3 + $0x58] sm:$0xff] }
  0x5a   : > { %341 = vadd.xlane.f32.xlu1 %v340_v48  ;;  %v3734_v48 = vld [vmem:[%s5866_s1 + $0x50] sm:$0xff] }
  0x5b   : > { %338 = vadd.xlane.f32.xlu0 %v337_v49  ;;  %v3740_v49 = vld [vmem:[%s5866_s1 + $0x78] sm:$0xff] }
  0x5e   : > { %380 = vadd.xlane.f32.xlu1 %v379_v54  ;;  %v3770_v54 = vld [vmem:[%s5867_s2] sm:$0x1] }
  0x5f   : > { %377 = vadd.xlane.f32.xlu0 %v376_v55  ;;  %v3776_v55 = vld [vmem:[%s5868_s3 + $0x20] sm:$0xff] }
  0x62   : > { %386 = vadd.xlane.f32.xlu1 %v385_v60  ;;  %v3806_v60 = vld [vmem:[%s5868_s3 + $0x28] sm:$0xff] }
  0x63   : > { %383 = vadd.xlane.f32.xlu0 %v382_v61  ;;  %v3812_v61 = vld [vmem:[%s5868_s3 + $0x50] sm:$0xff] }
  0x66   : > { %392 = vadd.xlane.f32.xlu1 %v391_v4 }
  0x67   : > { %389 = vadd.xlane.f32.xlu0 %v388_v5 }
  0x6a   : > { %398 = vadd.xlane.f32.xlu1 %v397_v10 }
  0x6b   : > { %395 = vadd.xlane.f32.xlu0 %v394_v11  ;;  %v3851_v11 = vld [vmem:[%s5868_s3 + $0x68] sm:$0xff] }
  0x6e   : > { %437 = vadd.xlane.f32.xlu1 %v436_v16 }
  0x6f   : > { %434 = vadd.xlane.f32.xlu0 %v433_v17  ;;  %v3861_v17 = vld [vmem:[%s5868_s3 + $0x78] sm:$0xff] }
  0x72   : > { %443 = vadd.xlane.f32.xlu1 %v442_v22 }
  0x73   : > { %440 = vadd.xlane.f32.xlu0 %v439_v23 }
  0x76   : > { %449 = vadd.xlane.f32.xlu1 %v448_v28 }
  0x77   : > { %446 = vadd.xlane.f32.xlu0 %v445_v29 }
  0x7a   : > { %455 = vadd.xlane.f32.xlu1 %v454_v34 }
  0x7b   : > { %452 = vadd.xlane.f32.xlu0 %v451_v35 }
  0x8b   : > { %512 = vperm.xlu1 %3211, %v3660_v36  }
  0x8f   : > { %517 = vperm.xlu1 %3211, %v3666_v37  }
  0x91   : > { %764 = vperm.xlu0 %3212, %v3671_v38  }
  0x93   : > { %522 = vperm.xlu1 %3211, %v3677_v39  }
  0x95   : > { %776 = vperm.xlu0 %3212, %v3677_v39  }
  0x97   : > { %527 = vperm.xlu1 %3211, %v3684_v40  }
  0x99   : > { %784 = vperm.xlu0 %3212, %v3690_v41  }
  0x9b   : > { %532 = vperm.xlu1 %3211, %v3690_v41  }
  0x9d   : > { %792 = vperm.xlu0 %3212, %v3697_v42  }
  0x9f   : > { %537 = vperm.xlu1 %3211, %v3703_v43  }
  0xa1   : > { %800 = vperm.xlu0 %3212, %v3709_v44  }
  0xa3   : > { %542 = vperm.xlu1 %3211, %v3697_v42  }
  0xa5   : > { %808 = vperm.xlu0 %3212, %v3716_v45  }
  0xa7   : > { %547 = vperm.xlu1 %3211, %v3722_v46  }
  0xa9   : > { %816 = vperm.xlu0 %3212, %v3728_v47  }
  0xab   : > { %557 = vperm.xlu1 %3211, %v3734_v48  }
  0xad   : > { %824 = vperm.xlu0 %3212, %v3740_v49  }
  0xaf   : > { %567 = vperm.xlu1 %3211, %v3746_v50  }
  0xb1   : > { %891 = vperm.xlu0 %3212, %v3752_v51  }
  0xb3   : > { %577 = vperm.xlu1 %3211, %v3758_v52  }
  0xb5   : > { %899 = vperm.xlu0 %3212, %v3764_v53  }
  0xb7   : > { %642 = vperm.xlu1 %3211, %v3770_v54  }
  0xb9   : > { %907 = vperm.xlu0 %3212, %v3776_v55  }
  0xbb   : > { %674 = vperm.xlu1 %3211, %v3782_v56  }
  0xbd   : > { %915 = vperm.xlu0 %3212, %v3788_v57  }
  0xbf   : > { %684 = vperm.xlu1 %3211, %v3794_v58  }
  0xc1   : > { %923 = vperm.xlu0 %3212, %v3800_v59  }
  0xc3   : > { %694 = vperm.xlu1 %3211, %v3806_v60  }
  0xc5   : > { %931 = vperm.xlu0 %3212, %v3812_v61  }
  0xc7   : > { %704 = vperm.xlu1 %3211, %v3818_v62  }
  0xc9   : > { %939 = vperm.xlu0 %3212, %v3824_v63  }
  0xcb   : > { %714 = vperm.xlu1 %3211, %v3830_v2   ;;  %v270_v4 = vpop.xlane.xlu1 %269 }
  0xcc   : > { %v288_v5 = vmul.f32 0.00390625, %v270_v4  ;;  %v264_v7 = vpop.xlane.xlu0 %263 }
  0xcd   : > { %947 = vperm.xlu0 %3212, %v3836_v3   ;;  %v286_v8 = vmul.f32 0.00390625, %v264_v7 }
  0xce   : > { %297 = vst.msk [vmem:[#allocation2 + $0x10] sm:$0xff] %vm294_vm0, %v288_v5 }
  0xcf   : > { %724 = vperm.xlu1 %3211, %v3842_v6   ;;  %v273_v9 = vpop.xlane.xlu1 %272  ;;  %295 = vst.msk [vmem:[#allocation2] sm:$0xff] %vm294_vm0, %v286_v8 }
  0xd0   : > { %v289_v10 = vmul.f32 0.00390625, %v273_v9  ;;  %v267_v12 = vpop.xlane.xlu0 %266 }
  0xd1   : > { %3214 = vset.pattern.permute.xlu0 %v3436_v13  ;;  %v287_v14 = vmul.f32 0.00390625, %v267_v12 }
  0xd2   : > { %298 = vst.msk [vmem:[#allocation2 + $0x18] sm:$0xff] %vm294_vm0, %v289_v10  ;;  %987 = vperm.xlu0 %3214, %v3671_v38  }
  0xd3   : > { %734 = vperm.xlu1 %3211, %v3851_v11   ;;  %v279_v15 = vpop.xlane.xlu1 %278  ;;  %296 = vst.msk [vmem:[#allocation2 + $0x8] sm:$0xff] %vm294_vm0, %v287_v14 }
  0xd4   : > { %v291_v16 = vmul.f32 0.00390625, %v279_v15  ;;  %v276_v18 = vpop.xlane.xlu0 %275 }
  0xd5   : > { %v290_v19 = vmul.f32 0.00390625, %v276_v18 }
  0xd6   : > { %300 = vst.msk [vmem:[#allocation2 + $0x28] sm:$0xff] %vm294_vm0, %v291_v16  ;;  %999 = vperm.xlu0 %3214, %v3677_v39  }
  0xd7   : > { %744 = vperm.xlu1 %3211, %v3861_v17   ;;  %v285_v20 = vpop.xlane.xlu1 %284  ;;  %299 = vst.msk [vmem:[#allocation2 + $0x20] sm:$0xff] %vm294_vm0, %v290_v19 }
  0xd8   : > { %v293_v21 = vmul.f32 0.00390625, %v285_v20  ;;  %v282_v22 = vpop.xlane.xlu0 %281 }
  0xd9   : > { %v292_v23 = vmul.f32 0.00390625, %v282_v22 }
  0xda   : > { %302 = vst.msk [vmem:[#allocation2 + $0x38] sm:$0xff] %vm294_vm0, %v293_v21  ;;  %1007 = vperm.xlu0 %3214, %v3690_v41  }
  0xdb   : > { %3213 = vset.pattern.permute.xlu1 %v5872_v1  ;;  %v324_v24 = vpop.xlane.xlu1 %323  ;;  %301 = vst.msk [vmem:[#allocation2 + $0x30] sm:$0xff] %vm294_vm0, %v292_v23 }
  0xdc   : > { %v344_v25 = vmul.f32 0.00390625, %v324_v24  ;;  %768 = vperm.xlu1 %3213, %v3660_v36   ;;  %v321_v26 = vpop.xlane.xlu0 %320 }
  0xdd   : > { %v343_v27 = vmul.f32 0.00390625, %v321_v26 }
  0xde   : > { %352 = vst.msk [vmem:[#allocation2 + $0x48] sm:$0xff] %vm294_vm0, %v344_v25  ;;  %1015 = vperm.xlu0 %3214, %v3697_v42  }
  0xdf   : > { %v330_v28 = vpop.xlane.xlu1 %329  ;;  %351 = vst.msk [vmem:[#allocation2 + $0x40] sm:$0xff] %vm294_vm0, %v343_v27 }
  0xe0   : > { %v346_v29 = vmul.f32 0.00390625, %v330_v28  ;;  %772 = vperm.xlu1 %3213, %v3666_v37   ;;  %v327_v30 = vpop.xlane.xlu0 %326 }
  0xe1   : > { %v345_v31 = vmul.f32 0.00390625, %v327_v30 }
  0xe2   : > { %354 = vst.msk [vmem:[#allocation2 + $0x58] sm:$0xff] %vm294_vm0, %v346_v29  ;;  %1023 = vperm.xlu0 %3214, %v3709_v44  }
  0xe3   : > { %v336_v32 = vpop.xlane.xlu1 %335  ;;  %353 = vst.msk [vmem:[#allocation2 + $0x50] sm:$0xff] %vm294_vm0, %v345_v31 }
  0xe4   : > { %v348_v33 = vmul.f32 0.00390625, %v336_v32  ;;  %780 = vperm.xlu1 %3213, %v3684_v40   ;;  %v333_v34 = vpop.xlane.xlu0 %332 }
  0xe5   : > { %v347_v35 = vmul.f32 0.00390625, %v333_v34 }
  0xe6   : > { %356 = vst.msk [vmem:[#allocation2 + $0x68] sm:$0xff] %vm294_vm0, %v348_v33  ;;  %1031 = vperm.xlu0 %3214, %v3716_v45  }
  0xe7   : > { %v342_v4 = vpop.xlane.xlu1 %341  ;;  %355 = vst.msk [vmem:[#allocation2 + $0x60] sm:$0xff] %vm294_vm0, %v347_v35 }
  0xe8   : > { %v350_v5 = vmul.f32 0.00390625, %v342_v4  ;;  %788 = vperm.xlu1 %3213, %v3703_v43   ;;  %v339_v7 = vpop.xlane.xlu0 %338 }
  0xe9   : > { %v349_v8 = vmul.f32 0.00390625, %v339_v7 }
  0xea   : > { %358 = vst.msk [vmem:[#allocation2 + $0x78] sm:$0xff] %vm294_vm0, %v350_v5  ;;  %1039 = vperm.xlu0 %3214, %v3728_v47  }
  0xeb   : > { %v381_v9 = vpop.xlane.xlu1 %380  ;;  %357 = vst.msk [vmem:[#allocation2 + $0x70] sm:$0xff] %vm294_vm0, %v349_v8 }
  0xec   : > { %v401_v10 = vmul.f32 0.00390625, %v381_v9  ;;  %796 = vperm.xlu1 %3213, %v3722_v46   ;;  %v378_v12 = vpop.xlane.xlu0 %377 }
  0xed   : > { %v400_v14 = vmul.f32 0.00390625, %v378_v12 }
  0xee   : > { %410 = vst.msk [vmem:[#allocation2 + $0x8] sm:$0xff] %vm408_vm1, %v401_v10  ;;  %1047 = vperm.xlu0 %3214, %v3740_v49  }
  0xef   : > { %v387_v15 = vpop.xlane.xlu1 %386  ;;  %409 = vst.msk [vmem:[#allocation2] sm:$0xff] %vm408_vm1, %v400_v14 }
  0xf0   : > { %v403_v16 = vmul.f32 0.00390625, %v387_v15  ;;  %804 = vperm.xlu1 %3213, %v3734_v48   ;;  %v384_v18 = vpop.xlane.xlu0 %383 }
  0xf1   : > { %v402_v19 = vmul.f32 0.00390625, %v384_v18 }
  0xf2   : > { %412 = vst.msk [vmem:[#allocation2 + $0x18] sm:$0xff] %vm408_vm1, %v403_v16  ;;  %1114 = vperm.xlu0 %3214, %v3752_v51  }
  0xf3   : > { %v393_v20 = vpop.xlane.xlu1 %392  ;;  %411 = vst.msk [vmem:[#allocation2 + $0x10] sm:$0xff] %vm408_vm1, %v402_v19  ;;  %v5876_v19 = vmov 3  }
  0xf4   : > { %v405_v21 = vmul.f32 0.00390625, %v393_v20  ;;  %812 = vperm.xlu1 %3213, %v3746_v50   ;;  %v390_v22 = vpop.xlane.xlu0 %389 }
  0xf5   : > { %v404_v23 = vmul.f32 0.00390625, %v390_v22 }
  0xf6   : > { %414 = vst.msk [vmem:[#allocation2 + $0x28] sm:$0xff] %vm408_vm1, %v405_v21  ;;  %1122 = vperm.xlu0 %3214, %v3764_v53  }
  0xf7   : > { %v399_v24 = vpop.xlane.xlu1 %398  ;;  %413 = vst.msk [vmem:[#allocation2 + $0x20] sm:$0xff] %vm408_vm1, %v404_v23 }
  0xf8   : > { %v407_v25 = vmul.f32 0.00390625, %v399_v24  ;;  %820 = vperm.xlu1 %3213, %v3758_v52   ;;  %v396_v26 = vpop.xlane.xlu0 %395 }
  0xf9   : > { %v406_v27 = vmul.f32 0.00390625, %v396_v26 }
  0xfa   : > { %416 = vst.msk [vmem:[#allocation2 + $0x38] sm:$0xff] %vm408_vm1, %v407_v25  ;;  %1130 = vperm.xlu0 %3214, %v3776_v55  }
  0xfb   : > { %v438_v28 = vpop.xlane.xlu1 %437  ;;  %415 = vst.msk [vmem:[#allocation2 + $0x30] sm:$0xff] %vm408_vm1, %v406_v27 }
  0xfc   : > { %v458_v29 = vmul.f32 0.00390625, %v438_v28  ;;  %881 = vperm.xlu1 %3213, %v3770_v54   ;;  %v435_v30 = vpop.xlane.xlu0 %434 }
  0xfd   : > { %v457_v31 = vmul.f32 0.00390625, %v435_v30 }
  0xfe   : > { %466 = vst.msk [vmem:[#allocation2 + $0x48] sm:$0xff] %vm408_vm1, %v458_v29  ;;  %1138 = vperm.xlu0 %3214, %v3788_v57  }
  0xff   : > { %v444_v32 = vpop.xlane.xlu1 %443  ;;  %465 = vst.msk [vmem:[#allocation2 + $0x40] sm:$0xff] %vm408_vm1, %v457_v31 }
 0x100   : > { %v460_v33 = vmul.f32 0.00390625, %v444_v32  ;;  %895 = vperm.xlu1 %3213, %v3782_v56   ;;  %v441_v34 = vpop.xlane.xlu0 %440 }
 0x101   : > { %v459_v35 = vmul.f32 0.00390625, %v441_v34 }
 0x102   : > { %468 = vst.msk [vmem:[#allocation2 + $0x58] sm:$0xff] %vm408_vm1, %v460_v33  ;;  %1146 = vperm.xlu0 %3214, %v3800_v59  }
 0x103   : > { %v450_v4 = vpop.xlane.xlu1 %449  ;;  %467 = vst.msk [vmem:[#allocation2 + $0x50] sm:$0xff] %vm408_vm1, %v459_v35 }
 0x104   : > { %v462_v5 = vmul.f32 0.00390625, %v450_v4  ;;  %903 = vperm.xlu1 %3213, %v3794_v58   ;;  %v447_v7 = vpop.xlane.xlu0 %446 }
 0x105   : > { %v461_v8 = vmul.f32 0.00390625, %v447_v7 }
 0x106   : > { %470 = vst.msk [vmem:[#allocation2 + $0x68] sm:$0xff] %vm408_vm1, %v462_v5  ;;  %1154 = vperm.xlu0 %3214, %v3812_v61  }
 0x107   : > { %v456_v9 = vpop.xlane.xlu1 %455  ;;  %469 = vst.msk [vmem:[#allocation2 + $0x60] sm:$0xff] %vm408_vm1, %v461_v8 }
 0x108   : > { %v464_v10 = vmul.f32 0.00390625, %v456_v9  ;;  %911 = vperm.xlu1 %3213, %v3806_v60   ;;  %v453_v12 = vpop.xlane.xlu0 %452 }
 0x109   : > { %v463_v14 = vmul.f32 0.00390625, %v453_v12 }
 0x10a   : > { %472 = vst.msk [vmem:[#allocation2 + $0x78] sm:$0xff] %vm408_vm1, %v464_v10  ;;  %1162 = vperm.xlu0 %3214, %v3824_v63  }
 0x10b   : > { %v3918_v15 = vpop.permute.xlu1 %512  ;;  %471 = vst.msk [vmem:[#allocation2 + $0x70] sm:$0xff] %vm408_vm1, %v463_v14 }
 0x10c   : > { %919 = vperm.xlu1 %3213, %v3818_v62  }
 0x10e   : > { %1170 = vperm.xlu0 %3214, %v3836_v3  }
 0x10f   : > { %v3923_v16 = vpop.permute.xlu1 %517 }
 0x110   : > { %v3925_v18 = vpop.permute.xlu0 %764  ;;  %927 = vperm.xlu1 %3213, %v3830_v2  }
 0x112   : > { %3216 = vset.pattern.permute.xlu0 %v5876_v19 }
 0x113   : > { %1210 = vperm.xlu0 %3216, %v3671_v38   ;;  %v3930_v20 = vpop.permute.xlu1 %522 }
 0x114   : > { %v3932_v21 = vpop.permute.xlu0 %776  ;;  %935 = vperm.xlu1 %3213, %v3842_v6  }
 0x117   : > { %1222 = vperm.xlu0 %3216, %v3677_v39   ;;  %v3936_v22 = vpop.permute.xlu1 %527 }
 0x118   : > { %v3938_v23 = vpop.permute.xlu0 %784  ;;  %943 = vperm.xlu1 %3213, %v3851_v11  }
 0x11b   : > { %1230 = vperm.xlu0 %3216, %v3690_v41   ;;  %v3942_v24 = vpop.permute.xlu1 %532 }
 0x11c   : > { %v3944_v25 = vpop.permute.xlu0 %792  ;;  %951 = vperm.xlu1 %3213, %v3861_v17  }
 0x11f   : > { %1238 = vperm.xlu0 %3216, %v3697_v42   ;;  %v3948_v26 = vpop.permute.xlu1 %537 }
 0x120   : > { %5891 = vst [vmem:[#allocation9_spill] sm:$0xff] %v3948_v26  ;;  %v3950_v27 = vpop.permute.xlu0 %800  ;;  %3215 = vset.pattern.permute.xlu1 %v3436_v13 }
 0x121   : > { %991 = vperm.xlu1 %3215, %v3660_v36  }
 0x123   : > { %1246 = vperm.xlu0 %3216, %v3709_v44   ;;  %v3955_v28 = vpop.permute.xlu1 %542 }
 0x124   : > { %5892 = vst [vmem:[#allocation10_spill] sm:$0xff] %v3955_v28  ;;  %v3957_v29 = vpop.permute.xlu0 %808 }
 0x125   : > { %995 = vperm.xlu1 %3215, %v3666_v37  }
 0x127   : > { %1254 = vperm.xlu0 %3216, %v3716_v45   ;;  %v3961_v30 = vpop.permute.xlu1 %547 }
 0x128   : > { %5893 = vst [vmem:[#allocation11_spill] sm:$0xff] %v3961_v30  ;;  %v3963_v31 = vpop.permute.xlu0 %816 }
 0x129   : > { %5894 = vst [vmem:[#allocation12_spill] sm:$0xff] %v3963_v31  ;;  %1003 = vperm.xlu1 %3215, %v3684_v40  }
 0x12b   : > { %1262 = vperm.xlu0 %3216, %v3728_v47   ;;  %v3967_v13 = vpop.permute.xlu1 %557 }
 0x12c   : > { %5895 = vst [vmem:[#allocation13_spill] sm:$0xff] %v3967_v13  ;;  %v3969_v32 = vpop.permute.xlu0 %824 }
 0x12d   : > { %5896 = vst [vmem:[#allocation14_spill] sm:$0xff] %v3969_v32  ;;  %1011 = vperm.xlu1 %3215, %v3703_v43   ;;  %v5981_v32 = vmov 5  }
 0x12f   : > { %1270 = vperm.xlu0 %3216, %v3740_v49   ;;  %v3973_v33 = vpop.permute.xlu1 %567 }
 0x130   : > { %5897 = vst [vmem:[#allocation15_spill] sm:$0xff] %v3973_v33  ;;  %v3975_v34 = vpop.permute.xlu0 %891 }
 0x131   : > { %5898 = vst [vmem:[#allocation16_spill] sm:$0xff] %v3975_v34  ;;  %1019 = vperm.xlu1 %3215, %v3722_v46  }
 0x133   : > { %1337 = vperm.xlu0 %3216, %v3752_v51   ;;  %v3979_v35 = vpop.permute.xlu1 %577 }
 0x134   : > { %5899 = vst [vmem:[#allocation17_spill] sm:$0xff] %v3979_v35  ;;  %v3981_v4 = vpop.permute.xlu0 %899 }
 0x135   : > { %5900 = vst [vmem:[#allocation18_spill] sm:$0xff] %v3981_v4  ;;  %1027 = vperm.xlu1 %3215, %v3734_v48   ;;  %v5919_v4 = vmov 3  }
 0x137   : > { %1345 = vperm.xlu0 %3216, %v3764_v53   ;;  %v3985_v5 = vpop.permute.xlu1 %642 }
 0x138   : > { %5901 = vst [vmem:[#allocation19_spill] sm:$0xff] %v3985_v5  ;;  %v3987_v7 = vpop.permute.xlu0 %907 }
 0x139   : > { %5902 = vst [vmem:[#allocation20_spill] sm:$0xff] %v3987_v7  ;;  %1035 = vperm.xlu1 %3215, %v3746_v50  }
 0x13b   : > { %1353 = vperm.xlu0 %3216, %v3776_v55   ;;  %v3991_v8 = vpop.permute.xlu1 %674 }
 0x13c   : > { %5903 = vst [vmem:[#allocation21_spill] sm:$0xff] %v3991_v8  ;;  %v3993_v9 = vpop.permute.xlu0 %915 }
 0x13d   : > { %5904 = vst [vmem:[#allocation22_spill] sm:$0xff] %v3993_v9  ;;  %1043 = vperm.xlu1 %3215, %v3758_v52  }
 0x13f   : > { %1361 = vperm.xlu0 %3216, %v3788_v57   ;;  %v3997_v10 = vpop.permute.xlu1 %684 }
 0x140   : > { %5905 = vst [vmem:[#allocation23_spill] sm:$0xff] %v3997_v10  ;;  %v3999_v12 = vpop.permute.xlu0 %923 }
 0x141   : > { %5906 = vst [vmem:[#allocation24_spill] sm:$0xff] %v3999_v12  ;;  %1104 = vperm.xlu1 %3215, %v3770_v54  }
 0x143   : > { %1369 = vperm.xlu0 %3216, %v3800_v59   ;;  %v4003_v14 = vpop.permute.xlu1 %694 }
 0x144   : > { %5907 = vst [vmem:[#allocation25_spill] sm:$0xff] %v4003_v14  ;;  %v4005_v1 = vpop.permute.xlu0 %931 }
 0x145   : > { %5908 = vst [vmem:[#allocation26_spill] sm:$0xff] %v4005_v1  ;;  %1118 = vperm.xlu1 %3215, %v3782_v56  }
 0x147   : > { %1377 = vperm.xlu0 %3216, %v3812_v61   ;;  %v4009_v0 = vpop.permute.xlu1 %704 }
 0x148   : > { %5909 = vst [vmem:[#allocation27_spill] sm:$0xff] %v4009_v0  ;;  %v4011_v19 = vpop.permute.xlu0 %939  ;;  %v5877_v0 = vmov 4  }
 0x149   : > { %5910 = vst [vmem:[#allocation28_spill] sm:$0xff] %v4011_v19  ;;  %1126 = vperm.xlu1 %3215, %v3794_v58  }
 0x14b   : > { %1385 = vperm.xlu0 %3216, %v3824_v63   ;;  %v4015_v8 = vpop.permute.xlu1 %714 }
 0x14c   : > { %5911 = vst [vmem:[#allocation29_spill] sm:$0xff] %v4015_v8  ;;  %v4017_v10 = vpop.permute.xlu0 %947 }
 0x14d   : > { %5912 = vst [vmem:[#allocation30_spill] sm:$0xff] %v4017_v10  ;;  %1134 = vperm.xlu1 %3215, %v3806_v60  }
 0x14f   : > { %1393 = vperm.xlu0 %3216, %v3836_v3   ;;  %v4021_v14 = vpop.permute.xlu1 %724 }
 0x150   : > { %5913 = vst [vmem:[#allocation31_spill] sm:$0xff] %v4021_v14 }
 0x151   : > { %v4023_v1 = vpop.permute.xlu0 %987  ;;  %1142 = vperm.xlu1 %3215, %v3818_v62  }
 0x153   : > { %3218 = vset.pattern.permute.xlu0 %v5877_v0  ;;  %v4027_v19 = vpop.permute.xlu1 %734 }
 0x154   : > { %5914 = vst [vmem:[#allocation32_spill] sm:$0xff] %v4027_v19  ;;  %1433 = vperm.xlu0 %3218, %v3671_v38  }
 0x155   : > { %v4030_v8 = vpop.permute.xlu0 %999  ;;  %1150 = vperm.xlu1 %3215, %v3830_v2  }
 0x157   : > { %v4033_v10 = vpop.permute.xlu1 %744 }
 0x158   : > { %5915 = vst [vmem:[#allocation33_spill] sm:$0xff] %v4033_v10  ;;  %1445 = vperm.xlu0 %3218, %v3677_v39  }
 0x159   : > { %v4036_v14 = vpop.permute.xlu0 %1007  ;;  %1158 = vperm.xlu1 %3215, %v3842_v6  }
 0x15b   : > { %v4039_v12 = vpop.permute.xlu1 %768 }
 0x15c   : > { %1453 = vperm.xlu0 %3218, %v3690_v41  }
 0x15d   : > { %v4042_v0 = vpop.permute.xlu0 %1015  ;;  %1166 = vperm.xlu1 %3215, %v3851_v11  }
 0x15e   : > { %5916 = vst [vmem:[#allocation34_spill] sm:$0xff] %v4042_v0 }
 0x15f   : > { %v4045_v19 = vpop.permute.xlu1 %772 }
 0x160   : > { %1461 = vperm.xlu0 %3218, %v3697_v42  }
 0x161   : > { %v4048_v9 = vpop.permute.xlu0 %1023  ;;  %1174 = vperm.xlu1 %3215, %v3861_v17  }
 0x162   : > { %5917 = vst [vmem:[#allocation35_spill] sm:$0xff] %v4048_v9  ;;  %v5948_v9 = vmov 4  }
 0x163   : > { %v4051_v10 = vpop.permute.xlu1 %780 }
 0x164   : > { %1469 = vperm.xlu0 %3218, %v3709_v44  }
 0x165   : > { %v4054_v7 = vpop.permute.xlu0 %1031  ;;  %3217 = vset.pattern.permute.xlu1 %v5919_v4 }
 0x166   : > { %5918 = vst [vmem:[#allocation36_spill] sm:$0xff] %v4054_v7  ;;  %1214 = vperm.xlu1 %3217, %v3660_v36  }
 0x167   : > { %v4058_v34 = vpop.permute.xlu1 %788 }
 0x168   : > { %1477 = vperm.xlu0 %3218, %v3716_v45  }
 0x169   : > { %v4061_v5 = vpop.permute.xlu0 %1039 }
 0x16a   : > { %5920 = vst [vmem:[#allocation37_spill] sm:$0xff] %v4061_v5  ;;  %1218 = vperm.xlu1 %3217, %v3666_v37  }
 0x16b   : > { %v4064_v35 = vpop.permute.xlu1 %796 }
 0x16c   : > { %1485 = vperm.xlu0 %3218, %v3728_v47  }
 0x16d   : > { %v4067_v33 = vpop.permute.xlu0 %1047 }
 0x16e   : > { %5921 = vst [vmem:[#allocation38_spill] sm:$0xff] %v4067_v33  ;;  %1226 = vperm.xlu1 %3217, %v3684_v40  }
 0x16f   : > { %v4070_v13 = vpop.permute.xlu1 %804 }
 0x170   : > { %5922 = vst [vmem:[#allocation39_spill] sm:$0xff] %v4070_v13  ;;  %1493 = vperm.xlu0 %3218, %v3740_v49  }
 0x171   : > { %v4073_v4 = vpop.permute.xlu0 %1114 }
 0x172   : > { %5923 = vst [vmem:[#allocation40_spill] sm:$0xff] %v4073_v4  ;;  %1234 = vperm.xlu1 %3217, %v3703_v43  }
 0x173   : > { %v4076_v30 = vpop.permute.xlu1 %812 }
 0x174   : > { %5924 = vst [vmem:[#allocation41_spill] sm:$0xff] %v4076_v30  ;;  %1560 = vperm.xlu0 %3218, %v3752_v51  }
 0x175   : > { %v4079_v28 = vpop.permute.xlu0 %1122 }
 0x176   : > { %5925 = vst [vmem:[#allocation42_spill] sm:$0xff] %v4079_v28  ;;  %1242 = vperm.xlu1 %3217, %v3722_v46  }
 0x177   : > { %v4082_v26 = vpop.permute.xlu1 %820 }
 0x178   : > { %5926 = vst [vmem:[#allocation43_spill] sm:$0xff] %v4082_v26  ;;  %1568 = vperm.xlu0 %3218, %v3764_v53  }
 0x179   : > { %v4085_v33 = vpop.permute.xlu0 %1130 }
 0x17a   : > { %5927 = vst [vmem:[#allocation44_spill] sm:$0xff] %v4085_v33  ;;  %1250 = vperm.xlu1 %3217, %v3734_v48  }
 0x17b   : > { %v4088_v5 = vpop.permute.xlu1 %881 }
 0x17c   : > { %5928 = vst [vmem:[#allocation45_spill] sm:$0xff] %v4088_v5  ;;  %1576 = vperm.xlu0 %3218, %v3776_v55  }
 0x17d   : > { %v4091_v4 = vpop.permute.xlu0 %1138 }
 0x17e   : > { %5929 = vst [vmem:[#allocation46_spill] sm:$0xff] %v4091_v4  ;;  %1258 = vperm.xlu1 %3217, %v3746_v50  }
 0x17f   : > { %v4094_v30 = vpop.permute.xlu1 %895 }
 0x180   : > { %5930 = vst [vmem:[#allocation47_spill] sm:$0xff] %v4094_v30  ;;  %1584 = vperm.xlu0 %3218, %v3788_v57  }
 0x181   : > { %v4097_v28 = vpop.permute.xlu0 %1146 }
 0x182   : > { %5931 = vst [vmem:[#allocation48_spill] sm:$0xff] %v4097_v28  ;;  %1266 = vperm.xlu1 %3217, %v3758_v52  }
 0x183   : > { %v4100_v26 = vpop.permute.xlu1 %903 }
 0x184   : > { %5932 = vst [vmem:[#allocation49_spill] sm:$0xff] %v4100_v26  ;;  %1592 = vperm.xlu0 %3218, %v3800_v59  }
 0x185   : > { %v4103_v33 = vpop.permute.xlu0 %1154 }
 0x186   : > { %5933 = vst [vmem:[#allocation50_spill] sm:$0xff] %v4103_v33  ;;  %1327 = vperm.xlu1 %3217, %v3770_v54  }
 0x187   : > { %v4106_v5 = vpop.permute.xlu1 %911 }
 0x188   : > { %5934 = vst [vmem:[#allocation51_spill] sm:$0xff] %v4106_v5  ;;  %1600 = vperm.xlu0 %3218, %v3812_v61  }
 0x189   : > { %v4109_v4 = vpop.permute.xlu0 %1162 }
 0x18a   : > { %5935 = vst [vmem:[#allocation52_spill] sm:$0xff] %v4109_v4  ;;  %1341 = vperm.xlu1 %3217, %v3782_v56   ;;  %v5879_v4 = vmov 5  }
 0x18b   : > { %v4112_v30 = vpop.permute.xlu1 %919 }
 0x18c   : > { %5936 = vst [vmem:[#allocation53_spill] sm:$0xff] %v4112_v30  ;;  %1608 = vperm.xlu0 %3218, %v3824_v63  }
 0x18d   : > { %v4115_v28 = vpop.permute.xlu0 %1170 }
 0x18e   : > { %5937 = vst [vmem:[#allocation54_spill] sm:$0xff] %v4115_v28  ;;  %1349 = vperm.xlu1 %3217, %v3794_v58  }
 0x18f   : > { %v4118_v26 = vpop.permute.xlu1 %927 }
 0x190   : > { %5938 = vst [vmem:[#allocation55_spill] sm:$0xff] %v4118_v26  ;;  %1616 = vperm.xlu0 %3218, %v3836_v3  }
 0x192   : > { %v4121_v33 = vpop.permute.xlu0 %1210  ;;  %1357 = vperm.xlu1 %3217, %v3806_v60  }
 0x193   : > { %v4124_v5 = vpop.permute.xlu1 %935 }
 0x194   : > { %5939 = vst [vmem:[#allocation56_spill] sm:$0xff] %v4124_v5  ;;  %3220 = vset.pattern.permute.xlu0 %v5879_v4 }
 0x195   : > { %1656 = vperm.xlu0 %3220, %v3671_v38  }
 0x196   : > { %v4128_v30 = vpop.permute.xlu0 %1222  ;;  %1365 = vperm.xlu1 %3217, %v3818_v62  }
 0x197   : > { %5940 = vst [vmem:[#allocation57_spill] sm:$0xff] %v4128_v30  ;;  %v4131_v28 = vpop.permute.xlu1 %943 }
 0x198   : > { %5941 = vst [vmem:[#allocation58_spill] sm:$0xff] %v4131_v28 }
 0x199   : > { %1668 = vperm.xlu0 %3220, %v3677_v39  }
 0x19a   : > { %v4134_v26 = vpop.permute.xlu0 %1230  ;;  %1373 = vperm.xlu1 %3217, %v3830_v2  }
 0x19b   : > { %5942 = vst [vmem:[#allocation59_spill] sm:$0xff] %v4134_v26  ;;  %v4137_v7 = vpop.permute.xlu1 %951 }
 0x19c   : > { %5943 = vst [vmem:[#allocation60_spill] sm:$0xff] %v4137_v7 }
 0x19d   : > { %1676 = vperm.xlu0 %3220, %v3690_v41  }
 0x19e   : > { %v4140_v5 = vpop.permute.xlu0 %1238  ;;  %1381 = vperm.xlu1 %3217, %v3842_v6  }
 0x19f   : > { %5944 = vst [vmem:[#allocation61_spill] sm:$0xff] %v4140_v5 }
 0x1a0   : > { %v4143_v4 = vpop.permute.xlu1 %991 }
 0x1a1   : > { %1684 = vperm.xlu0 %3220, %v3697_v42  }
 0x1a2   : > { %v4146_v13 = vpop.permute.xlu0 %1246  ;;  %1389 = vperm.xlu1 %3217, %v3851_v11  }
 0x1a3   : > { %5945 = vst [vmem:[#allocation62_spill] sm:$0xff] %v4146_v13 }
 0x1a4   : > { %v4149_v28 = vpop.permute.xlu1 %995 }
 0x1a5   : > { %1692 = vperm.xlu0 %3220, %v3709_v44  }
 0x1a6   : > { %v4152_v26 = vpop.permute.xlu0 %1254  ;;  %1397 = vperm.xlu1 %3217, %v3861_v17  }
 0x1a7   : > { %5946 = vst [vmem:[#allocation63_spill] sm:$0xff] %v4152_v26 }
 0x1a8   : > { %v4155_v7 = vpop.permute.xlu1 %1003 }
 0x1a9   : > { %1700 = vperm.xlu0 %3220, %v3716_v45  }
 0x1aa   : > { %v4158_v5 = vpop.permute.xlu0 %1262  ;;  %3219 = vset.pattern.permute.xlu1 %v5948_v9 }
 0x1ab   : > { %5947 = vst [vmem:[#allocation64_spill] sm:$0xff] %v4158_v5  ;;  %1437 = vperm.xlu1 %3219, %v3660_v36  }
 0x1ac   : > { %v4162_v13 = vpop.permute.xlu1 %1011 }
 0x1ad   : > { %5949 = vst [vmem:[#allocation65_spill] sm:$0xff] %v4162_v13  ;;  %1708 = vperm.xlu0 %3220, %v3728_v47  }
 0x1ae   : > { %v4165_v0 = vpop.permute.xlu0 %1270 }
 0x1af   : > { %5950 = vst [vmem:[#allocation66_spill] sm:$0xff] %v4165_v0  ;;  %1441 = vperm.xlu1 %3219, %v3666_v37  }
 0x1b0   : > { %v4168_v26 = vpop.permute.xlu1 %1019 }
 0x1b1   : > { %5951 = vst [vmem:[#allocation67_spill] sm:$0xff] %v4168_v26  ;;  %1716 = vperm.xlu0 %3220, %v3740_v49  }
 0x1b2   : > { %v4171_v30 = vpop.permute.xlu0 %1337 }
 0x1b3   : > { %5952 = vst [vmem:[#allocation68_spill] sm:$0xff] %v4171_v30  ;;  %1449 = vperm.xlu1 %3219, %v3684_v40  }
 0x1b4   : > { %v4174_v5 = vpop.permute.xlu1 %1027 }
 0x1b5   : > { %5953 = vst [vmem:[#allocation69_spill] sm:$0xff] %v4174_v5  ;;  %1783 = vperm.xlu0 %3220, %v3752_v51  }
 0x1b6   : > { %v4177_v9 = vpop.permute.xlu0 %1345 }
 0x1b7   : > { %5954 = vst [vmem:[#allocation70_spill] sm:$0xff] %v4177_v9  ;;  %1457 = vperm.xlu1 %3219, %v3703_v43  }
 0x1b8   : > { %v4180_v13 = vpop.permute.xlu1 %1035 }
 0x1b9   : > { %5955 = vst [vmem:[#allocation71_spill] sm:$0xff] %v4180_v13  ;;  %1791 = vperm.xlu0 %3220, %v3764_v53  }
 0x1ba   : > { %v4183_v0 = vpop.permute.xlu0 %1353 }
 0x1bb   : > { %5956 = vst [vmem:[#allocation72_spill] sm:$0xff] %v4183_v0  ;;  %1465 = vperm.xlu1 %3219, %v3722_v46  }
 0x1bc   : > { %v4186_v26 = vpop.permute.xlu1 %1043 }
 0x1bd   : > { %5957 = vst [vmem:[#allocation73_spill] sm:$0xff] %v4186_v26  ;;  %1799 = vperm.xlu0 %3220, %v3776_v55  }
 0x1be   : > { %v4189_v30 = vpop.permute.xlu0 %1361 }
 0x1bf   : > { %5958 = vst [vmem:[#allocation74_spill] sm:$0xff] %v4189_v30  ;;  %1473 = vperm.xlu1 %3219, %v3734_v48  }
 0x1c0   : > { %v4192_v5 = vpop.permute.xlu1 %1104 }
 0x1c1   : > { %5959 = vst [vmem:[#allocation75_spill] sm:$0xff] %v4192_v5  ;;  %1807 = vperm.xlu0 %3220, %v3788_v57  }
 0x1c2   : > { %v4195_v9 = vpop.permute.xlu0 %1369 }
 0x1c3   : > { %5960 = vst [vmem:[#allocation76_spill] sm:$0xff] %v4195_v9  ;;  %1481 = vperm.xlu1 %3219, %v3746_v50  }
 0x1c4   : > { %v4198_v13 = vpop.permute.xlu1 %1118 }
 0x1c5   : > { %5961 = vst [vmem:[#allocation77_spill] sm:$0xff] %v4198_v13  ;;  %1815 = vperm.xlu0 %3220, %v3800_v59  }
 0x1c6   : > { %v4201_v0 = vpop.permute.xlu0 %1377 }
 0x1c7   : > { %5962 = vst [vmem:[#allocation78_spill] sm:$0xff] %v4201_v0  ;;  %1489 = vperm.xlu1 %3219, %v3758_v52  }
 0x1c8   : > { %v4204_v26 = vpop.permute.xlu1 %1126 }
 0x1c9   : > { %5963 = vst [vmem:[#allocation79_spill] sm:$0xff] %v4204_v26  ;;  %1823 = vperm.xlu0 %3220, %v3812_v61  }
 0x1ca   : > { %v4207_v30 = vpop.permute.xlu0 %1385 }
 0x1cb   : > { %5964 = vst [vmem:[#allocation80_spill] sm:$0xff] %v4207_v30  ;;  %1550 = vperm.xlu1 %3219, %v3770_v54   ;;  %v5880_v30 = vmov 6  }
 0x1cc   : > { %v4210_v5 = vpop.permute.xlu1 %1134 }
 0x1cd   : > { %5965 = vst [vmem:[#allocation81_spill] sm:$0xff] %v4210_v5  ;;  %1831 = vperm.xlu0 %3220, %v3824_v63  }
 0x1ce   : > { %v4213_v9 = vpop.permute.xlu0 %1393 }
 0x1cf   : > { %5966 = vst [vmem:[#allocation82_spill] sm:$0xff] %v4213_v9  ;;  %1564 = vperm.xlu1 %3219, %v3782_v56  }
 0x1d0   : > { %v4216_v13 = vpop.permute.xlu1 %1142 }
 0x1d1   : > { %5967 = vst [vmem:[#allocation83_spill] sm:$0xff] %v4216_v13  ;;  %1839 = vperm.xlu0 %3220, %v3836_v3  }
 0x1d3   : > { %v4219_v0 = vpop.permute.xlu0 %1433  ;;  %1572 = vperm.xlu1 %3219, %v3794_v58  }
 0x1d4   : > { %5968 = vst [vmem:[#allocation84_spill] sm:$0xff] %v4219_v0  ;;  %v4222_v26 = vpop.permute.xlu1 %1150 }
 0x1d5   : > { %5969 = vst [vmem:[#allocation85_spill] sm:$0xff] %v4222_v26  ;;  %3222 = vset.pattern.permute.xlu0 %v5880_v30 }
 0x1d6   : > { %1879 = vperm.xlu0 %3222, %v3671_v38  }
 0x1d7   : > { %v4226_v5 = vpop.permute.xlu0 %1445  ;;  %1580 = vperm.xlu1 %3219, %v3806_v60  }
 0x1d8   : > { %5970 = vst [vmem:[#allocation86_spill] sm:$0xff] %v4226_v5  ;;  %v4229_v9 = vpop.permute.xlu1 %1158 }
 0x1d9   : > { %5971 = vst [vmem:[#allocation87_spill] sm:$0xff] %v4229_v9 }
 0x1da   : > { %1891 = vperm.xlu0 %3222, %v3677_v39  }
 0x1db   : > { %v4232_v13 = vpop.permute.xlu0 %1453  ;;  %1588 = vperm.xlu1 %3219, %v3818_v62  }
 0x1dc   : > { %5972 = vst [vmem:[#allocation88_spill] sm:$0xff] %v4232_v13  ;;  %v4235_v0 = vpop.permute.xlu1 %1166 }
 0x1dd   : > { %5973 = vst [vmem:[#allocation89_spill] sm:$0xff] %v4235_v0 }
 0x1de   : > { %1899 = vperm.xlu0 %3222, %v3690_v41  }
 0x1df   : > { %v4238_v26 = vpop.permute.xlu0 %1461  ;;  %1596 = vperm.xlu1 %3219, %v3830_v2  }
 0x1e0   : > { %5974 = vst [vmem:[#allocation90_spill] sm:$0xff] %v4238_v26  ;;  %v4241_v30 = vpop.permute.xlu1 %1174 }
 0x1e1   : > { %5975 = vst [vmem:[#allocation91_spill] sm:$0xff] %v4241_v30 }
 0x1e2   : > { %1907 = vperm.xlu0 %3222, %v3697_v42  }
 0x1e3   : > { %v4244_v5 = vpop.permute.xlu0 %1469  ;;  %1604 = vperm.xlu1 %3219, %v3842_v6  }
 0x1e4   : > { %5976 = vst [vmem:[#allocation92_spill] sm:$0xff] %v4244_v5 }
 0x1e5   : > { %v4247_v9 = vpop.permute.xlu1 %1214 }
 0x1e6   : > { %1915 = vperm.xlu0 %3222, %v3709_v44  }
 0x1e7   : > { %v4250_v13 = vpop.permute.xlu0 %1477  ;;  %1612 = vperm.xlu1 %3219, %v3851_v11  }
 0x1e8   : > { %5977 = vst [vmem:[#allocation93_spill] sm:$0xff] %v4250_v13 }
 0x1e9   : > { %v4253_v0 = vpop.permute.xlu1 %1218 }
 0x1ea   : > { %1923 = vperm.xlu0 %3222, %v3716_v45  }
 0x1eb   : > { %v4256_v26 = vpop.permute.xlu0 %1485  ;;  %1620 = vperm.xlu1 %3219, %v3861_v17  }
 0x1ec   : > { %5978 = vst [vmem:[#allocation94_spill] sm:$0xff] %v4256_v26 }
 0x1ed   : > { %v4259_v30 = vpop.permute.xlu1 %1226 }
 0x1ee   : > { %5979 = vst [vmem:[#allocation95_spill] sm:$0xff] %v4259_v30  ;;  %1931 = vperm.xlu0 %3222, %v3728_v47  }
 0x1ef   : > { %v4262_v5 = vpop.permute.xlu0 %1493  ;;  %3221 = vset.pattern.permute.xlu1 %v5981_v32 }
 0x1f0   : > { %5980 = vst [vmem:[#allocation96_spill] sm:$0xff] %v4262_v5  ;;  %1660 = vperm.xlu1 %3221, %v3660_v36  }
 0x1f1   : > { %v4266_v13 = vpop.permute.xlu1 %1234 }
 0x1f2   : > { %5982 = vst [vmem:[#allocation97_spill] sm:$0xff] %v4266_v13  ;;  %1939 = vperm.xlu0 %3222, %v3740_v49  }
 0x1f3   : > { %v4269_v31 = vpop.permute.xlu0 %1560 }
 0x1f4   : > { %5983 = vst [vmem:[#allocation98_spill] sm:$0xff] %v4269_v31  ;;  %1664 = vperm.xlu1 %3221, %v3666_v37  }
 0x1f5   : > { %v4272_v26 = vpop.permute.xlu1 %1242 }
 0x1f6   : > { %5984 = vst [vmem:[#allocation99_spill] sm:$0xff] %v4272_v26  ;;  %2006 = vperm.xlu0 %3222, %v3752_v51  }
 0x1f7   : > { %v4275_v30 = vpop.permute.xlu0 %1568 }
 0x1f8   : > { %5985 = vst [vmem:[#allocation100_spill] sm:$0xff] %v4275_v30  ;;  %1672 = vperm.xlu1 %3221, %v3684_v40  }
 0x1f9   : > { %v4278_v5 = vpop.permute.xlu1 %1250 }
 0x1fa   : > { %5986 = vst [vmem:[#allocation101_spill] sm:$0xff] %v4278_v5  ;;  %2014 = vperm.xlu0 %3222, %v3764_v53  }
 0x1fb   : > { %v4281_v32 = vpop.permute.xlu0 %1576 }
 0x1fc   : > { %5987 = vst [vmem:[#allocation102_spill] sm:$0xff] %v4281_v32  ;;  %1680 = vperm.xlu1 %3221, %v3703_v43  }
 0x1fd   : > { %v4284_v13 = vpop.permute.xlu1 %1258 }
 0x1fe   : > { %5988 = vst [vmem:[#allocation103_spill] sm:$0xff] %v4284_v13  ;;  %2022 = vperm.xlu0 %3222, %v3776_v55  }
 0x1ff   : > { %v4287_v31 = vpop.permute.xlu0 %1584 }
 0x200   : > { %5989 = vst [vmem:[#allocation104_spill] sm:$0xff] %v4287_v31  ;;  %1688 = vperm.xlu1 %3221, %v3722_v46  }
 0x201   : > { %v4290_v26 = vpop.permute.xlu1 %1266 }
 0x202   : > { %5990 = vst [vmem:[#allocation105_spill] sm:$0xff] %v4290_v26  ;;  %2030 = vperm.xlu0 %3222, %v3788_v57  }
 0x203   : > { %v4293_v30 = vpop.permute.xlu0 %1592 }
 0x204   : > { %5991 = vst [vmem:[#allocation106_spill] sm:$0xff] %v4293_v30  ;;  %1696 = vperm.xlu1 %3221, %v3734_v48  }
 0x205   : > { %v4296_v5 = vpop.permute.xlu1 %1327 }
 0x206   : > { %5992 = vst [vmem:[#allocation107_spill] sm:$0xff] %v4296_v5  ;;  %2038 = vperm.xlu0 %3222, %v3800_v59  }
 0x207   : > { %v4299_v32 = vpop.permute.xlu0 %1600 }
 0x208   : > { %5993 = vst [vmem:[#allocation108_spill] sm:$0xff] %v4299_v32  ;;  %1704 = vperm.xlu1 %3221, %v3746_v50  }
 0x209   : > { %v4302_v13 = vpop.permute.xlu1 %1341 }
 0x20a   : > { %5994 = vst [vmem:[#allocation109_spill] sm:$0xff] %v4302_v13  ;;  %2046 = vperm.xlu0 %3222, %v3812_v61  }
 0x20b   : > { %v4305_v31 = vpop.permute.xlu0 %1608 }
 0x20c   : > { %5995 = vst [vmem:[#allocation110_spill] sm:$0xff] %v4305_v31  ;;  %1712 = vperm.xlu1 %3221, %v3758_v52   ;;  %v5881_v31 = vmov 7  }
 0x20d   : > { %v4308_v26 = vpop.permute.xlu1 %1349 }
 0x20e   : > { %5996 = vst [vmem:[#allocation111_spill] sm:$0xff] %v4308_v26  ;;  %2054 = vperm.xlu0 %3222, %v3824_v63  }
 0x20f   : > { %v4311_v30 = vpop.permute.xlu0 %1616 }
 0x210   : > { %5997 = vst [vmem:[#allocation112_spill] sm:$0xff] %v4311_v30  ;;  %1773 = vperm.xlu1 %3221, %v3770_v54  }
 0x211   : > { %v4314_v5 = vpop.permute.xlu1 %1357 }
 0x212   : > { %5998 = vst [vmem:[#allocation113_spill] sm:$0xff] %v4314_v5  ;;  %2062 = vperm.xlu0 %3222, %v3836_v3  }
 0x214   : > { %v4317_v32 = vpop.permute.xlu0 %1656  ;;  %1787 = vperm.xlu1 %3221, %v3782_v56  }
 0x215   : > { %5999 = vst [vmem:[#allocation114_spill] sm:$0xff] %v4317_v32  ;;  %v4320_v13 = vpop.permute.xlu1 %1365 }
 0x216   : > { %6000 = vst [vmem:[#allocation115_spill] sm:$0xff] %v4320_v13  ;;  %3224 = vset.pattern.permute.xlu0 %v5881_v31 }
 0x217   : > { %2102 = vperm.xlu0 %3224, %v3671_v38  }
 0x218   : > { %v4324_v26 = vpop.permute.xlu0 %1668  ;;  %1795 = vperm.xlu1 %3221, %v3794_v58  }
 0x219   : > { %v4327_v30 = vpop.permute.xlu1 %1373 }
 0x21a   : > { %6001 = vst [vmem:[#allocation116_spill] sm:$0xff] %v4327_v30 }
 0x21b   : > { %2114 = vperm.xlu0 %3224, %v3677_v39  }
 0x21c   : > { %v4330_v5 = vpop.permute.xlu0 %1676  ;;  %1803 = vperm.xlu1 %3221, %v3806_v60  }
 0x21d   : > { %v4333_v32 = vpop.permute.xlu1 %1381 }
 0x21e   : > { %6002 = vst [vmem:[#allocation117_spill] sm:$0xff] %v4333_v32 }
 0x21f   : > { %2122 = vperm.xlu0 %3224, %v3690_v41  }
 0x220   : > { %v4336_v13 = vpop.permute.xlu0 %1684  ;;  %1811 = vperm.xlu1 %3221, %v3818_v62  }
 0x221   : > { %v4339_v38 = vpop.permute.xlu1 %1389 }
 0x222   : > { %6003 = vst [vmem:[#allocation118_spill] sm:$0xff] %v4339_v38 }
 0x223   : > { %2130 = vperm.xlu0 %3224, %v3697_v42  }
 0x224   : > { %v4342_v31 = vpop.permute.xlu0 %1692  ;;  %1819 = vperm.xlu1 %3221, %v3830_v2  }
 0x225   : > { %v4345_v39 = vpop.permute.xlu1 %1397 }
 0x226   : > { %6004 = vst [vmem:[#allocation119_spill] sm:$0xff] %v4345_v39 }
 0x227   : > { %2138 = vperm.xlu0 %3224, %v3709_v44  }
 0x228   : > { %v4348_v30 = vpop.permute.xlu0 %1700  ;;  %1827 = vperm.xlu1 %3221, %v3842_v6  }
 0x229   : > { %6005 = vst [vmem:[#allocation120_spill] sm:$0xff] %v4348_v30  ;;  %v6009_v30 = vmov 6  }
 0x22a   : > { %v4351_v41 = vpop.permute.xlu1 %1437 }
 0x22b   : > { %2146 = vperm.xlu0 %3224, %v3716_v45  }
 0x22c   : > { %v4354_v32 = vpop.permute.xlu0 %1708  ;;  %1835 = vperm.xlu1 %3221, %v3851_v11  }
 0x22d   : > { %6006 = vst [vmem:[#allocation121_spill] sm:$0xff] %v4354_v32 }
 0x22e   : > { %v4357_v42 = vpop.permute.xlu1 %1441 }
 0x22f   : > { %2154 = vperm.xlu0 %3224, %v3728_v47  }
 0x230   : > { %v4360_v38 = vpop.permute.xlu0 %1716  ;;  %1843 = vperm.xlu1 %3221, %v3861_v17  }
 0x231   : > { %6007 = vst [vmem:[#allocation122_spill] sm:$0xff] %v4360_v38 }
 0x232   : > { %v4363_v44 = vpop.permute.xlu1 %1449 }
 0x233   : > { %2162 = vperm.xlu0 %3224, %v3740_v49  }
 0x234   : > { %v4366_v39 = vpop.permute.xlu0 %1783  ;;  %3223 = vset.pattern.permute.xlu1 %v6009_v30  ;;  %v6022_v30 = vmov 0  }
 0x235   : > { %6008 = vst [vmem:[#allocation123_spill] sm:$0xff] %v4366_v39  ;;  %1883 = vperm.xlu1 %3223, %v3660_v36  }
 0x236   : > { %v4370_v45 = vpop.permute.xlu1 %1457 }
 0x237   : > { %2229 = vperm.xlu0 %3224, %v3752_v51  }
 0x238   : > { %v4373_v32 = vpop.permute.xlu0 %1791 }
 0x239   : > { %6010 = vst [vmem:[#allocation124_spill] sm:$0xff] %v4373_v32  ;;  %1887 = vperm.xlu1 %3223, %v3666_v37  }
 0x23a   : > { %v4376_v47 = vpop.permute.xlu1 %1465 }
 0x23b   : > { %2237 = vperm.xlu0 %3224, %v3764_v53  }
 0x23c   : > { %v4379_v38 = vpop.permute.xlu0 %1799 }
 0x23d   : > { %6011 = vst [vmem:[#allocation125_spill] sm:$0xff] %v4379_v38  ;;  %1895 = vperm.xlu1 %3223, %v3684_v40  }
 0x23e   : > { %v4382_v49 = vpop.permute.xlu1 %1473 }
 0x23f   : > { %2245 = vperm.xlu0 %3224, %v3776_v55  }
 0x240   : > { %v4385_v36 = vpop.permute.xlu0 %1807 }
 0x241   : > { %6012 = vst [vmem:[#allocation126_spill] sm:$0xff] %v4385_v36  ;;  %1903 = vperm.xlu1 %3223, %v3703_v43  }
 0x242   : > { %v4388_v51 = vpop.permute.xlu1 %1481 }
 0x243   : > { %2253 = vperm.xlu0 %3224, %v3788_v57  }
 0x244   : > { %v4391_v37 = vpop.permute.xlu0 %1815 }
 0x245   : > { %6013 = vst [vmem:[#allocation127_spill] sm:$0xff] %v4391_v37  ;;  %1911 = vperm.xlu1 %3223, %v3722_v46  }
 0x246   : > { %v4394_v53 = vpop.permute.xlu1 %1489 }
 0x247   : > { %6014 = vst [vmem:[#allocation128_spill] sm:$0xff] %v4394_v53  ;;  %2261 = vperm.xlu0 %3224, %v3800_v59  }
 0x248   : > { %v4397_v40 = vpop.permute.xlu0 %1823 }
 0x249   : > { %6015 = vst [vmem:[#allocation129_spill] sm:$0xff] %v4397_v40  ;;  %1919 = vperm.xlu1 %3223, %v3734_v48  }
 0x24a   : > { %v4400_v55 = vpop.permute.xlu1 %1550 }
 0x24b   : > { %6016 = vst [vmem:[#allocation130_spill] sm:$0xff] %v4400_v55  ;;  %2269 = vperm.xlu0 %3224, %v3812_v61  }
 0x24c   : > { %v4403_v43 = vpop.permute.xlu0 %1831 }
 0x24d   : > { %6017 = vst [vmem:[#allocation131_spill] sm:$0xff] %v4403_v43  ;;  %1927 = vperm.xlu1 %3223, %v3746_v50   ;;  %v3294_v50 = vld [vmem:[%s5866_s1] sm:$0xff] }
 0x24e   : > { %v4406_v57 = vpop.permute.xlu1 %1564 }
 0x24f   : > { %6018 = vst [vmem:[#allocation132_spill] sm:$0xff] %v4406_v57  ;;  %2277 = vperm.xlu0 %3224, %v3824_v63  }
 0x250   : > { %v4409_v46 = vpop.permute.xlu0 %1839 }
 0x251   : > { %6019 = vst [vmem:[#allocation133_spill] sm:$0xff] %v4409_v46  ;;  %1935 = vperm.xlu1 %3223, %v3758_v52  }
 0x252   : > { %v4412_v59 = vpop.permute.xlu1 %1572 }
 0x253   : > { %6020 = vst [vmem:[#allocation134_spill] sm:$0xff] %v4412_v59  ;;  %2285 = vperm.xlu0 %3224, %v3836_v3   ;;  %v3295_v3 = vld [vmem:[%s5866_s1 + $0x48] sm:$0xff] }
 0x255   : > { %v4415_v48 = vpop.permute.xlu0 %1879  ;;  %1996 = vperm.xlu1 %3223, %v3770_v54  }
 0x256   : > { %v4418_v61 = vpop.permute.xlu1 %1580 }
 0x257   : > { %6021 = vst [vmem:[#allocation135_spill] sm:$0xff] %v4418_v61  ;;  %3226 = vset.pattern.permute.xlu0 %v6022_v30  ;;  %v3312_v61 = vld [vmem:[%s5866_s1 + $0x50] sm:$0xff] }
 0x258   : > { %507 = vperm.xlu0 %3226, %v3294_v50   ;;  %v3296_v50 = vld [vmem:[%s5866_s1 + $0x58] sm:$0xff] }
 0x259   : > { %v4424_v63 = vpop.permute.xlu0 %1891  ;;  %2010 = vperm.xlu1 %3223, %v3782_v56  }
 0x25a   : > { %v4427_v52 = vpop.permute.xlu1 %1588 }
 0x25b   : > { %6023 = vst [vmem:[#allocation136_spill] sm:$0xff] %v4427_v52  ;;  %v4544_v52 = vld [vmem:[#allocation2 + $0x8] sm:$0xff] }
 0x25c   : > { %552 = vperm.xlu0 %3226, %v3295_v3   ;;  %v3297_v3 = vld [vmem:[%s5866_s1 + $0x68] sm:$0xff] }
 0x25d   : > { %v4432_v54 = vpop.permute.xlu0 %1899  ;;  %2018 = vperm.xlu1 %3223, %v3794_v58  }
 0x25e   : > { %v4435_v46 = vpop.permute.xlu1 %1596 }
 0x25f   : > { %6024 = vst [vmem:[#allocation137_spill] sm:$0xff] %v4435_v46 }
 0x260   : > { %562 = vperm.xlu0 %3226, %v3296_v50   ;;  %v3298_v50 = vld [vmem:[%s5866_s1 + $0x78] sm:$0xff] }
 0x261   : > { %v4440_v43 = vpop.permute.xlu0 %1907  ;;  %2026 = vperm.xlu1 %3223, %v3806_v60  }
 0x262   : > { %v4443_v56 = vpop.permute.xlu1 %1604 }
 0x263   : > { %6025 = vst [vmem:[#allocation138_spill] sm:$0xff] %v4443_v56 }
 0x264   : > { %572 = vperm.xlu0 %3226, %v3297_v3   ;;  %v3299_v3 = vld [vmem:[%s5868_s3] sm:$0xff] }
 0x265   : > { %v4448_v40 = vpop.permute.xlu0 %1915  ;;  %2034 = vperm.xlu1 %3223, %v3818_v62  }
 0x266   : > { %6026 = vst [vmem:[#allocation139_spill] sm:$0xff] %v4448_v40  ;;  %v4451_v58 = vpop.permute.xlu1 %1612 }
 0x267   : > { %6027 = vst [vmem:[#allocation140_spill] sm:$0xff] %v4451_v58 }
 0x268   : > { %582 = vperm.xlu0 %3226, %v3298_v50   ;;  %v3300_v50 = vld [vmem:[%s5868_s3 + $0x10] sm:$0xff] }
 0x269   : > { %v4456_v37 = vpop.permute.xlu0 %1923  ;;  %2042 = vperm.xlu1 %3223, %v3830_v2  }
 0x26a   : > { %6028 = vst [vmem:[#allocation141_spill] sm:$0xff] %v4456_v37  ;;  %v4459_v60 = vpop.permute.xlu1 %1620 }
 0x26b   : > { %6029 = vst [vmem:[#allocation142_spill] sm:$0xff] %v4459_v60  ;;  %v3303_v60 = vld [vmem:[%s5866_s1 + $0x8] sm:$0xff] }
 0x26c   : > { %669 = vperm.xlu0 %3226, %v3299_v3   ;;  %v3301_v3 = vld [vmem:[%s5868_s3 + $0x20] sm:$0xff] }
 0x26d   : > { %v4464_v36 = vpop.permute.xlu0 %1931  ;;  %2050 = vperm.xlu1 %3223, %v3842_v6  }
 0x26e   : > { %6030 = vst [vmem:[#allocation143_spill] sm:$0xff] %v4464_v36 }
 0x26f   : > { %v4467_v62 = vpop.permute.xlu1 %1660 }
 0x270   : > { %679 = vperm.xlu0 %3226, %v3300_v50   ;;  %v3302_v50 = vld [vmem:[%s5868_s3 + $0x30] sm:$0xff] }
 0x271   : > { %v4472_v38 = vpop.permute.xlu0 %1939  ;;  %2058 = vperm.xlu1 %3223, %v3851_v11   ;;  %v6034_v11 = vmov 7  }
 0x272   : > { %6031 = vst [vmem:[#allocation144_spill] sm:$0xff] %v4472_v38  ;;  %v4577_v38 = vld [vmem:[#allocation2 + $0x18] sm:$0xff] }
 0x273   : > { %v4475_v2 = vpop.permute.xlu1 %1664 }
 0x274   : > { %689 = vperm.xlu0 %3226, %v3301_v3  }
 0x275   : > { %v4480_v32 = vpop.permute.xlu0 %2006  ;;  %2066 = vperm.xlu1 %3223, %v3861_v17   ;;  %v3304_v17 = vld [vmem:[%s5868_s3 + $0x40] sm:$0xff] }
 0x276   : > { %6032 = vst [vmem:[#allocation145_spill] sm:$0xff] %v4480_v32 }
 0x277   : > { %v4483_v6 = vpop.permute.xlu1 %1672 }
 0x278   : > { %699 = vperm.xlu0 %3226, %v3302_v50   ;;  %v3305_v50 = vld [vmem:[%s5866_s1 + $0x10] sm:$0xff] }
 0x279   : > { %v4488_v39 = vpop.permute.xlu0 %2014  ;;  %3225 = vset.pattern.permute.xlu1 %v6034_v11 }
 0x27a   : > { %6033 = vst [vmem:[#allocation146_spill] sm:$0xff] %v4488_v39  ;;  %2106 = vperm.xlu1 %3225, %v3303_v60   ;;  %v3306_v60 = vld [vmem:[%s5868_s3 + $0x50] sm:$0xff] }
 0x27b   : > { %v4494_v3 = vpop.permute.xlu1 %1680 }
 0x27c   : > { %709 = vperm.xlu0 %3226, %v3304_v17   ;;  %v3307_v17 = vld [vmem:[%s5866_s1 + $0x20] sm:$0xff] }
 0x27d   : > { %v4499_v32 = vpop.permute.xlu0 %2022 }
 0x27e   : > { %6035 = vst [vmem:[#allocation147_spill] sm:$0xff] %v4499_v32  ;;  %2110 = vperm.xlu1 %3225, %v3305_v50   ;;  %v3308_v50 = vld [vmem:[%s5868_s3 + $0x60] sm:$0xff] }
 0x27f   : > { %v4504_v11 = vpop.permute.xlu1 %1688 }
 0x280   : > { %719 = vperm.xlu0 %3226, %v3306_v60   ;;  %v3309_v60 = vld [vmem:[%s5866_s1 + $0x30] sm:$0xff] }
 0x281   : > { %v4509_v39 = vpop.permute.xlu0 %2030 }
 0x282   : > { %6036 = vst [vmem:[#allocation148_spill] sm:$0xff] %v4509_v39  ;;  %2118 = vperm.xlu1 %3225, %v3307_v17   ;;  %v3310_v17 = vld [vmem:[%s5868_s3 + $0x70] sm:$0xff] }
 0x283   : > { %v4514_v32 = vpop.permute.xlu1 %1696 }
 0x284   : > { %729 = vperm.xlu0 %3226, %v3308_v50   ;;  %v2324_v50 = vld [vmem:[%s5869_s4] sm:$0xff] }
 0x285   : > { %v4519_v58 = vpop.permute.xlu0 %2038 }
 0x286   : > { %6037 = vst [vmem:[#allocation149_spill] sm:$0xff] %v4519_v58  ;;  %2126 = vperm.xlu1 %3225, %v3309_v60   ;;  %v3311_v58 = vld [vmem:[%s5866_s1 + $0x40] sm:$0xff] }
 0x287   : > { %v4524_v39 = vpop.permute.xlu1 %1704 }
 0x288   : > { %6038 = vst [vmem:[#allocation150_spill] sm:$0xff] %v4524_v39  ;;  %739 = vperm.xlu0 %3226, %v3310_v17   ;;  %v2327_v17 = vld [vmem:[%s5869_s4 + $0x18] sm:$0xff] }
 0x289   : > { %v4529_v56 = vpop.permute.xlu0 %2046 }
 0x28a   : > { %6039 = vst [vmem:[#allocation151_spill] sm:$0xff] %v4529_v56  ;;  %2134 = vperm.xlu1 %3225, %v3311_v58   ;;  %v4546_v56 = vld [vmem:[#allocation2] sm:$0xff]  ;;  %v828_v58 = vmul.f32 %v4039_v12, %v4544_v52 }
 0x28b   : > { %v4537_v46 = vpop.permute.xlu1 %1712  ;;  %v3313_v12 = vld [vmem:[%s5866_s1 + $0x60] sm:$0xff] }
 0x28c   : > { %6040 = vst [vmem:[#allocation152_spill] sm:$0xff] %v4537_v46  ;;  %2342 = vperm.xlu0 %3226, %v2324_v50   ;;  %v4555_v50 = vld [vmem:[#allocation2 + $0x10] sm:$0xff] }
 0x28d   : > { %v4539_v60 = vpop.permute.xlu0 %2054  ;;  %v829_v57 = vmul.f32 %v4045_v19, %v4555_v50 }
 0x28e   : > { %6041 = vst [vmem:[#allocation153_spill] sm:$0xff] %v4539_v60  ;;  %2142 = vperm.xlu1 %3225, %v3312_v61   ;;  %v827_v60 = vmul.f32 %v3925_v18, %v4546_v56  ;;  %v2329_v61 = vld [vmem:[%s5869_s4 + $0x28] sm:$0xff] }
 0x28f   : > { %v4553_v59 = vpop.permute.xlu1 %1773  ;;  %v846_v19 = vsel %vm601_vm2, %v829_v57, 0.0  ;;  %v4588_v57 = vld [vmem:[#allocation2 + $0x20] sm:$0xff] }
 0x290   : > { %6042 = vst [vmem:[#allocation154_spill] sm:$0xff] %v4553_v59  ;;  %2357 = vperm.xlu0 %3226, %v2327_v17   ;;  %v844_v17 = vsel %vm601_vm2, %v828_v58, 0.0  ;;  %v843_v18 = vsel %vm601_vm2, %v827_v60, 0.0  ;;  %v3314_v58 = vld [vmem:[%s5866_s1 + $0x70] sm:$0xff] }
 0x291   : > { %v4561_v55 = vpop.permute.xlu0 %2062  ;;  %v845_v36 = vadd.f32 %v844_v17, %v843_v18  ;;  %v1051_v17 = vmul.f32 %v4143_v4, %v4544_v52  ;;  %v2333_v18 = vld [vmem:[%s5869_s4 + $0x48] sm:$0xff] }
 0x292   : > { %6043 = vst [vmem:[#allocation155_spill] sm:$0xff] %v4561_v55  ;;  %2150 = vperm.xlu1 %3225, %v3313_v12   ;;  %v2331_v55 = vld [vmem:[%s5869_s4 + $0x38] sm:$0xff] }
 0x293   : > { %v4570_v59 = vpop.permute.xlu1 %1787  ;;  %v847_v12 = vadd.f32 %v846_v19, %v845_v36  ;;  %v645_v19 = vlaneseq }
 0x294   : > { %6044 = vst [vmem:[#allocation156_spill] sm:$0xff] %v4570_v59  ;;  %2367 = vperm.xlu0 %3226, %v2329_v61   ;;  %v830_v61 = vmul.f32 %v3932_v21, %v4577_v38  ;;  %v831_v59 = vmul.f32 %v4051_v10, %v4588_v57  ;;  %v3315_v21 = vld [vmem:[%s5867_s2] sm:$0x1]  ;;  %v1052_v10 = vmul.f32 %v4149_v28, %v4555_v50 }
 0x296   : > { %v4579_v46 = vpop.permute.xlu0 %2102  ;;  %2158 = vperm.xlu1 %3225, %v3314_v58   ;;  %v848_v36 = vsel %vm601_vm2, %v830_v61, 0.0  ;;  %v4614_v61 = vld [vmem:[#allocation2 + $0x28] sm:$0xff] }
 0x297   : > { %6045 = vst [vmem:[#allocation157_spill] sm:$0xff] %v4579_v46  ;;  %v4586_v60 = vpop.permute.xlu1 %1795  ;;  %v1067_v46 = vsel %vm601_vm2, %v1051_v17, 0.0  ;;  %v832_v28 = vmul.f32 %v3938_v23, %v4614_v61  ;;  %v2337_v23 = vld [vmem:[%s5869_s4 + $0x68] sm:$0xff] }
 0x298   : > { %6046 = vst [vmem:[#allocation158_spill] sm:$0xff] %v4586_v60  ;;  %2377 = vperm.xlu0 %3226, %v2331_v55   ;;  %v1050_v55 = vmul.f32 %v4023_v1, %v4546_v56  ;;  %v849_v60 = vadd.f32 %v848_v36, %v847_v12  ;;  %v3316_v1 = vld [vmem:[%s5868_s3 + $0x8] sm:$0xff]  ;;  %v1069_v12 = vsel %vm601_vm2, %v1052_v10, 0.0  ;;  %v646_v36 = vshrl.u32 %v645_v19, 7 }
 0x299   : > { %v587_v10 = vmul.f32 %v3923_v16, %v4555_v50  ;;  %v852_v19 = vsel %vm601_vm2, %v832_v28, 0.0  ;;  %v1274_v16 = vmul.f32 %v4247_v9, %v4544_v52  ;;  %v1273_v28 = vmul.f32 %v4121_v33, %v4546_v56  ;;  %v2339_v9 = vld [vmem:[%s5869_s4 + $0x78] sm:$0xff] }
 0x29a   : > { %v4597_v58 = vpop.permute.xlu0 %2114  ;;  %2219 = vperm.xlu1 %3225, %v3315_v21   ;;  %v2335_v21 = vld [vmem:[%s5869_s4 + $0x58] sm:$0xff] }
 0x29b   : > { %6047 = vst [vmem:[#allocation159_spill] sm:$0xff] %v4597_v58  ;;  %v4607_v4 = vpop.permute.xlu1 %1803  ;;  %v850_v58 = vsel %vm601_vm2, %v831_v59, 0.0  ;;  %v1066_v59 = vsel %vm601_vm2, %v1050_v55, 0.0  ;;  %v586_v55 = vmul.f32 %v3918_v15, %v4544_v52  ;;  %v1054_v15 = vmul.f32 %v4155_v7, %v4588_v57 }
 0x29c   : > { %6048 = vst [vmem:[#allocation160_spill] sm:$0xff] %v4607_v4  ;;  %2387 = vperm.xlu0 %3226, %v2333_v18   ;;  %v4627_v18 = vld [vmem:[#allocation2 + $0x30] sm:$0xff]  ;;  %v851_v4 = vadd.f32 %v850_v58, %v849_v60  ;;  %v1068_v53 = vadd.f32 %v1067_v46, %v1066_v59  ;;  %v588_v46 = vmul.f32 %v3930_v20, %v4577_v38 }
 0x29d   : > { %v1275_v7 = vmul.f32 %v4253_v0, %v4555_v50  ;;  %v3318_v0 = vld [vmem:[%s5868_s3 + $0x28] sm:$0xff] }
 0x29e   : > { %v4616_v37 = vpop.permute.xlu0 %2122  ;;  %2233 = vperm.xlu1 %3225, %v3316_v1   ;;  %v833_v1 = vmul.f32 %v4058_v34, %v4627_v18  ;;  %v1070_v60 = vadd.f32 %v1069_v12, %v1068_v53  ;;  %v3317_v34 = vld [vmem:[%s5868_s3 + $0x18] sm:$0xff]  ;;  %v590_v53 = vmul.f32 %v3942_v24, %v4614_v61  ;;  %v853_v59 = vadd.f32 %v852_v19, %v851_v4 }
 0x29f   : > { %6049 = vst [vmem:[#allocation161_spill] sm:$0xff] %v4616_v37  ;;  %v4625_v17 = vpop.permute.xlu1 %1811  ;;  %v1053_v37 = vmul.f32 %v4030_v8, %v4577_v38  ;;  %v589_v8 = vmul.f32 %v3936_v22, %v4588_v57  ;;  %v4670_v24 = vsel %vm601_vm2, %v586_v55, 0.0  ;;  %v4673_v4 = vsel %vm601_vm2, %v587_v10, 0.0  ;;  %v4690_v10 = vld [vmem:[#allocation2 + $0x48] sm:$0xff] }
 0x2a0   : > { %6050 = vst [vmem:[#allocation162_spill] sm:$0xff] %v4625_v17  ;;  %2397 = vperm.xlu0 %3226, %v2335_v21   ;;  %v4658_v21 = vsub.s32 0, %v646_v36  ;;  %v854_v22 = vsel %vm601_vm2, %v833_v1, 0.0  ;;  %6054 = vst [vmem:[#allocation166_spill] sm:$0xff] %v4670_v24  ;;  %v4678_v36 = vld [vmem:[#allocation2 + $0x38] sm:$0xff]  ;;  %v4697_v19 = vsel %vm601_vm2, %v590_v53, 0.0 }
 0x2a1   : > { %v1071_v12 = vsel %vm601_vm2, %v1053_v37, 0.0  ;;  %6055 = vst [vmem:[#allocation167_spill] sm:$0xff] %v4673_v4  ;;  %v4676_v37 = vsel %vm601_vm2, %v588_v46, 0.0  ;;  %v834_v55 = vmul.f32 %v3944_v25, %v4678_v36  ;;  %v1073_v46 = vsel %vm601_vm2, %v1054_v15, 0.0  ;;  %6060 = vst [vmem:[#allocation172_spill] sm:$0xff] %v4697_v19  ;;  %v6065_v19 = vld [vmem:[#allocation65_spill] sm:$0xff] }
 0x2a2   : > { %v4642_v58 = vpop.permute.xlu0 %2130  ;;  %2241 = vperm.xlu1 %3225, %v3317_v34   ;;  %6053 = vst [vmem:[#allocation165_spill] sm:$0xff] %v4658_v21  ;;  %6056 = vst [vmem:[#allocation168_spill] sm:$0xff] %v4676_v37  ;;  %v1072_v1 = vadd.f32 %v1071_v12, %v1070_v60  ;;  %v1290_v34 = vsel %vm601_vm2, %v1274_v16, 0.0  ;;  %v836_v12 = vmul.f32 %v3950_v27, %v4690_v10  ;;  %v4709_v16 = vld [vmem:[#allocation2 + $0x68] sm:$0xff]  ;;  %v1289_v27 = vsel %vm601_vm2, %v1273_v28, 0.0  ;;  %v3319_v21 = vld [vmem:[%s5868_s3 + $0x38] sm:$0xff] }
 0x2a3   : > { %6051 = vst [vmem:[#allocation163_spill] sm:$0xff] %v4642_v58  ;;  %v4654_v20 = vpop.permute.xlu1 %1819  ;;  %v1055_v25 = vmul.f32 %v4036_v14, %v4614_v61  ;;  %v6061_v58 = vld [vmem:[#allocation12_spill] sm:$0xff]  ;;  %v6062_v14 = vld [vmem:[#allocation14_spill] sm:$0xff]  ;;  %v6064_v28 = vld [vmem:[#allocation57_spill] sm:$0xff] }
 0x2a4   : > { %6052 = vst [vmem:[#allocation164_spill] sm:$0xff] %v4654_v20  ;;  %2407 = vperm.xlu0 %3226, %v2337_v23   ;;  %v4686_v23 = vsel %vm601_vm2, %v589_v8, 0.0  ;;  %v4703_v8 = vld [vmem:[#allocation2 + $0x40] sm:$0xff]  ;;  %v855_v20 = vadd.f32 %v854_v22, %v853_v59  ;;  %v840_v17 = vmul.f32 %v6061_v58, %v4709_v16  ;;  %v1074_v22 = vadd.f32 %v1073_v46, %v1072_v1  ;;  %v6075_v24 = vld [vmem:[#allocation59_spill] sm:$0xff] }
 0x2a5   : > { %6058 = vst [vmem:[#allocation170_spill] sm:$0xff] %v4686_v23  ;;  %v835_v53 = vmul.f32 %v4064_v35, %v4703_v8  ;;  %v856_v35 = vsel %vm601_vm2, %v834_v55, 0.0  ;;  %v1056_v58 = vmul.f32 %v6065_v19, %v4627_v18  ;;  %v860_v46 = vsel %vm601_vm2, %v836_v12, 0.0  ;;  %v6067_v55 = vld [vmem:[#allocation84_spill] sm:$0xff] }
 0x2a6   : > { %v4680_v33 = vpop.permute.xlu0 %2138  ;;  %2249 = vperm.xlu1 %3225, %v3318_v0   ;;  %v4701_v0 = vld [vmem:[#allocation2 + $0x58] sm:$0xff]  ;;  %v1496_v23 = vmul.f32 %v6067_v55, %v4546_v56  ;;  %v1498_v19 = vmul.f32 %v4357_v42, %v4555_v50  ;;  %v4748_v12 = vsel %vm601_vm2, %v840_v17, 0.0  ;;  %v6070_v42 = vld [vmem:[#allocation34_spill] sm:$0xff] }
 0x2a7   : > { %6057 = vst [vmem:[#allocation169_spill] sm:$0xff] %v4680_v33  ;;  %v4694_v60 = vpop.permute.xlu1 %1827  ;;  %v838_v15 = vmul.f32 %v3957_v29, %v4701_v0  ;;  %v1292_v33 = vsel %vm601_vm2, %v1275_v7, 0.0  ;;  %v1276_v7 = vmul.f32 %v6064_v28, %v4577_v38  ;;  %v6068_v28 = vld [vmem:[#allocation95_spill] sm:$0xff]  ;;  %v1077_v17 = vsel %vm601_vm2, %v1056_v58, 0.0 }
 0x2a8   : > { %6059 = vst [vmem:[#allocation171_spill] sm:$0xff] %v4694_v60  ;;  %2417 = vperm.xlu0 %3226, %v2339_v9   ;;  %v4711_v60 = vld [vmem:[#allocation2 + $0x78] sm:$0xff]  ;;  %v1291_v9 = vadd.f32 %v1290_v34, %v1289_v27  ;;  %v1075_v34 = vsel %vm601_vm2, %v1055_v25, 0.0  ;;  %v857_v27 = vadd.f32 %v856_v35, %v855_v20  ;;  %v1277_v37 = vmul.f32 %v6068_v28, %v4588_v57 }
 0x2a9   : > { %v842_v59 = vmul.f32 %v6062_v14, %v4711_v60  ;;  %v1497_v14 = vmul.f32 %v4351_v41, %v4544_v52  ;;  %v4745_v41 = vsel %vm601_vm2, %v838_v15, 0.0  ;;  %v1057_v15 = vmul.f32 %v6070_v42, %v4678_v36 }
 0x2aa   : > { %v4721_v29 = vpop.permute.xlu0 %2146  ;;  %2257 = vperm.xlu1 %3225, %v3319_v21   ;;  %v858_v21 = vsel %vm601_vm2, %v835_v53, 0.0  ;;  %v3320_v53 = vld [vmem:[%s5868_s3 + $0x48] sm:$0xff]  ;;  %v1294_v35 = vsel %vm601_vm2, %v1276_v7, 0.0  ;;  %v1512_v4 = vsel %vm601_vm2, %v1496_v23, 0.0  ;;  %v1296_v42 = vsel %vm601_vm2, %v1277_v37, 0.0  ;;  %v3321_v23 = vld [vmem:[%s5868_s3 + $0x58] sm:$0xff] }
 0x2ab   : > { %6063 = vst [vmem:[#allocation12_spill] sm:$0xff] %v4721_v29  ;;  %v4733_v1 = vpop.permute.xlu1 %1835  ;;  %v1293_v29 = vadd.f32 %v1292_v33, %v1291_v9  ;;  %v4751_v20 = vsel %vm601_vm2, %v842_v59, 0.0  ;;  %v1076_v33 = vadd.f32 %v1075_v34, %v1074_v22  ;;  %v4758_v9 = vld [vmem:[#allocation2 + $0x50] sm:$0xff]  ;;  %v1513_v59 = vsel %vm601_vm2, %v1497_v14, 0.0  ;;  %v6074_v14 = vld [vmem:[#allocation36_spill] sm:$0xff] }
 0x2ac   : > { %6066 = vst [vmem:[#allocation14_spill] sm:$0xff] %v4733_v1  ;;  %v6072_v22 = vld [vmem:[#allocation35_spill] sm:$0xff]  ;;  %v859_v28 = vadd.f32 %v858_v21, %v857_v27  ;;  %v1515_v7 = vsel %vm601_vm2, %v1498_v19, 0.0  ;;  %v1720_v58 = vmul.f32 %v4467_v62, %v4544_v52  ;;  %v1514_v21 = vadd.f32 %v1513_v59, %v1512_v4  ;;  %v6078_v62 = vld [vmem:[#allocation86_spill] sm:$0xff] }
 0x2ad   : > { %v1059_v34 = vmul.f32 %v6072_v22, %v4690_v10  ;;  %v6073_v1 = vld [vmem:[#allocation39_spill] sm:$0xff]  ;;  %v1278_v22 = vmul.f32 %v6075_v24, %v4614_v61  ;;  %v1078_v27 = vadd.f32 %v1077_v17, %v1076_v33  ;;  %v6079_v19 = vld [vmem:[#allocation114_spill] sm:$0xff]  ;;  %v1721_v24 = vmul.f32 %v4475_v2, %v4555_v50 }
 0x2ae   : > { %v4753_v25 = vpop.permute.xlu0 %2154  ;;  %2265 = vperm.xlu1 %3225, %v3320_v53   ;;  %v837_v53 = vmul.f32 %v6073_v1, %v4758_v9  ;;  %v6077_v37 = vld [vmem:[#allocation67_spill] sm:$0xff]  ;;  %v1499_v1 = vmul.f32 %v6078_v62, %v4577_v38  ;;  %v1079_v4 = vsel %vm601_vm2, %v1057_v15, 0.0  ;;  %v861_v33 = vadd.f32 %v860_v46, %v859_v28  ;;  %v3322_v28 = vld [vmem:[%s5868_s3 + $0x68] sm:$0xff] }
 0x2af   : > { %6069 = vst [vmem:[#allocation57_spill] sm:$0xff] %v4753_v25  ;;  %v4765_v55 = vpop.permute.xlu1 %1843  ;;  %v1295_v25 = vadd.f32 %v1294_v35, %v1293_v29  ;;  %v1058_v29 = vmul.f32 %v6077_v37, %v4703_v8  ;;  %v1719_v35 = vmul.f32 %v6079_v19, %v4546_v56  ;;  %v1516_v59 = vadd.f32 %v1515_v7, %v1514_v21 }
 0x2b0   : > { %6071 = vst [vmem:[#allocation65_spill] sm:$0xff] %v4765_v55  ;;  %v1061_v55 = vmul.f32 %v6074_v14, %v4701_v0  ;;  %v1500_v62 = vmul.f32 %v4363_v44, %v4588_v57  ;;  %v1736_v40 = vsel %vm601_vm2, %v1720_v58, 0.0  ;;  %v1083_v19 = vsel %vm601_vm2, %v1059_v34, 0.0 }
 0x2b1   : > { %v1297_v17 = vadd.f32 %v1296_v42, %v1295_v25  ;;  %v1298_v46 = vsel %vm601_vm2, %v1278_v22, 0.0  ;;  %v1080_v25 = vadd.f32 %v1079_v4, %v1078_v27  ;;  %v1517_v44 = vsel %vm601_vm2, %v1499_v1, 0.0  ;;  %v4814_v27 = vld [vmem:[#allocation2 + $0x60] sm:$0xff] }
 0x2b2   : > { %v4780_v39 = vpop.permute.xlu0 %2162  ;;  %2273 = vperm.xlu1 %3225, %v3321_v23   ;;  %v862_v23 = vsel %vm601_vm2, %v837_v53, 0.0  ;;  %v4802_v2 = vsel %vm601_vm2, %v1061_v55, 0.0  ;;  %v1735_v53 = vsel %vm601_vm2, %v1719_v35, 0.0  ;;  %v1738_v34 = vsel %vm601_vm2, %v1721_v24, 0.0  ;;  %v6082_v35 = vld [vmem:[#allocation41_spill] sm:$0xff] }
 0x2b3   : > { %6076 = vst [vmem:[#allocation84_spill] sm:$0xff] %v4780_v39  ;;  %v6080_v39 = vld [vmem:[#allocation97_spill] sm:$0xff]  ;;  %v863_v55 = vadd.f32 %v862_v23, %v861_v33  ;;  %v1299_v42 = vadd.f32 %v1298_v46, %v1297_v17  ;;  %v1518_v7 = vadd.f32 %v1517_v44, %v1516_v59  ;;  %v1737_v58 = vadd.f32 %v1736_v40, %v1735_v53  ;;  %v3323_v23 = vld [vmem:[%s5868_s3 + $0x78] sm:$0xff] }
 0x2b4   : > { %v1884_v14 = vpop.permute.xlu1 %1883  ;;  %v1279_v37 = vmul.f32 %v6080_v39, %v4627_v18  ;;  %v1081_v39 = vsel %vm601_vm2, %v1058_v29, 0.0  ;;  %v1722_v4 = vmul.f32 %v4324_v26, %v4577_v38  ;;  %v1519_v29 = vsel %vm601_vm2, %v1500_v62, 0.0  ;;  %v6083_v24 = vld [vmem:[#allocation61_spill] sm:$0xff]  ;;  %v6085_v26 = vld [vmem:[#allocation88_spill] sm:$0xff] }
 0x2b5   : > { %v1943_v1 = vmul.f32 %v1884_v14, %v4544_v52  ;;  %v1280_v33 = vmul.f32 %v6083_v24, %v4678_v36  ;;  %v1082_v17 = vadd.f32 %v1081_v39, %v1080_v25  ;;  %v1739_v40 = vadd.f32 %v1738_v34, %v1737_v58  ;;  %v6086_v39 = vld [vmem:[#allocation69_spill] sm:$0xff]  ;;  %v6087_v24 = vld [vmem:[#allocation99_spill] sm:$0xff] }
 0x2b6   : > { %v4805_v15 = vpop.permute.xlu0 %2229  ;;  %2281 = vperm.xlu1 %3225, %v3322_v28   ;;  %v1300_v21 = vsel %vm601_vm2, %v1279_v37, 0.0  ;;  %v839_v28 = vmul.f32 %v6082_v35, %v4814_v27  ;;  %v1501_v37 = vmul.f32 %v6085_v26, %v4614_v61  ;;  %v1942_v14 = vmul.f32 %v4415_v48, %v4546_v56  ;;  %v2325_v35 = vld [vmem:[%s5869_s4 + $0x8] sm:$0xff] }
 0x2b7   : > { %6081 = vst [vmem:[#allocation95_spill] sm:$0xff] %v4805_v15  ;;  %v1723_v62 = vmul.f32 %v4483_v6, %v4588_v57  ;;  %v865_v25 = vadd.f32 %v4745_v41, %v863_v55  ;;  %v1060_v44 = vmul.f32 %v6086_v39, %v4758_v9  ;;  %v1301_v53 = vadd.f32 %v1300_v21, %v1299_v42 }
 0x2b8   : > { %v1888_v22 = vpop.permute.xlu1 %1887  ;;  %v1520_v34 = vadd.f32 %v1519_v29, %v1518_v7  ;;  %v1281_v48 = vmul.f32 %v6087_v24, %v4703_v8  ;;  %v1502_v6 = vmul.f32 %v4370_v45, %v4627_v18  ;;  %v1959_v41 = vsel %vm601_vm2, %v1943_v1, 0.0 }
 0x2b9   : > { %v1944_v46 = vmul.f32 %v1888_v22, %v4555_v50  ;;  %v866_v55 = vsel %vm601_vm2, %v839_v28, 0.0  ;;  %v1302_v42 = vsel %vm601_vm2, %v1280_v33, 0.0  ;;  %v1084_v7 = vadd.f32 %v1083_v19, %v1082_v17  ;;  %v2326_v17 = vld [vmem:[%s5869_s4 + $0x10] sm:$0xff] }
 0x2ba   : > { %v4825_v59 = vpop.permute.xlu0 %2237  ;;  %2289 = vperm.xlu1 %3225, %v3323_v23   ;;  %v1740_v23 = vsel %vm601_vm2, %v1722_v4, 0.0  ;;  %v1521_v29 = vsel %vm601_vm2, %v1501_v37, 0.0  ;;  %v1958_v26 = vsel %vm601_vm2, %v1942_v14, 0.0  ;;  %v1742_v4 = vsel %vm601_vm2, %v1723_v62, 0.0 }
 0x2bb   : > { %6084 = vst [vmem:[#allocation34_spill] sm:$0xff] %v4825_v59  ;;  %v1741_v22 = vadd.f32 %v1740_v23, %v1739_v40  ;;  %v1961_v45 = vsel %vm601_vm2, %v1944_v46, 0.0  ;;  %v1085_v1 = vsel %vm601_vm2, %v1060_v44, 0.0  ;;  %v1303_v28 = vadd.f32 %v1302_v42, %v1301_v53  ;;  %v6089_v44 = vld [vmem:[#allocation43_spill] sm:$0xff]  ;;  %v6091_v23 = vld [vmem:[#allocation62_spill] sm:$0xff] }
 0x2bc   : > { %v1896_v58 = vpop.permute.xlu1 %1895  ;;  %v1522_v39 = vadd.f32 %v1521_v29, %v1520_v34  ;;  %v1960_v33 = vadd.f32 %v1959_v41, %v1958_v26  ;;  %v1304_v40 = vsel %vm601_vm2, %v1281_v48, 0.0  ;;  %v1724_v37 = vmul.f32 %v4330_v5, %v4614_v61  ;;  %v6092_v48 = vld [vmem:[#allocation90_spill] sm:$0xff]  ;;  %v2328_v26 = vld [vmem:[%s5869_s4 + $0x20] sm:$0xff] }
 0x2bd   : > { %v1523_v14 = vsel %vm601_vm2, %v1502_v6, 0.0  ;;  %v1945_v62 = vmul.f32 %v4424_v63, %v4577_v38  ;;  %v867_v46 = vadd.f32 %v866_v55, %v865_v25  ;;  %v1743_v34 = vadd.f32 %v1742_v4, %v1741_v22  ;;  %v6093_v63 = vld [vmem:[#allocation71_spill] sm:$0xff]  ;;  %v6094_v4 = vld [vmem:[#allocation101_spill] sm:$0xff] }
 0x2be   : > { %v4851_v21 = vpop.permute.xlu0 %2245  ;;  %3227 = vset.pattern.permute.xlu1 %v6022_v30  ;;  %v4862_v30 = vld [vmem:[#allocation2 + $0x70] sm:$0xff]  ;;  %v1282_v41 = vmul.f32 %v6091_v23, %v4690_v10  ;;  %v1503_v42 = vmul.f32 %v6092_v48, %v4678_v36  ;;  %v1725_v5 = vmul.f32 %v4494_v3, %v4627_v18  ;;  %v1946_v6 = vmul.f32 %v1896_v58, %v4588_v57 }
 0x2bf   : > { %6088 = vst [vmem:[#allocation35_spill] sm:$0xff] %v4851_v21  ;;  %2347 = vperm.xlu1 %3227, %v2325_v35   ;;  %v841_v53 = vmul.f32 %v6089_v44, %v4862_v30  ;;  %v1962_v35 = vadd.f32 %v1961_v45, %v1960_v33  ;;  %v1086_v38 = vadd.f32 %v1085_v1, %v1084_v7  ;;  %v1744_v3 = vsel %vm601_vm2, %v1724_v37, 0.0  ;;  %v6168_v21 = vld [vmem:[#allocation85_spill] sm:$0xff] }
 0x2c0   : > { %v1904_v19 = vpop.permute.xlu1 %1903  ;;  %v1062_v25 = vmul.f32 %v6093_v63, %v4814_v27  ;;  %v1305_v55 = vadd.f32 %v1304_v40, %v1303_v28  ;;  %v1524_v22 = vadd.f32 %v1523_v14, %v1522_v39  ;;  %v1283_v45 = vmul.f32 %v6094_v4, %v4758_v9  ;;  %v6098_v63 = vld [vmem:[#allocation63_spill] sm:$0xff] }
 0x2c1   : > { %v1504_v57 = vmul.f32 %v4376_v47, %v4703_v8  ;;  %v1963_v58 = vsel %vm601_vm2, %v1945_v62, 0.0  ;;  %v869_v7 = vadd.f32 %v4748_v12, %v867_v46  ;;  %v870_v1 = vsel %vm601_vm2, %v841_v53, 0.0  ;;  %v2330_v53 = vld [vmem:[%s5869_s4 + $0x30] sm:$0xff] }
 0x2c2   : > { %v4872_v24 = vpop.permute.xlu0 %2253  ;;  %v1745_v28 = vadd.f32 %v1744_v3, %v1743_v34  ;;  %v1964_v39 = vadd.f32 %v1963_v58, %v1962_v35  ;;  %v1525_v40 = vsel %vm601_vm2, %v1503_v42, 0.0  ;;  %v1746_v14 = vsel %vm601_vm2, %v1725_v5, 0.0  ;;  %v2332_v58 = vld [vmem:[%s5869_s4 + $0x40] sm:$0xff] }
 0x2c3   : > { %6090 = vst [vmem:[#allocation39_spill] sm:$0xff] %v4872_v24  ;;  %2352 = vperm.xlu1 %3227, %v2326_v17   ;;  %v1306_v17 = vsel %vm601_vm2, %v1282_v41, 0.0  ;;  %v1965_v37 = vsel %vm601_vm2, %v1946_v6, 0.0  ;;  %v1088_v47 = vadd.f32 %v4802_v2, %v1086_v38  ;;  %v1089_v62 = vsel %vm601_vm2, %v1062_v25, 0.0  ;;  %v6096_v41 = vld [vmem:[#allocation37_spill] sm:$0xff] }
 0x2c4   : > { %v4883_v29 = vpop.permute.xlu1 %1911  ;;  %v1307_v12 = vadd.f32 %v1306_v17, %v1305_v55  ;;  %v1526_v46 = vadd.f32 %v1525_v40, %v1524_v22  ;;  %v1308_v34 = vsel %vm601_vm2, %v1283_v45, 0.0  ;;  %v1726_v35 = vmul.f32 %v4336_v13, %v4678_v36  ;;  %v6099_v55 = vld [vmem:[#allocation92_spill] sm:$0xff] }
 0x2c5   : > { %v1527_v23 = vsel %vm601_vm2, %v1504_v57, 0.0  ;;  %v1947_v2 = vmul.f32 %v4432_v54, %v4614_v61  ;;  %v1063_v48 = vmul.f32 %v6096_v41, %v4709_v16  ;;  %v871_v42 = vadd.f32 %v870_v1, %v869_v7  ;;  %v6100_v61 = vld [vmem:[#allocation73_spill] sm:$0xff]  ;;  %v6101_v7 = vld [vmem:[#allocation103_spill] sm:$0xff] }
 0x2c6   : > { %v4896_v33 = vpop.permute.xlu0 %2261  ;;  %v1747_v5 = vadd.f32 %v1746_v14, %v1745_v28  ;;  %v1966_v6 = vadd.f32 %v1965_v37, %v1964_v39  ;;  %v1284_v25 = vmul.f32 %v6098_v63, %v4701_v0  ;;  %v1505_v22 = vmul.f32 %v6099_v55, %v4690_v10 }
 0x2c7   : > { %6095 = vst [vmem:[#allocation36_spill] sm:$0xff] %v4896_v33  ;;  %2362 = vperm.xlu1 %3227, %v2328_v26   ;;  %v1727_v13 = vmul.f32 %v4504_v11, %v4703_v8  ;;  %v1948_v26 = vmul.f32 %v1904_v19, %v4627_v18  ;;  %v1090_v54 = vadd.f32 %v1089_v62, %v1088_v47  ;;  %v1748_v11 = vsel %vm601_vm2, %v1726_v35, 0.0 }
 0x2c8   : > { %v4904_v44 = vpop.permute.xlu1 %1919  ;;  %v1064_v4 = vmul.f32 %v6100_v61, %v4862_v30  ;;  %v1309_v45 = vadd.f32 %v1308_v34, %v1307_v12  ;;  %v1528_v3 = vadd.f32 %v1527_v23, %v1526_v46  ;;  %v1285_v1 = vmul.f32 %v6101_v7, %v4814_v27 }
 0x2c9   : > { %v1506_v19 = vmul.f32 %v4382_v49, %v4758_v9  ;;  %v1967_v28 = vsel %vm601_vm2, %v1947_v2, 0.0  ;;  %v1091_v39 = vsel %vm601_vm2, %v1063_v48, 0.0  ;;  %v873_v17 = vadd.f32 %v4751_v20, %v871_v42  ;;  %v2334_v20 = vld [vmem:[%s5869_s4 + $0x50] sm:$0xff] }
 0x2ca   : > { %v4917_v38 = vpop.permute.xlu0 %2269  ;;  %v1749_v40 = vadd.f32 %v1748_v11, %v1747_v5  ;;  %v1968_v14 = vadd.f32 %v1967_v28, %v1966_v6  ;;  %v1310_v47 = vsel %vm601_vm2, %v1284_v25, 0.0  ;;  %v1529_v62 = vsel %vm601_vm2, %v1505_v22, 0.0  ;;  %v6103_v5 = vld [vmem:[#allocation38_spill] sm:$0xff]  ;;  %v2336_v11 = vld [vmem:[%s5869_s4 + $0x60] sm:$0xff] }
 0x2cb   : > { %6097 = vst [vmem:[#allocation59_spill] sm:$0xff] %v4917_v38  ;;  %2372 = vperm.xlu1 %3227, %v2330_v53   ;;  %v1750_v12 = vsel %vm601_vm2, %v1727_v13, 0.0  ;;  %v1969_v46 = vsel %vm601_vm2, %v1948_v26, 0.0  ;;  %v1092_v49 = vadd.f32 %v1091_v39, %v1090_v54  ;;  %v1093_v53 = vsel %vm601_vm2, %v1064_v4, 0.0  ;;  %v6105_v13 = vld [vmem:[#allocation64_spill] sm:$0xff]  ;;  %v6106_v54 = vld [vmem:[#allocation93_spill] sm:$0xff] }
 0x2cc   : > { %v4928_v57 = vpop.permute.xlu1 %1927  ;;  %v1311_v34 = vadd.f32 %v1310_v47, %v1309_v45  ;;  %v1530_v35 = vadd.f32 %v1529_v62, %v1528_v3  ;;  %v1312_v2 = vsel %vm601_vm2, %v1285_v1, 0.0  ;;  %v1728_v41 = vmul.f32 %v4342_v31, %v4690_v10  ;;  %v6107_v4 = vld [vmem:[#allocation9_spill] sm:$0xff] }
 0x2cd   : > { %v1531_v48 = vsel %vm601_vm2, %v1506_v19, 0.0  ;;  %v1949_v42 = vmul.f32 %v4440_v43, %v4678_v36  ;;  %v1065_v6 = vmul.f32 %v6103_v5, %v4711_v60  ;;  %v874_v63 = vrot.slane %v873_v17, 4  ;;  %v6108_v19 = vld [vmem:[#allocation105_spill] sm:$0xff] }
 0x2ce   : > { %v4941_v37 = vpop.permute.xlu0 %2277  ;;  %v1751_v25 = vadd.f32 %v1750_v12, %v1749_v40  ;;  %v1970_v55 = vadd.f32 %v1969_v46, %v1968_v14  ;;  %v1286_v26 = vmul.f32 %v6105_v13, %v4709_v16  ;;  %v1507_v61 = vmul.f32 %v6106_v54, %v4701_v0  ;;  %v6112_v54 = vld [vmem:[#allocation94_spill] sm:$0xff] }
 0x2cf   : > { %6102 = vst [vmem:[#allocation67_spill] sm:$0xff] %v4941_v37  ;;  %2382 = vperm.xlu1 %3227, %v2332_v58   ;;  %v1729_v31 = vmul.f32 %v4514_v32, %v4758_v9  ;;  %v1950_v43 = vmul.f32 %v4883_v29, %v4703_v8  ;;  %v4973_v45 = vmul.f32 %v6107_v4, %v4627_v18  ;;  %v1752_v28 = vsel %vm601_vm2, %v1728_v41, 0.0 }
 0x2d0   : > { %v4948_v23 = vpop.permute.xlu1 %1935  ;;  %v1094_v3 = vadd.f32 %v1093_v53, %v1092_v49  ;;  %v1313_v58 = vadd.f32 %v1312_v2, %v1311_v34  ;;  %v1532_v7 = vadd.f32 %v1531_v48, %v1530_v35  ;;  %v1287_v32 = vmul.f32 %v6108_v19, %v4862_v30  ;;  %v6109_v48 = vld [vmem:[#allocation120_spill] sm:$0xff] }
 0x2d1   : > { %v1508_v29 = vmul.f32 %v4388_v51, %v4814_v27  ;;  %v1971_v18 = vsel %vm601_vm2, %v1949_v42, 0.0  ;;  %v1095_v39 = vsel %vm601_vm2, %v1065_v6, 0.0  ;;  %v875_v40 = vadd.f32 %v874_v63, %v873_v17  ;;  %v2338_v17 = vld [vmem:[%s5869_s4 + $0x70] sm:$0xff] }
 0x2d2   : > { %v4961_v22 = vpop.permute.xlu0 %2285  ;;  %v1753_v14 = vadd.f32 %v1752_v28, %v1751_v25  ;;  %v1972_v47 = vadd.f32 %v1971_v18, %v1970_v55  ;;  %v1314_v62 = vsel %vm601_vm2, %v1286_v26, 0.0  ;;  %v1533_v12 = vsel %vm601_vm2, %v1507_v61, 0.0  ;;  %v6110_v6 = vld [vmem:[#allocation139_spill] sm:$0xff]  ;;  %v6111_v25 = vld [vmem:[#allocation66_spill] sm:$0xff] }
 0x2d3   : > { %6104 = vst [vmem:[#allocation86_spill] sm:$0xff] %v4961_v22  ;;  %2392 = vperm.xlu1 %3227, %v2334_v20   ;;  %v1754_v46 = vsel %vm601_vm2, %v1729_v31, 0.0  ;;  %v1973_v49 = vsel %vm601_vm2, %v1950_v43, 0.0  ;;  %v1096_v34 = vadd.f32 %v1095_v39, %v1094_v3  ;;  %v1315_v35 = vadd.f32 %v1314_v62, %v1313_v58  ;;  %v6113_v31 = vld [vmem:[#allocation150_spill] sm:$0xff]  ;;  %v6115_v39 = vld [vmem:[#allocation128_spill] sm:$0xff]  ;;  %v6116_v62 = vld [vmem:[#allocation167_spill] sm:$0xff] }
 0x2d4   : > { %v4975_v1 = vpop.permute.xlu1 %1996  ;;  %v1534_v51 = vadd.f32 %v1533_v12, %v1532_v7  ;;  %v1316_v41 = vsel %vm601_vm2, %v1287_v32, 0.0  ;;  %v1730_v42 = vmul.f32 %v6109_v48, %v4701_v0  ;;  %v1535_v5 = vsel %vm601_vm2, %v1508_v29, 0.0  ;;  %v6114_v3 = vld [vmem:[#allocation166_spill] sm:$0xff]  ;;  %v6160_v22 = vld [vmem:[#allocation77_spill] sm:$0xff] }
 0x2d5   : > { %v1951_v63 = vmul.f32 %v6110_v6, %v4690_v10  ;;  %v1288_v55 = vmul.f32 %v6111_v25, %v4711_v60  ;;  %v1974_v13 = vadd.f32 %v1973_v49, %v1972_v47  ;;  %v1509_v61 = vmul.f32 %v6112_v54, %v4709_v16 }
 0x2d6   : > { %v1731_v43 = vmul.f32 %v6113_v31, %v4814_v27  ;;  %v1952_v4 = vmul.f32 %v4904_v44, %v4758_v9  ;;  %v1097_v19 = vrot.slane %v1096_v34, 4  ;;  %v1317_v32 = vadd.f32 %v1316_v41, %v1315_v35  ;;  %v6117_v44 = vld [vmem:[#allocation10_spill] sm:$0xff]  ;;  %v6118_v41 = vld [vmem:[#allocation168_spill] sm:$0xff] }
 0x2d7   : > { %v508_v53 = vpop.permute.xlu0 %507  ;;  %2402 = vperm.xlu1 %3227, %v2336_v11   ;;  %v876_v11 = vrot.slane %v875_v40, 2  ;;  %v1536_v28 = vadd.f32 %v1535_v5, %v1534_v51  ;;  %v1756_v18 = vsel %vm601_vm2, %v1730_v42, 0.0  ;;  %v1975_v47 = vsel %vm601_vm2, %v1951_v63, 0.0 }
 0x2d8   : > { %v585_v20 = vmul.f32 %v508_v53, %v4546_v56  ;;  %v4992_v2 = vpop.permute.xlu1 %2010  ;;  %v1755_v56 = vadd.f32 %v1754_v46, %v1753_v14  ;;  %v1510_v14 = vmul.f32 %v6115_v39, %v4862_v30  ;;  %v592_v46 = vmul.f32 %v6117_v44, %v4678_v36  ;;  %v6119_v36 = vld [vmem:[#allocation121_spill] sm:$0xff] }
 0x2d9   : > { %v1318_v49 = vsel %vm601_vm2, %v1288_v55, 0.0  ;;  %v1537_v35 = vsel %vm601_vm2, %v1509_v61, 0.0  ;;  %v1758_v51 = vsel %vm601_vm2, %v1731_v43, 0.0  ;;  %v877_v5 = vadd.f32 %v876_v11, %v875_v40  ;;  %v6121_v61 = vld [vmem:[#allocation170_spill] sm:$0xff]  ;;  %v6123_v11 = vld [vmem:[#allocation152_spill] sm:$0xff] }
 0x2da   : > { %v602_v26 = vsel %vm601_vm2, %v585_v20, 0.0  ;;  %v1757_v53 = vadd.f32 %v1756_v18, %v1755_v56  ;;  %v1976_v20 = vadd.f32 %v1975_v47, %v1974_v13  ;;  %v1098_v6 = vadd.f32 %v1097_v19, %v1096_v34  ;;  %v6120_v13 = vld [vmem:[#allocation141_spill] sm:$0xff] }
 0x2db   : > { %v604_v58 = vadd.f32 %v6114_v3, %v602_v26  ;;  %v553_v7 = vpop.permute.xlu0 %552  ;;  %2412 = vperm.xlu1 %3227, %v2338_v17   ;;  %v1977_v17 = vsel %vm601_vm2, %v1952_v4, 0.0  ;;  %v1319_v63 = vadd.f32 %v1318_v49, %v1317_v32  ;;  %v1538_v25 = vadd.f32 %v1537_v35, %v1536_v28  ;;  %v6122_v3 = vld [vmem:[#allocation96_spill] sm:$0xff]  ;;  %v6126_v35 = vld [vmem:[#allocation13_spill] sm:$0xff] }
 0x2dc   : > { %v5013_v29 = vpop.permute.xlu1 %2018  ;;  %v1732_v55 = vmul.f32 %v6119_v36, %v4709_v16  ;;  %v1539_v56 = vsel %vm601_vm2, %v1510_v14, 0.0  ;;  %v1953_v54 = vmul.f32 %v6120_v13, %v4701_v0  ;;  %v613_v43 = vsel %vm601_vm2, %v4973_v45, 0.0  ;;  %v6124_v28 = vld [vmem:[#allocation172_spill] sm:$0xff]  ;;  %v6125_v14 = vld [vmem:[#allocation11_spill] sm:$0xff] }
 0x2dd   : > { %v606_v12 = vadd.f32 %v6116_v62, %v604_v58  ;;  %v615_v40 = vsel %vm601_vm2, %v592_v46, 0.0  ;;  %v1759_v34 = vadd.f32 %v1758_v51, %v1757_v53  ;;  %v1978_v4 = vadd.f32 %v1977_v17, %v1976_v20 }
 0x2de   : > { %v1511_v58 = vmul.f32 %v6122_v3, %v4711_v60  ;;  %v1733_v19 = vmul.f32 %v6123_v11, %v4862_v30  ;;  %v1954_v32 = vmul.f32 %v4928_v57, %v4814_v27  ;;  %v593_v47 = vmul.f32 %v6125_v14, %v4703_v8 }
 0x2df   : > { %v608_v48 = vadd.f32 %v6118_v41, %v606_v12  ;;  %v563_v42 = vpop.permute.xlu0 %562  ;;  %v1099_v45 = vrot.slane %v1098_v6, 2  ;;  %v1320_v62 = vrot.slane %v1319_v63, 4  ;;  %v1540_v12 = vadd.f32 %v1539_v56, %v1538_v25 }
 0x2e0   : > { %v5027_v26 = vpop.permute.xlu1 %2026  ;;  %v878_v46 = vrot.slane %v877_v5, 1  ;;  %v1760_v49 = vsel %vm601_vm2, %v1732_v55, 0.0  ;;  %v1979_v53 = vsel %vm601_vm2, %v1953_v54, 0.0  ;;  %v595_v57 = vmul.f32 %v6126_v35, %v4758_v9 }
 0x2e1   : > { %v610_v31 = vadd.f32 %v6121_v61, %v608_v48  ;;  %v1761_v51 = vadd.f32 %v1760_v49, %v1759_v34  ;;  %v1980_v17 = vadd.f32 %v1979_v53, %v1978_v4  ;;  %v594_v41 = vmul.f32 %v553_v7, %v4690_v10  ;;  %v6127_v34 = vld [vmem:[#allocation122_spill] sm:$0xff]  ;;  %v6128_v10 = vld [vmem:[#allocation143_spill] sm:$0xff] }
 0x2e2   : > { %v1541_v8 = vsel %vm601_vm2, %v1511_v58, 0.0  ;;  %v1762_v48 = vsel %vm601_vm2, %v1733_v19, 0.0  ;;  %v1981_v25 = vsel %vm601_vm2, %v1954_v32, 0.0  ;;  %v617_v55 = vsel %vm601_vm2, %v593_v47, 0.0  ;;  %v6130_v32 = vld [vmem:[#allocation45_spill] sm:$0xff]  ;;  %v6131_v47 = vld [vmem:[#allocation15_spill] sm:$0xff] }
 0x2e3   : > { %v612_v18 = vadd.f32 %v6124_v28, %v610_v31  ;;  %v573_v39 = vpop.permute.xlu0 %572  ;;  %v1100_v13 = vadd.f32 %v1099_v45, %v1098_v6  ;;  %v1321_v54 = vadd.f32 %v1320_v62, %v1319_v63  ;;  %v1542_v61 = vadd.f32 %v1541_v8, %v1540_v12  ;;  %v6129_v63 = vld [vmem:[#allocation165_spill] sm:$0xff] }
 0x2e4   : > { %v5047_v44 = vpop.permute.xlu1 %2034  ;;  %v1734_v4 = vmul.f32 %v6127_v34, %v4711_v60  ;;  %v1955_v7 = vmul.f32 %v6128_v10, %v4709_v16  ;;  %v1763_v58 = vadd.f32 %v1762_v48, %v1761_v51  ;;  %v1982_v11 = vadd.f32 %v1981_v25, %v1980_v17  ;;  %v6132_v17 = vld [vmem:[#allocation17_spill] sm:$0xff] }
 0x2e5   : > { %v614_v20 = vadd.f32 %v613_v43, %v612_v18  ;;  %v879_v43 = vadd.f32 %v878_v46, %v877_v5  ;;  %v596_v19 = vmul.f32 %v563_v42, %v4701_v0  ;;  %v621_v6 = vsel %vm601_vm2, %v595_v57, 0.0 }
 0x2e6   : > { %v887_v28 = vrot.slane %v6130_v32, %v6129_v63  ;;  %v1956_v5 = vmul.f32 %v4948_v23, %v4862_v30  ;;  %v597_v45 = vmul.f32 %v6131_v47, %v4814_v27  ;;  %v1101_v62 = vrot.slane %v1100_v13, 1 }
 0x2e7   : > { %v616_v36 = vadd.f32 %v615_v40, %v614_v20  ;;  %v583_v56 = vpop.permute.xlu0 %582  ;;  %v619_v40 = vsel %vm601_vm2, %v594_v41, 0.0  ;;  %v1322_v12 = vrot.slane %v1321_v54, 2  ;;  %v1543_v46 = vrot.slane %v1542_v61, 4 }
 0x2e8   : > { %v5058_v31 = vpop.permute.xlu1 %2042  ;;  %v888_v0 = vadd.f32 %v887_v28, %v879_v43  ;;  %v1764_v42 = vsel %vm601_vm2, %v1734_v4, 0.0  ;;  %v1983_v53 = vsel %vm601_vm2, %v1955_v7, 0.0  ;;  %v623_v23 = vsel %vm601_vm2, %v596_v19, 0.0  ;;  %v6134_v7 = vld [vmem:[#allocation75_spill] sm:$0xff] }
 0x2e9   : > { %v618_v3 = vadd.f32 %v617_v55, %v616_v36  ;;  %v1765_v35 = vadd.f32 %v1764_v42, %v1763_v58  ;;  %v1984_v57 = vadd.f32 %v1983_v53, %v1982_v11  ;;  %v598_v51 = vmul.f32 %v573_v39, %v4709_v16  ;;  %v6135_v39 = vld [vmem:[#allocation144_spill] sm:$0xff]  ;;  %v6136_v28 = vld [vmem:[#allocation19_spill] sm:$0xff] }
 0x2ea   : > { %v599_v41 = vmul.f32 %v6132_v17, %v4862_v30  ;;  %v1985_v8 = vsel %vm601_vm2, %v1956_v5, 0.0  ;;  %v625_v36 = vsel %vm601_vm2, %v597_v45, 0.0  ;;  %v1102_v55 = vadd.f32 %v1101_v62, %v1100_v13 }
 0x2eb   : > { %v620_v18 = vadd.f32 %v619_v40, %v618_v3  ;;  %v5071_v14 = vpop.permute.xlu0 %669  ;;  %v1323_v43 = vadd.f32 %v1322_v12, %v1321_v54  ;;  %v1544_v34 = vadd.f32 %v1543_v46, %v1542_v61  ;;  %v889_v10 = vmax.f32 %v888_v0, 0.0  ;;  %v6138_v12 = vld [vmem:[#allocation47_spill] sm:$0xff]  ;;  %v6140_v0 = vld [vmem:[#allocation49_spill] sm:$0xff] }
 0x2ec   : > { %v5075_v49 = vpop.permute.xlu1 %2050  ;;  %v1110_v3 = vrot.slane %v6134_v7, %v6129_v63  ;;  %v1957_v58 = vmul.f32 %v6135_v39, %v4711_v60  ;;  %v1766_v40 = vrot.slane %v1765_v35, 4  ;;  %v1986_v19 = vadd.f32 %v1985_v8, %v1984_v57  ;;  %v6144_v7 = vld [vmem:[#allocation16_spill] sm:$0xff] }
 0x2ed   : > { %v622_v20 = vadd.f32 %v621_v6, %v620_v18  ;;  %v627_v6 = vsel %vm601_vm2, %v598_v51, 0.0  ;;  %v600_v32 = vmul.f32 %v583_v56, %v4711_v60  ;;  %v629_v13 = vsel %vm601_vm2, %v599_v41, 0.0  ;;  %v6142_v41 = vld [vmem:[#allocation53_spill] sm:$0xff] }
 0x2ee   : > { %v1111_v18 = vadd.f32 %v1110_v3, %v1102_v55  ;;  %v1324_v47 = vrot.slane %v1323_v43, 1  ;;  %v1545_v45 = vrot.slane %v1544_v34, 2  ;;  %v5103_v46 = vmul.f32 %v6138_v12, %v889_v10 }
 0x2ef   : > { %v624_v48 = vadd.f32 %v623_v23, %v622_v20  ;;  %v5084_v25 = vpop.permute.xlu0 %679  ;;  %v5106_v42 = vmul.f32 %v6140_v0, %v889_v10  ;;  %v1987_v56 = vsel %vm601_vm2, %v1957_v58, 0.0  ;;  %v6141_v20 = vld [vmem:[#allocation51_spill] sm:$0xff]  ;;  %v1767_v23 = vadd.f32 %v1766_v40, %v1765_v35  ;;  %v6146_v40 = vld [vmem:[#allocation20_spill] sm:$0xff] }
 0x2f0   : > { %v5087_v4 = vpop.permute.xlu1 %2058  ;;  %6139 = vst [vmem:[#allocation41_spill] sm:$0xff] %v5103_v46  ;;  %v5110_v57 = vmul.f32 %v6141_v20, %v889_v10  ;;  %v1988_v51 = vadd.f32 %v1987_v56, %v1986_v19  ;;  %v631_v17 = vsel %vm601_vm2, %v600_v32, 0.0  ;;  %v5114_v8 = vmul.f32 %v6142_v41, %v889_v10  ;;  %v6147_v32 = vld [vmem:[#allocation22_spill] sm:$0xff]  ;;  %v6148_v0 = vld [vmem:[#allocation24_spill] sm:$0xff]  ;;  %v6195_v46 = vld [vmem:[#allocation113_spill] sm:$0xff] }
 0x2f1   : > { %6133 = vst [vmem:[#allocation114_spill] sm:$0xff] %v5087_v4  ;;  %v626_v11 = vadd.f32 %v625_v36, %v624_v48  ;;  %v6143_v48 = vld [vmem:[#allocation55_spill] sm:$0xff]  ;;  %v5120_v3 = vmul.f32 %v6144_v7, %v889_v10  ;;  %v1112_v58 = vmax.f32 %v1111_v18, 0.0  ;;  %v5128_v19 = vmul.f32 %v6146_v40, %v889_v10  ;;  %v6155_v41 = vld [vmem:[#allocation56_spill] sm:$0xff]  ;;  %v6156_v7 = vld [vmem:[#allocation58_spill] sm:$0xff] }
 0x2f2   : > { %v5117_v36 = vmul.f32 %v6143_v48, %v889_v10  ;;  %v5134_v56 = vmul.f32 %v6148_v0, %v889_v10  ;;  %v6152_v18 = vld [vmem:[#allocation107_spill] sm:$0xff]  ;;  %v5145_v48 = vmul.f32 %v6155_v41, %v889_v10  ;;  %v6164_v41 = vld [vmem:[#allocation81_spill] sm:$0xff]  ;;  %v6201_v4 = vld [vmem:[#allocation68_spill] sm:$0xff] }
 0x2f3   : > { %v628_v54 = vadd.f32 %v627_v6, %v626_v11  ;;  %v5096_v61 = vpop.permute.xlu0 %689  ;;  %v1325_v11 = vadd.f32 %v1324_v47, %v1323_v43  ;;  %v1546_v6 = vadd.f32 %v1545_v45, %v1544_v34  ;;  %v1333_v43 = vrot.slane %v6152_v18, %v6129_v63  ;;  %v6153_v45 = vld [vmem:[#allocation28_spill] sm:$0xff] }
 0x2f4   : > { %v5100_v62 = vpop.permute.xlu1 %2066  ;;  %6149 = vst [vmem:[#allocation61_spill] sm:$0xff] %v5134_v56  ;;  %v1768_v34 = vrot.slane %v1767_v23, 2  ;;  %v1989_v47 = vrot.slane %v1988_v51, 4  ;;  %v5157_v18 = vmul.f32 %v6160_v22, %v1112_v58  ;;  %v5163_v15 = vmul.f32 %v6164_v41, %v1112_v58  ;;  %v6174_v56 = vld [vmem:[#allocation46_spill] sm:$0xff] }
 0x2f5   : > { %6137 = vst [vmem:[#allocation97_spill] sm:$0xff] %v5100_v62  ;;  %v630_v53 = vadd.f32 %v629_v13, %v628_v54  ;;  %v6145_v13 = vld [vmem:[#allocation18_spill] sm:$0xff]  ;;  %v5131_v54 = vmul.f32 %v6147_v32, %v889_v10  ;;  %v1334_v37 = vadd.f32 %v1333_v43, %v1325_v11  ;;  %v1547_v38 = vrot.slane %v1546_v6, 1 }
 0x2f6   : > { %v5125_v35 = vmul.f32 %v6145_v13, %v889_v10  ;;  %v5148_v13 = vmul.f32 %v6156_v7, %v889_v10  ;;  %v6157_v32 = vld [vmem:[#allocation30_spill] sm:$0xff]  ;;  %6161 = vst [vmem:[#allocation43_spill] sm:$0xff] %v5157_v18  ;;  %6165 = vst [vmem:[#allocation90_spill] sm:$0xff] %v5163_v15  ;;  %v6166_v7 = vld [vmem:[#allocation83_spill] sm:$0xff]  ;;  %v1990_v22 = vadd.f32 %v1989_v47, %v1988_v51 }
 0x2f7   : > { %v632_v55 = vadd.f32 %v631_v17, %v630_v53  ;;  %v5122_v39 = vpop.permute.xlu0 %699  ;;  %v6150_v53 = vld [vmem:[#allocation26_spill] sm:$0xff]  ;;  %v5142_v17 = vmul.f32 %v6153_v45, %v889_v10  ;;  %v5151_v0 = vmul.f32 %v6157_v32, %v889_v10  ;;  %v6162_v45 = vld [vmem:[#allocation79_spill] sm:$0xff]  ;;  %v5166_v24 = vmul.f32 %v6166_v7, %v1112_v58  ;;  %v6177_v47 = vld [vmem:[#allocation48_spill] sm:$0xff] }
 0x2f8   : > { %v5137_v20 = vmul.f32 %v6150_v53, %v889_v10  ;;  %v6159_v53 = vld [vmem:[#allocation60_spill] sm:$0xff]  ;;  %v5160_v33 = vmul.f32 %v6162_v45, %v1112_v58  ;;  %v5169_v32 = vmul.f32 %v6168_v21, %v1112_v58  ;;  %v5184_v21 = vmul.f32 %v6174_v56, %v1112_v58 }
 0x2f9   : > { %v2107_v12 = vpop.permute.xlu1 %2106  ;;  %6154 = vst [vmem:[#allocation69_spill] sm:$0xff] %v5142_v17  ;;  %v633_v40 = vrot.slane %v632_v55, 4  ;;  %6158 = vst [vmem:[#allocation99_spill] sm:$0xff] %v5151_v0  ;;  %v5154_v5 = vmul.f32 %v6159_v53, %v889_v10  ;;  %v1769_v53 = vadd.f32 %v1768_v34, %v1767_v23  ;;  %v6170_v0 = vld [vmem:[#allocation40_spill] sm:$0xff]  ;;  %v6171_v17 = vld [vmem:[#allocation42_spill] sm:$0xff]  ;;  %v1335_v18 = vmax.f32 %v1334_v37, 0.0 }
 0x2fa   : > { %6151 = vst [vmem:[#allocation88_spill] sm:$0xff] %v5137_v20  ;;  %6163 = vst [vmem:[#allocation62_spill] sm:$0xff] %v5160_v33  ;;  %v5174_v11 = vmul.f32 %v6170_v0, %v1112_v58  ;;  %v2166_v43 = vmul.f32 %v2107_v12, %v4544_v52  ;;  %v5178_v41 = vmul.f32 %v6171_v17, %v1112_v58  ;;  %v6172_v20 = vld [vmem:[#allocation44_spill] sm:$0xff]  ;;  %v6176_v23 = vld [vmem:[#allocation157_spill] sm:$0xff] }
 0x2fb   : > { %6167 = vst [vmem:[#allocation71_spill] sm:$0xff] %v5166_v24  ;;  %v5171_v59 = vpop.permute.xlu0 %709  ;;  %v634_v45 = vadd.f32 %v633_v40, %v632_v55  ;;  %v5181_v7 = vmul.f32 %v6172_v20, %v1112_v58  ;;  %6175 = vst [vmem:[#allocation63_spill] sm:$0xff] %v5184_v21  ;;  %v3324_v24 = vld [vmem:[#allocation2] sm:$0xff]  ;;  %v5189_v0 = vmul.f32 %v6177_v47, %v1112_v58  ;;  %v6179_v52 = vld [vmem:[#allocation50_spill] sm:$0xff] }
 0x2fc   : > { %6169 = vst [vmem:[#allocation101_spill] sm:$0xff] %v5171_v59  ;;  %v1548_v59 = vadd.f32 %v1547_v38, %v1546_v6  ;;  %v2165_v51 = vmul.f32 %v3324_v24, %v6176_v23  ;;  %v5192_v55 = vmul.f32 %v6179_v52, %v1112_v58  ;;  %v6181_v17 = vld [vmem:[#allocation52_spill] sm:$0xff]  ;;  %v6183_v40 = vld [vmem:[#allocation54_spill] sm:$0xff]  ;;  %v1770_v6 = vrot.slane %v1769_v53, 1  ;;  %v6187_v47 = vld [vmem:[#allocation89_spill] sm:$0xff] }
 0x2fd   : > { %v2111_v10 = vpop.permute.xlu1 %2110  ;;  %6173 = vst [vmem:[#allocation37_spill] sm:$0xff] %v5181_v7  ;;  %6178 = vst [vmem:[#allocation92_spill] sm:$0xff] %v5189_v0  ;;  %v5195_v20 = vmul.f32 %v6181_v17, %v1112_v58  ;;  %v5198_v56 = vmul.f32 %v6183_v40, %v1112_v58  ;;  %v6185_v38 = vld [vmem:[#allocation130_spill] sm:$0xff]  ;;  %v1991_v24 = vrot.slane %v1990_v22, 2  ;;  %v5207_v52 = vmul.f32 %v6187_v47, %v1112_v58  ;;  %v6191_v40 = vld [vmem:[#allocation109_spill] sm:$0xff] }
 0x2fe   : > { %v2167_v34 = vmul.f32 %v2111_v10, %v4555_v50  ;;  %6180 = vst [vmem:[#allocation73_spill] sm:$0xff] %v5192_v55  ;;  %v1556_v37 = vrot.slane %v6185_v38, %v6129_v63  ;;  %v2182_v50 = vsel %vm601_vm2, %v2166_v43, 0.0  ;;  %v6186_v10 = vld [vmem:[#allocation87_spill] sm:$0xff]  ;;  %v635_v17 = vrot.slane %v634_v45, 2 }
 0x2ff   : > { %6182 = vst [vmem:[#allocation103_spill] sm:$0xff] %v5195_v20  ;;  %6184 = vst [vmem:[#allocation38_spill] sm:$0xff] %v5198_v56  ;;  %v5204_v23 = vmul.f32 %v6186_v10, %v1112_v58  ;;  %v6188_v55 = vld [vmem:[#allocation91_spill] sm:$0xff]  ;;  %v5212_v20 = vpop.permute.xlu0 %719  ;;  %v5215_v56 = vmul.f32 %v6191_v40, %v1335_v18  ;;  %v2181_v15 = vsel %vm601_vm2, %v2165_v51, 0.0  ;;  %v5223_v47 = vmul.f32 %v6195_v46, %v1335_v18 }
 0x300   : > { %v5210_v0 = vmul.f32 %v6188_v55, %v1112_v58  ;;  %6190 = vst [vmem:[#allocation93_spill] sm:$0xff] %v5212_v20  ;;  %v1557_v38 = vadd.f32 %v1556_v37, %v1548_v59  ;;  %v2184_v43 = vsel %vm601_vm2, %v2167_v34, 0.0  ;;  %v6193_v33 = vld [vmem:[#allocation111_spill] sm:$0xff]  ;;  %v2183_v55 = vadd.f32 %v2182_v50, %v2181_v15  ;;  %v6199_v20 = vld [vmem:[#allocation116_spill] sm:$0xff]  ;;  %v6204_v15 = vld [vmem:[#allocation154_spill] sm:$0xff] }
 0x301   : > { %v2119_v12 = vpop.permute.xlu1 %2118  ;;  %6192 = vst [vmem:[#allocation9_spill] sm:$0xff] %v5215_v56  ;;  %v5220_v10 = vmul.f32 %v6193_v33, %v1335_v18  ;;  %6196 = vst [vmem:[#allocation120_spill] sm:$0xff] %v5223_v47  ;;  %v6197_v21 = vld [vmem:[#allocation115_spill] sm:$0xff]  ;;  %v5229_v7 = vmul.f32 %v6199_v20, %v1335_v18  ;;  %v1771_v40 = vadd.f32 %v1770_v6, %v1769_v53  ;;  %v3325_v59 = vld [vmem:[#allocation2 + $0x18] sm:$0xff] }
 0x302   : > { %6189 = vst [vmem:[#allocation64_spill] sm:$0xff] %v5210_v0  ;;  %v5226_v58 = vmul.f32 %v6197_v21, %v1335_v18  ;;  %v6200_v37 = vld [vmem:[#allocation159_spill] sm:$0xff]  ;;  %v1992_v56 = vadd.f32 %v1991_v24, %v1990_v22  ;;  %v636_v34 = vadd.f32 %v635_v17, %v634_v45  ;;  %v5233_v33 = vmul.f32 %v6201_v4, %v1335_v18  ;;  %v3326_v53 = vld [vmem:[#allocation2 + $0x20] sm:$0xff]  ;;  %v6207_v0 = vld [vmem:[#allocation74_spill] sm:$0xff] }
 0x303   : > { %6194 = vst [vmem:[#allocation105_spill] sm:$0xff] %v5220_v10  ;;  %v2168_v51 = vmul.f32 %v3325_v59, %v6200_v37  ;;  %v6202_v10 = vld [vmem:[#allocation70_spill] sm:$0xff]  ;;  %v2185_v47 = vadd.f32 %v2184_v43, %v2183_v55  ;;  %v1558_v21 = vmax.f32 %v1557_v38, 0.0  ;;  %v1779_v50 = vrot.slane %v6204_v15, %v6129_v63  ;;  %v6209_v22 = vld [vmem:[#allocation76_spill] sm:$0xff]  ;;  %v5255_v38 = vpop.permute.xlu0 %729  ;;  %v6218_v15 = vld [vmem:[#allocation117_spill] sm:$0xff] }
 0x304   : > { %6198 = vst [vmem:[#allocation139_spill] sm:$0xff] %v5226_v58  ;;  %v5236_v46 = vmul.f32 %v6202_v10, %v1335_v18  ;;  %v6205_v58 = vld [vmem:[#allocation72_spill] sm:$0xff]  ;;  %v2169_v6 = vmul.f32 %v3326_v53, %v2119_v12  ;;  %v5244_v59 = vmul.f32 %v6207_v0, %v1335_v18  ;;  %v5247_v45 = vmul.f32 %v6209_v22, %v1335_v18  ;;  %v6211_v4 = vld [vmem:[#allocation78_spill] sm:$0xff] }
 0x305   : > { %v2127_v62 = vpop.permute.xlu1 %2126  ;;  %v5241_v20 = vmul.f32 %v6205_v58, %v1335_v18  ;;  %v5250_v24 = vmul.f32 %v6211_v4, %v1335_v18  ;;  %v6213_v17 = vld [vmem:[#allocation80_spill] sm:$0xff]  ;;  %6215 = vst [vmem:[#allocation10_spill] sm:$0xff] %v5255_v38  ;;  %v1780_v58 = vadd.f32 %v1779_v50, %v1771_v40  ;;  %v2186_v55 = vsel %vm601_vm2, %v2168_v51, 0.0  ;;  %v6216_v37 = vld [vmem:[#allocation82_spill] sm:$0xff] }
 0x306   : > { %6203 = vst [vmem:[#allocation66_spill] sm:$0xff] %v5236_v46  ;;  %6208 = vst [vmem:[#allocation150_spill] sm:$0xff] %v5244_v59  ;;  %v5253_v43 = vmul.f32 %v6213_v17, %v1335_v18  ;;  %v1993_v12 = vrot.slane %v1992_v56, 1  ;;  %v5261_v0 = vmul.f32 %v6216_v37, %v1335_v18  ;;  %v5264_v53 = vmul.f32 %v6218_v15, %v1335_v18  ;;  %v6219_v22 = vld [vmem:[#allocation118_spill] sm:$0xff]  ;;  %v6223_v59 = vld [vmem:[#allocation132_spill] sm:$0xff] }
 0x307   : > { %6206 = vst [vmem:[#allocation94_spill] sm:$0xff] %v5241_v20  ;;  %6210 = vst [vmem:[#allocation166_spill] sm:$0xff] %v5247_v45  ;;  %v5267_v4 = vmul.f32 %v6219_v22, %v1335_v18  ;;  %v2187_v17 = vadd.f32 %v2186_v55, %v2185_v47  ;;  %v5273_v20 = vmul.f32 %v6223_v59, %v1558_v21  ;;  %v6225_v40 = vld [vmem:[#allocation134_spill] sm:$0xff]  ;;  %v2188_v50 = vsel %vm601_vm2, %v2169_v6, 0.0  ;;  %v6227_v37 = vld [vmem:[#allocation135_spill] sm:$0xff] }
 0x308   : > { %6212 = vst [vmem:[#allocation128_spill] sm:$0xff] %v5250_v24  ;;  %6214 = vst [vmem:[#allocation167_spill] sm:$0xff] %v5253_v43  ;;  %v637_v24 = vrot.slane %v636_v34, 1  ;;  %v6221_v43 = vld [vmem:[#allocation119_spill] sm:$0xff]  ;;  %v5276_v51 = vmul.f32 %v6225_v40, %v1558_v21  ;;  %v6229_v15 = vld [vmem:[#allocation136_spill] sm:$0xff]  ;;  %v5291_v59 = vmax.f32 %v1780_v58, 0.0  ;;  %v2002_v58 = vrot.slane %v4975_v1, %v6129_v63 }
 0x309   : > { %v5257_v10 = vpop.permute.xlu1 %2134  ;;  %6217 = vst [vmem:[#allocation168_spill] sm:$0xff] %v5261_v0  ;;  %6220 = vst [vmem:[#allocation121_spill] sm:$0xff] %v5267_v4  ;;  %v5270_v45 = vmul.f32 %v6221_v43, %v1335_v18  ;;  %v5280_v0 = vmul.f32 %v6227_v37, %v1558_v21  ;;  %v5283_v38 = vmul.f32 %v6229_v15, %v1558_v21  ;;  %v6231_v22 = vld [vmem:[#allocation137_spill] sm:$0xff]  ;;  %v6233_v47 = vld [vmem:[#allocation98_spill] sm:$0xff]  ;;  %v5297_v15 = vpop.permute.xlu0 %739 }
 0x30a   : > { %6224 = vst [vmem:[#allocation170_spill] sm:$0xff] %v5273_v20  ;;  %6226 = vst [vmem:[#allocation96_spill] sm:$0xff] %v5276_v51  ;;  %v5286_v46 = vmul.f32 %v6231_v22, %v1558_v21  ;;  %v5289_v18 = vmul.f32 %v6233_v47, %v1558_v21  ;;  %v3327_v55 = vld [vmem:[#allocation2 + $0x28] sm:$0xff]  ;;  %v6236_v40 = vld [vmem:[#allocation161_spill] sm:$0xff]  ;;  %v1994_v51 = vadd.f32 %v1993_v12, %v1992_v56 }
 0x30b   : > { %6222 = vst [vmem:[#allocation141_spill] sm:$0xff] %v5270_v45  ;;  %6228 = vst [vmem:[#allocation152_spill] sm:$0xff] %v5280_v0  ;;  %v2170_v20 = vmul.f32 %v3327_v55, %v6236_v40  ;;  %v6237_v6 = vld [vmem:[#allocation100_spill] sm:$0xff]  ;;  %v638_v37 = vadd.f32 %v637_v24, %v636_v34  ;;  %v2189_v0 = vadd.f32 %v2188_v50, %v2187_v17  ;;  %v6244_v55 = vld [vmem:[#allocation106_spill] sm:$0xff] }
 0x30c   : > { %6230 = vst [vmem:[#allocation172_spill] sm:$0xff] %v5283_v38  ;;  %6232 = vst [vmem:[#allocation11_spill] sm:$0xff] %v5286_v46  ;;  %v5295_v45 = vmul.f32 %v6237_v6, %v1558_v21  ;;  %v6240_v38 = vld [vmem:[#allocation102_spill] sm:$0xff]  ;;  %v6242_v46 = vld [vmem:[#allocation104_spill] sm:$0xff]  ;;  %v5308_v56 = vmul.f32 %v6244_v55, %v1558_v21 }
 0x30d   : > { %6234 = vst [vmem:[#allocation13_spill] sm:$0xff] %v5289_v18  ;;  %v2143_v43 = vpop.permute.xlu1 %2142  ;;  %6235 = vst [vmem:[#allocation122_spill] sm:$0xff] %v5291_v59  ;;  %v5300_v22 = vmul.f32 %v6240_v38, %v1558_v21  ;;  %v5303_v47 = vmul.f32 %v6242_v46, %v1558_v21  ;;  %v3328_v18 = vld [vmem:[#allocation2 + $0x30] sm:$0xff]  ;;  %v6246_v12 = vld [vmem:[#allocation108_spill] sm:$0xff] }
 0x30e   : > { %6238 = vst [vmem:[#allocation143_spill] sm:$0xff] %v5295_v45  ;;  %6239 = vst [vmem:[#allocation45_spill] sm:$0xff] %v5297_v15  ;;  %v2171_v4 = vmul.f32 %v3328_v18, %v2127_v62  ;;  %v5311_v40 = vmul.f32 %v6246_v12, %v1558_v21  ;;  %v6248_v34 = vld [vmem:[#allocation138_spill] sm:$0xff]  ;;  %v6249_v17 = vld [vmem:[#allocation140_spill] sm:$0xff] }
 0x30f   : > { %6241 = vst [vmem:[#allocation15_spill] sm:$0xff] %v5300_v22  ;;  %6243 = vst [vmem:[#allocation17_spill] sm:$0xff] %v5303_v47  ;;  %v5314_v24 = vmul.f32 %v6248_v34, %v1558_v21  ;;  %v5317_v38 = vmul.f32 %v6249_v17, %v1558_v21  ;;  %v6250_v46 = vld [vmem:[#allocation110_spill] sm:$0xff]  ;;  %v6252_v47 = vld [vmem:[#allocation112_spill] sm:$0xff]  ;;  %v2190_v34 = vsel %vm601_vm2, %v2170_v20, 0.0 }
 0x310   : > { %6245 = vst [vmem:[#allocation75_spill] sm:$0xff] %v5308_v56  ;;  %6247 = vst [vmem:[#allocation144_spill] sm:$0xff] %v5311_v40  ;;  %v5320_v6 = vmul.f32 %v6250_v46, %v1558_v21  ;;  %v5323_v1 = vmul.f32 %v6252_v47, %v1558_v21  ;;  %v6254_v62 = vld [vmem:[#allocation142_spill] sm:$0xff]  ;;  %v6255_v55 = vld [vmem:[#allocation156_spill] sm:$0xff]  ;;  %v2003_v40 = vadd.f32 %v2002_v58, %v1994_v51 }
 0x311   : > { %v2151_v50 = vpop.permute.xlu1 %2150  ;;  %v5326_v18 = vmul.f32 %v6254_v62, %v1558_v21  ;;  %v5330_v12 = vmul.f32 %v6255_v55, %v5291_v59  ;;  %v6257_v17 = vld [vmem:[#allocation158_spill] sm:$0xff]  ;;  %v6259_v46 = vld [vmem:[#allocation160_spill] sm:$0xff]  ;;  %v6261_v47 = vrot.slane %v6136_v28, %v6129_v63  ;;  %v2191_v62 = vadd.f32 %v2190_v34, %v2189_v0  ;;  %v6264_v20 = vld [vmem:[#allocation163_spill] sm:$0xff] }
 0x312   : > { %6251 = vst [vmem:[#allocation19_spill] sm:$0xff] %v5320_v6  ;;  %6253 = vst [vmem:[#allocation47_spill] sm:$0xff] %v5323_v1  ;;  %v5335_v56 = vmul.f32 %v6257_v17, %v5291_v59  ;;  %v5339_v6 = vmul.f32 %v6259_v46, %v5291_v59  ;;  %v6262_v1 = vld [vmem:[#allocation162_spill] sm:$0xff]  ;;  %v6265_v15 = vld [vmem:[#allocation169_spill] sm:$0xff] }
 0x313   : > { %6256 = vst [vmem:[#allocation49_spill] sm:$0xff] %v5330_v12  ;;  %v649_v21 = vadd.f32 %v6261_v47, %v638_v37  ;;  %v5346_v55 = vmul.f32 %v6262_v1, %v5291_v59  ;;  %v3329_v12 = vld [vmem:[#allocation2 + $0x38] sm:$0xff]  ;;  %v3330_v58 = vld [vmem:[#allocation2 + $0x48] sm:$0xff]  ;;  %v6268_v0 = vld [vmem:[#allocation123_spill] sm:$0xff]  ;;  %v5360_v1 = vpop.permute.xlu0 %2342 }
 0x314   : > { %6258 = vst [vmem:[#allocation51_spill] sm:$0xff] %v5335_v56  ;;  %6260 = vst [vmem:[#allocation53_spill] sm:$0xff] %v5339_v6  ;;  %v2172_v51 = vmul.f32 %v3329_v12, %v6264_v20  ;;  %v2174_v17 = vmul.f32 %v3330_v58, %v6265_v15  ;;  %v2192_v56 = vsel %vm601_vm2, %v2171_v4, 0.0  ;;  %v6266_v46 = vld [vmem:[#allocation164_spill] sm:$0xff]  ;;  %v5358_v34 = vmul.f32 %v6268_v0, %v5291_v59  ;;  %v6272_v4 = vld [vmem:[#allocation57_spill] sm:$0xff] }
 0x315   : > { %6263 = vst [vmem:[#allocation55_spill] sm:$0xff] %v5346_v55  ;;  %v5353_v6 = vmul.f32 %v6266_v46, %v5291_v59  ;;  %v3331_v22 = vld [vmem:[#allocation2 + $0x58] sm:$0xff]  ;;  %6269 = vst [vmem:[#allocation16_spill] sm:$0xff] %v5360_v1  ;;  %v2159_v47 = vpop.permute.xlu1 %2158  ;;  %v2178_v15 = vmul.f32 %v6272_v4, %v4709_v16  ;;  %v5370_v55 = vmax.f32 %v2003_v40, 0.0  ;;  %v5376_v0 = vmax.f32 %v649_v21, 0.0  ;;  %v3332_v63 = vld [vmem:[#allocation2 + $0x40] sm:$0xff] }
 0x316   : > { %v6267_v28 = vld [vmem:[#allocation12_spill] sm:$0xff]  ;;  %v2193_v1 = vadd.f32 %v2192_v56, %v2191_v62  ;;  %v2173_v45 = vmul.f32 %v3332_v63, %v5257_v10  ;;  %v2194_v16 = vsel %vm601_vm2, %v2172_v51, 0.0  ;;  %v6277_v40 = vld [vmem:[#allocation171_spill] sm:$0xff]  ;;  %v6278_v56 = vld [vmem:[#allocation14_spill] sm:$0xff] }
 0x317   : > { %v2176_v37 = vmul.f32 %v3331_v22, %v6267_v28  ;;  %v6270_v12 = vld [vmem:[#allocation124_spill] sm:$0xff]  ;;  %v6274_v22 = vld [vmem:[#allocation125_spill] sm:$0xff]  ;;  %v5387_v4 = vmul.f32 %v6277_v40, %v5291_v59  ;;  %v5393_v62 = vmul.f32 %v6278_v56, %v5291_v59  ;;  %v2206_v51 = vsel %vm601_vm2, %v2178_v15, 0.0 }
 0x318   : > { %v5364_v20 = vmul.f32 %v6270_v12, %v5291_v59  ;;  %v6273_v58 = vld [vmem:[#allocation84_spill] sm:$0xff]  ;;  %v5374_v28 = vmul.f32 %v6274_v22, %v5291_v59  ;;  %v6275_v12 = vld [vmem:[#allocation126_spill] sm:$0xff]  ;;  %v2195_v63 = vadd.f32 %v2194_v16, %v2193_v1  ;;  %v2196_v10 = vsel %vm601_vm2, %v2173_v45, 0.0  ;;  %v6281_v45 = vld [vmem:[#allocation29_spill] sm:$0xff]  ;;  %v5418_v16 = vpop.permute.xlu0 %2357 }
 0x319   : > { %v2180_v46 = vmul.f32 %v6273_v58, %v4711_v60  ;;  %v2198_v60 = vsel %vm601_vm2, %v2174_v17, 0.0  ;;  %v2175_v58 = vmul.f32 %v2143_v43, %v4758_v9  ;;  %v2202_v21 = vsel %vm601_vm2, %v2176_v37, 0.0  ;;  %v5396_v22 = vpop.permute.xlu1 %2219  ;;  %v6279_v17 = vld [vmem:[#allocation65_spill] sm:$0xff]  ;;  %6282 = vst [vmem:[#allocation24_spill] sm:$0xff] %v5418_v16 }
 0x31a   : > { %6271 = vst [vmem:[#allocation18_spill] sm:$0xff] %v5364_v20  ;;  %v5381_v20 = vmul.f32 %v6275_v12, %v5291_v59  ;;  %v5401_v12 = vmul.f32 %v6279_v17, %v5291_v59  ;;  %v5408_v9 = vmul.f32 %v4992_v2, %v5370_v55  ;;  %v5412_v43 = vmul.f32 %v5013_v29, %v5370_v55  ;;  %v6283_v2 = vld [vmem:[#allocation31_spill] sm:$0xff] }
 0x31b   : > { %v5404_v40 = vsel %vm601_vm2, %v2180_v46, 0.0  ;;  %v756_v37 = vmul.f32 %v6281_v45, %v5376_v0  ;;  %v747_v1 = vmul.f32 %v5071_v14, %v5376_v0  ;;  %v2197_v15 = vadd.f32 %v2196_v10, %v2195_v63  ;;  %v6284_v63 = vld [vmem:[#allocation32_spill] sm:$0xff] }
 0x31c   : > { %6276 = vst [vmem:[#allocation20_spill] sm:$0xff] %v5381_v20  ;;  %6280 = vst [vmem:[#allocation22_spill] sm:$0xff] %v5408_v9  ;;  %v5422_v46 = vmul.f32 %v5027_v26, %v5370_v55  ;;  %v758_v56 = vmul.f32 %v6283_v2, %v5376_v0  ;;  %v2200_v17 = vsel %vm601_vm2, %v2175_v58, 0.0  ;;  %v2177_v29 = vmul.f32 %v2151_v50, %v4814_v27  ;;  %v6286_v2 = vld [vmem:[#allocation145_spill] sm:$0xff] }
 0x31d   : > { %v5430_v45 = vmul.f32 %v5047_v44, %v5370_v55  ;;  %v5434_v14 = vmul.f32 %v5058_v31, %v5370_v55  ;;  %v760_v10 = vmul.f32 %v6284_v63, %v5376_v0  ;;  %v2199_v26 = vadd.f32 %v2198_v60, %v2197_v15  ;;  %v5438_v59 = vpop.permute.xlu1 %2233  ;;  %v6287_v44 = vld [vmem:[#allocation146_spill] sm:$0xff]  ;;  %v6288_v31 = vld [vmem:[#allocation147_spill] sm:$0xff]  ;;  %v6289_v15 = vld [vmem:[#allocation33_spill] sm:$0xff] }
 0x31e   : > { %6285 = vst [vmem:[#allocation26_spill] sm:$0xff] %v5438_v59  ;;  %v5442_v20 = vmul.f32 %v6286_v2, %v5370_v55  ;;  %v749_v27 = vmul.f32 %v5084_v25, %v5376_v0  ;;  %v5448_v50 = vmul.f32 %v6287_v44, %v5370_v55  ;;  %v5452_v58 = vmul.f32 %v6288_v31, %v5370_v55 }
 0x31f   : > { %v979_v63 = vadd.f32 %v5117_v36, %v756_v37  ;;  %v970_v60 = vadd.f32 %v5120_v3, %v747_v1  ;;  %v762_v16 = vmul.f32 %v6289_v15, %v5376_v0  ;;  %v2201_v2 = vadd.f32 %v2200_v17, %v2199_v26  ;;  %v5466_v3 = vpop.permute.xlu0 %2367  ;;  %v6290_v17 = vld [vmem:[#allocation148_spill] sm:$0xff] }
 0x320   : > { %v981_v9 = vadd.f32 %v5145_v48, %v758_v56  ;;  %v751_v25 = vmul.f32 %v5096_v61, %v5376_v0  ;;  %v2204_v44 = vsel %vm601_vm2, %v2177_v29, 0.0  ;;  %v2179_v59 = vmul.f32 %v2159_v47, %v4862_v30  ;;  %v6291_v56 = vld [vmem:[#allocation23_spill] sm:$0xff]  ;;  %v6292_v30 = vld [vmem:[#allocation25_spill] sm:$0xff] }
 0x321   : > { %v983_v31 = vadd.f32 %v5148_v13, %v760_v10  ;;  %v753_v36 = vmul.f32 %v5122_v39, %v5376_v0  ;;  %v2203_v37 = vadd.f32 %v2202_v21, %v2201_v2  ;;  %v5468_v1 = vpop.permute.xlu1 %2241  ;;  %v5472_v48 = vmul.f32 %v6290_v17, %v5370_v55  ;;  %v6293_v47 = vld [vmem:[#allocation27_spill] sm:$0xff] }
 0x322   : > { %v972_v61 = vadd.f32 %v5125_v35, %v749_v27  ;;  %v750_v29 = vmul.f32 %v6291_v56, %v5376_v0  ;;  %v752_v13 = vmul.f32 %v6292_v30, %v5376_v0  ;;  %v754_v39 = vmul.f32 %v6293_v47, %v5376_v0  ;;  %v6302_v47 = vld [vmem:[#allocation66_spill] sm:$0xff] }
 0x323   : > { %v1202_v21 = vadd.f32 %v5169_v32, %v979_v63  ;;  %v1193_v10 = vadd.f32 %v5174_v11, %v970_v60  ;;  %v985_v26 = vadd.f32 %v5154_v5, %v762_v16  ;;  %v2205_v15 = vadd.f32 %v2204_v44, %v2203_v37  ;;  %v6294_v5 = vld [vmem:[#allocation21_spill] sm:$0xff]  ;;  %v6295_v16 = vld [vmem:[#allocation64_spill] sm:$0xff]  ;;  %v5504_v60 = vpop.permute.xlu0 %2377  ;;  %v6296_v44 = vld [vmem:[#allocation114_spill] sm:$0xff] }
 0x324   : > { %v1204_v2 = vadd.f32 %v5204_v23, %v981_v9  ;;  %v5487_v35 = vmul.f32 %v5075_v49, %v5370_v55  ;;  %v974_v27 = vadd.f32 %v5128_v19, %v751_v25  ;;  %v2208_v17 = vsel %vm601_vm2, %v2179_v59, 0.0 }
 0x325   : > { %v1206_v56 = vadd.f32 %v5207_v52, %v983_v31  ;;  %v976_v30 = vadd.f32 %v5131_v54, %v753_v36  ;;  %v2207_v32 = vadd.f32 %v2206_v51, %v2205_v15  ;;  %v5493_v63 = vpop.permute.xlu1 %2249  ;;  %v748_v11 = vmul.f32 %v6294_v5, %v5376_v0  ;;  %v6307_v5 = vld [vmem:[#allocation13_spill] sm:$0xff] }
 0x326   : > { %v1195_v23 = vadd.f32 %v5178_v41, %v972_v61  ;;  %v973_v9 = vadd.f32 %v5106_v42, %v750_v29  ;;  %v975_v49 = vadd.f32 %v5110_v57, %v752_v13  ;;  %v977_v19 = vadd.f32 %v5114_v8, %v754_v39  ;;  %v6297_v42 = vld [vmem:[#allocation37_spill] sm:$0xff] }
 0x327   : > { %v1425_v59 = vadd.f32 %v5229_v7, %v1202_v21  ;;  %v1416_v52 = vadd.f32 %v5233_v33, %v1193_v10  ;;  %v1208_v54 = vadd.f32 %v6295_v16, %v985_v26  ;;  %v2209_v51 = vadd.f32 %v2208_v17, %v2207_v32  ;;  %v6298_v57 = vld [vmem:[#allocation97_spill] sm:$0xff]  ;;  %v6300_v33 = vld [vmem:[#allocation63_spill] sm:$0xff]  ;;  %v6303_v21 = vld [vmem:[#allocation62_spill] sm:$0xff] }
 0x328   : > { %v1427_v25 = vadd.f32 %v5264_v53, %v1204_v2  ;;  %v5509_v41 = vmul.f32 %v6296_v44, %v5370_v55  ;;  %v1197_v31 = vadd.f32 %v6297_v42, %v974_v27  ;;  %v5514_v8 = vmul.f32 %v6298_v57, %v5370_v55  ;;  %v6299_v7 = vld [vmem:[#allocation121_spill] sm:$0xff]  ;;  %v6304_v26 = vld [vmem:[#allocation90_spill] sm:$0xff]  ;;  %v6305_v2 = vld [vmem:[#allocation71_spill] sm:$0xff] }
 0x329   : > { %v1429_v36 = vadd.f32 %v6299_v7, %v1206_v56  ;;  %v1199_v37 = vadd.f32 %v6300_v33, %v976_v30  ;;  %v2211_v61 = vadd.f32 %v5404_v40, %v2209_v51  ;;  %v5519_v29 = vpop.permute.xlu1 %2257  ;;  %v6301_v13 = vld [vmem:[#allocation41_spill] sm:$0xff]  ;;  %v1418_v39 = vadd.f32 %v6302_v47, %v1195_v23  ;;  %v6306_v17 = vld [vmem:[#allocation11_spill] sm:$0xff]  ;;  %v6312_v57 = vld [vmem:[#allocation94_spill] sm:$0xff] }
 0x32a   : > { %v971_v53 = vadd.f32 %v6301_v13, %v748_v11  ;;  %v1196_v10 = vadd.f32 %v6303_v21, %v973_v9  ;;  %v1198_v15 = vadd.f32 %v6304_v26, %v975_v49  ;;  %v1200_v27 = vadd.f32 %v6305_v2, %v977_v19  ;;  %v6308_v16 = vld [vmem:[#allocation141_spill] sm:$0xff]  ;;  %v6311_v9 = vld [vmem:[#allocation10_spill] sm:$0xff]  ;;  %v6313_v33 = vld [vmem:[#allocation43_spill] sm:$0xff] }
 0x32b   : > { %v1648_v32 = vadd.f32 %v6306_v17, %v1425_v59  ;;  %v1639_v56 = vadd.f32 %v6307_v5, %v1416_v52  ;;  %v1431_v30 = vadd.f32 %v6308_v16, %v1208_v54  ;;  %v2212_v44 = vrot.slane %v2211_v61, 4  ;;  %v6309_v51 = vld [vmem:[#allocation101_spill] sm:$0xff]  ;;  %v5538_v52 = vpop.permute.xlu0 %2387  ;;  %v6316_v26 = vld [vmem:[#allocation120_spill] sm:$0xff]  ;;  %v6317_v17 = vld [vmem:[#allocation139_spill] sm:$0xff] }
 0x32c   : > { %v1650_v40 = vadd.f32 %v5314_v24, %v1427_v25  ;;  %v755_v11 = vmul.f32 %v6309_v51, %v5376_v0  ;;  %v6310_v23 = vld [vmem:[#allocation93_spill] sm:$0xff]  ;;  %v759_v49 = vmul.f32 %v6311_v9, %v5376_v0  ;;  %v1652_v19 = vadd.f32 %v5317_v38, %v1429_v36  ;;  %v6314_v25 = vld [vmem:[#allocation150_spill] sm:$0xff] }
 0x32d   : > { %v757_v42 = vmul.f32 %v6310_v23, %v5376_v0  ;;  %v1420_v59 = vadd.f32 %v6312_v57, %v1197_v31  ;;  %v2213_v7 = vadd.f32 %v2212_v44, %v2211_v61  ;;  %v5540_v54 = vpop.permute.xlu1 %2265  ;;  %v1194_v24 = vadd.f32 %v6313_v33, %v971_v53  ;;  %v6315_v47 = vld [vmem:[#allocation105_spill] sm:$0xff]  ;;  %v6319_v53 = vld [vmem:[#allocation88_spill] sm:$0xff] }
 0x32e   : > { %v1422_v13 = vadd.f32 %v6314_v25, %v1199_v37  ;;  %v1419_v21 = vadd.f32 %v6315_v47, %v1196_v10  ;;  %v1421_v2 = vadd.f32 %v6316_v26, %v1198_v15  ;;  %v1423_v5 = vadd.f32 %v6317_v17, %v1200_v27  ;;  %v6318_v44 = vld [vmem:[#allocation61_spill] sm:$0xff]  ;;  %v6325_v25 = vld [vmem:[#allocation172_spill] sm:$0xff] }
 0x32f   : > { %v1871_v16 = vadd.f32 %v5353_v6, %v1648_v32  ;;  %v1862_v38 = vadd.f32 %v5358_v34, %v1639_v56  ;;  %v1654_v31 = vadd.f32 %v5326_v18, %v1431_v30  ;;  %v2214_v36 = vrot.slane %v2213_v7, 2  ;;  %v6320_v37 = vld [vmem:[#allocation69_spill] sm:$0xff]  ;;  %v6322_v6 = vld [vmem:[#allocation143_spill] sm:$0xff]  ;;  %v6323_v34 = vld [vmem:[#allocation96_spill] sm:$0xff] }
 0x330   : > { %v1873_v61 = vadd.f32 %v5387_v4, %v1650_v40  ;;  %v978_v51 = vadd.f32 %v6318_v44, %v755_v11  ;;  %v980_v23 = vadd.f32 %v6319_v53, %v757_v42  ;;  %v982_v9 = vadd.f32 %v6320_v37, %v759_v49  ;;  %v6321_v27 = vld [vmem:[#allocation9_spill] sm:$0xff]  ;;  %v6324_v18 = vld [vmem:[#allocation152_spill] sm:$0xff]  ;;  %v6326_v40 = vld [vmem:[#allocation15_spill] sm:$0xff] }
 0x331   : > { %v1875_v10 = vadd.f32 %v5393_v62, %v1652_v19  ;;  %v2215_v15 = vadd.f32 %v2214_v36, %v2213_v7  ;;  %v2274_v57 = vpop.permute.xlu1 %2273  ;;  %v1417_v33 = vadd.f32 %v6321_v27, %v1194_v24  ;;  %v1641_v32 = vadd.f32 %v6322_v6, %v1418_v39  ;;  %v2398_v7 = vpop.permute.xlu0 %2397  ;;  %v6327_v24 = vld [vmem:[#allocation92_spill] sm:$0xff]  ;;  %v6328_v39 = vld [vmem:[#allocation73_spill] sm:$0xff]  ;;  %v6333_v44 = vld [vmem:[#allocation18_spill] sm:$0xff] }
 0x332   : > { %v1642_v56 = vadd.f32 %v6323_v34, %v1419_v21  ;;  %v1644_v30 = vadd.f32 %v6324_v18, %v1421_v2  ;;  %v1646_v4 = vadd.f32 %v6325_v25, %v1423_v5  ;;  %v1643_v11 = vadd.f32 %v6326_v40, %v1420_v59  ;;  %v6329_v21 = vld [vmem:[#allocation103_spill] sm:$0xff]  ;;  %v6330_v2 = vld [vmem:[#allocation45_spill] sm:$0xff]  ;;  %v6337_v34 = vld [vmem:[#allocation166_spill] sm:$0xff] }
 0x333   : > { %v2094_v42 = vadd.f32 %v5434_v14, %v1871_v16  ;;  %v5563_v49 = vadd.f32 %v5442_v20, %v1862_v38  ;;  %v1877_v62 = vadd.f32 %v5401_v12, %v1654_v31  ;;  %v2216_v19 = vrot.slane %v2215_v15, 1  ;;  %v6331_v59 = vld [vmem:[#allocation165_spill] sm:$0xff]  ;;  %v6332_v20 = vld [vmem:[#allocation170_spill] sm:$0xff]  ;;  %v6334_v31 = vld [vmem:[#allocation51_spill] sm:$0xff] }
 0x334   : > { %v1201_v47 = vadd.f32 %v6327_v24, %v978_v51  ;;  %v1203_v26 = vadd.f32 %v6328_v39, %v980_v23  ;;  %v1205_v17 = vadd.f32 %v6329_v21, %v982_v9  ;;  %v761_v5 = vmul.f32 %v6330_v2, %v5376_v0  ;;  %v6335_v37 = vld [vmem:[#allocation53_spill] sm:$0xff]  ;;  %v6336_v27 = vld [vmem:[#allocation55_spill] sm:$0xff]  ;;  %v6343_v39 = vld [vmem:[#allocation26_spill] sm:$0xff] }
 0x335   : > { %v2217_v36 = vadd.f32 %v2216_v19, %v2215_v15  ;;  %v2225_v14 = vrot.slane %v5396_v22, %v6331_v59  ;;  %v2282_v16 = vpop.permute.xlu1 %2281  ;;  %v1640_v38 = vadd.f32 %v6332_v20, %v1417_v33  ;;  %v1864_v12 = vadd.f32 %v6333_v44, %v1641_v32  ;;  %v6338_v33 = vld [vmem:[#allocation128_spill] sm:$0xff] }
 0x336   : > { %v1865_v53 = vadd.f32 %v6334_v31, %v1642_v56  ;;  %v1867_v51 = vadd.f32 %v6335_v37, %v1644_v30  ;;  %v1869_v23 = vadd.f32 %v6336_v27, %v1646_v4  ;;  %v1866_v9 = vadd.f32 %v5374_v28, %v1643_v11  ;;  %v6339_v56 = vld [vmem:[#allocation167_spill] sm:$0xff]  ;;  %v2408_v28 = vpop.permute.xlu0 %2407 }
 0x337   : > { %v2096_v6 = vadd.f32 %v5487_v35, %v1873_v61  ;;  %v2098_v0 = vadd.f32 %v5509_v41, %v1875_v10  ;;  %v2100_v15 = vadd.f32 %v5514_v8, %v1877_v62  ;;  %v2226_v22 = vadd.f32 %v2225_v14, %v2217_v36  ;;  %v6340_v30 = vld [vmem:[#allocation99_spill] sm:$0xff]  ;;  %v6341_v61 = vld [vmem:[#allocation49_spill] sm:$0xff]  ;;  %v6344_v36 = vld [vmem:[#allocation22_spill] sm:$0xff] }
 0x338   : > { %v5583_v18 = vadd.f32 %v6337_v34, %v1201_v47  ;;  %v5586_v32 = vadd.f32 %v6338_v33, %v1203_v26  ;;  %v5589_v25 = vadd.f32 %v6339_v56, %v1205_v17  ;;  %v984_v4 = vadd.f32 %v6340_v30, %v761_v5  ;;  %v6342_v10 = vld [vmem:[#allocation17_spill] sm:$0xff]  ;;  %v6348_v33 = vld [vmem:[#allocation20_spill] sm:$0xff]  ;;  %v6349_v56 = vld [vmem:[#allocation38_spill] sm:$0xff] }
 0x339   : > { %v5592_v40 = vmax.f32 %v2226_v22, 0.0  ;;  %v2290_v35 = vpop.permute.xlu1 %2289  ;;  %v1863_v41 = vadd.f32 %v6341_v61, %v1640_v38  ;;  %v2087_v8 = vadd.f32 %v5448_v50, %v1864_v12  ;;  %v1645_v11 = vadd.f32 %v6342_v10, %v1422_v13  ;;  %v6350_v10 = vld [vmem:[#allocation39_spill] sm:$0xff] }
 0x33a   : > { %v2088_v62 = vadd.f32 %v5412_v43, %v1865_v53  ;;  %v2090_v19 = vadd.f32 %v5422_v46, %v1867_v51  ;;  %v2092_v24 = vadd.f32 %v5430_v45, %v1869_v23  ;;  %v2089_v47 = vadd.f32 %v5452_v58, %v1866_v9  ;;  %v2418_v12 = vpop.permute.xlu0 %2417  ;;  %v6346_v9 = vld [vmem:[#allocation34_spill] sm:$0xff] }
 0x33b   : > { %v2293_v26 = vmul.f32 %v6343_v39, %v5592_v40  ;;  %v2295_v21 = vmul.f32 %v5468_v1, %v5592_v40  ;;  %v2297_v17 = vmul.f32 %v5493_v63, %v5592_v40  ;;  %v2299_v50 = vmul.f32 %v5519_v29, %v5592_v40  ;;  %v6345_v29 = vld [vmem:[#allocation24_spill] sm:$0xff] }
 0x33c   : > { %v2301_v43 = vmul.f32 %v5540_v54, %v5592_v40  ;;  %v2303_v46 = vmul.f32 %v2274_v57, %v5592_v40  ;;  %v2305_v45 = vmul.f32 %v2282_v16, %v5592_v40  ;;  %v2307_v58 = vmul.f32 %v2290_v35, %v5592_v40 }
 0x33d   : > { %v2311_v13 = vadd.f32 %v2295_v21, %v2088_v62  ;;  %v2313_v2 = vadd.f32 %v2297_v17, %v2090_v19  ;;  %v2315_v5 = vadd.f32 %v2299_v50, %v2092_v24  ;;  %v2086_v1 = vadd.f32 %v6344_v36, %v1863_v41  ;;  %v6351_v19 = vld [vmem:[#allocation95_spill] sm:$0xff] }
 0x33e   : > { %v2317_v59 = vadd.f32 %v2301_v43, %v2094_v42  ;;  %v2319_v14 = vadd.f32 %v2303_v46, %v2096_v6  ;;  %v2321_v63 = vadd.f32 %v2305_v45, %v2098_v0  ;;  %v2323_v20 = vadd.f32 %v2307_v58, %v2100_v15  ;;  %v2348_v38 = vpop.permute.xlu1 %2347  ;;  %v6354_v43 = vld [vmem:[#allocation122_spill] sm:$0xff]  ;;  %v6355_v46 = vld [vmem:[#allocation127_spill] sm:$0xff]  ;;  %v6356_v58 = vld [vmem:[#allocation129_spill] sm:$0xff] }
 0x33f   : > { %v2423_v44 = vadd.f32 %v6345_v29, %v2311_v13  ;;  %v2425_v54 = vadd.f32 %v5466_v3, %v2313_v2  ;;  %v2427_v57 = vadd.f32 %v5504_v60, %v2315_v5  ;;  %v2309_v16 = vadd.f32 %v2293_v26, %v2086_v1  ;;  %v6347_v3 = vld [vmem:[#allocation35_spill] sm:$0xff]  ;;  %v6358_v1 = vld [vmem:[#allocation168_spill] sm:$0xff] }
 0x340   : > { %v2429_v31 = vadd.f32 %v5538_v52, %v2317_v59  ;;  %v2431_v53 = vadd.f32 %v2398_v7, %v2319_v14  ;;  %v2433_v37 = vadd.f32 %v2408_v28, %v2321_v63  ;;  %v2435_v51 = vadd.f32 %v2418_v12, %v2323_v20  ;;  %v6352_v26 = vld [vmem:[#allocation75_spill] sm:$0xff]  ;;  %v6359_v63 = vld [vmem:[#allocation16_spill] sm:$0xff] }
 0x341   : > { %v3066_v27 = vmul.f32 -1.442695, %v2423_v44  ;;  %v3068_v23 = vmul.f32 -1.442695, %v2425_v54  ;;  %v3070_v42 = vmul.f32 -1.442695, %v2427_v57  ;;  %v2294_v6 = vmul.f32 %v6346_v9, %v5592_v40 }
 0x342   : > { %v3072_v0 = vmul.f32 -1.442695, %v2429_v31  ;;  %v2421_v15 = vadd.f32 %v2348_v38, %v2309_v16  ;;  %v2353_v22 = vpop.permute.xlu1 %2352  ;;  %v2296_v34 = vmul.f32 %v6347_v3, %v5592_v40  ;;  %v1868_v60 = vadd.f32 %v6348_v33, %v1645_v11  ;;  %v6360_v44 = vld [vmem:[#allocation19_spill] sm:$0xff]  ;;  %v6362_v57 = vld [vmem:[#allocation36_spill] sm:$0xff]  ;;  %v6365_v9 = vld [vmem:[#allocation133_spill] sm:$0xff] }
 0x343   : > { %v1207_v30 = vadd.f32 %v6349_v56, %v984_v4  ;;  %3230 = vpow2.f32 %v3066_v27  ;;  %v3074_v52 = vmul.f32 -1.442695, %v2431_v53  ;;  %v2310_v7 = vadd.f32 %v2294_v6, %v2087_v8  ;;  %v6366_v3 = vld [vmem:[#allocation47_spill] sm:$0xff] }
 0x344   : > { %3232 = vpow2.f32 %v3068_v23  ;;  %v3076_v28 = vmul.f32 -1.442695, %v2433_v37  ;;  %v3078_v35 = vmul.f32 -1.442695, %v2435_v51  ;;  %v2312_v61 = vadd.f32 %v2296_v34, %v2089_v47  ;;  %v6353_v47 = vld [vmem:[#allocation144_spill] sm:$0xff]  ;;  %v6363_v51 = vld [vmem:[#allocation151_spill] sm:$0xff] }
 0x345   : > { %3234 = vpow2.f32 %v3070_v42  ;;  %v2422_v41 = vadd.f32 %v2353_v22, %v2310_v7  ;;  %v2298_v62 = vmul.f32 %v6350_v10, %v5592_v40  ;;  %v2292_v24 = vmul.f32 %v6351_v19, %v5592_v40  ;;  %v6364_v23 = vld [vmem:[#allocation59_spill] sm:$0xff] }
 0x346   : > { %3236 = vpow2.f32 %v3072_v0  ;;  %v3064_v39 = vmul.f32 -1.442695, %v2421_v15  ;;  %v2363_v11 = vpop.permute.xlu1 %2362  ;;  %v2091_v4 = vadd.f32 %v5472_v48, %v1868_v60  ;;  %v1647_v8 = vadd.f32 %v6352_v26, %v5583_v18  ;;  %v6357_v18 = vld [vmem:[#allocation131_spill] sm:$0xff] }
 0x347   : > { %3238 = vpow2.f32 %v3074_v52  ;;  %v3065_v21 = vmul.f32 -1.442695, %v2422_v41  ;;  %v2424_v17 = vadd.f32 %v2363_v11, %v2312_v61  ;;  %v1649_v50 = vadd.f32 %v6353_v47, %v5586_v32  ;;  %v6368_v19 = vld [vmem:[#allocation67_spill] sm:$0xff] }
 0x348   : > { %3240 = vpow2.f32 %v3076_v28  ;;  %v1854_v45 = vmul.f32 %v6355_v46, %v6354_v43  ;;  %v1856_v13 = vmul.f32 %v6356_v58, %v6354_v43  ;;  %v2308_v2 = vadd.f32 %v2292_v24, %v5563_v49  ;;  %v6361_v49 = vld [vmem:[#allocation149_spill] sm:$0xff] }
 0x349   : > { %3242 = vpow2.f32 %v3078_v35  ;;  %v3067_v48 = vmul.f32 -1.442695, %v2424_v17  ;;  %v2314_v5 = vadd.f32 %v2298_v62, %v2091_v4  ;;  %v1858_v36 = vmul.f32 %v6357_v18, %v6354_v43  ;;  %v6367_v35 = vld [vmem:[#allocation153_spill] sm:$0xff] }
 0x34a   : > { %v1430_v59 = vadd.f32 %v6358_v1, %v1207_v30  ;;  %3244 = vpow2.f32 %v3064_v39  ;;  %v2373_v14 = vpop.permute.xlu1 %2372  ;;  %v1870_v32 = vadd.f32 %v1854_v45, %v1647_v8  ;;  %v2420_v20 = vadd.f32 %v6359_v63, %v2308_v2  ;;  %v6369_v45 = vld [vmem:[#allocation155_spill] sm:$0xff] }
 0x34b   : > { %3246 = vpow2.f32 %v3065_v21  ;;  %v2426_v38 = vadd.f32 %v2373_v14, %v2314_v5  ;;  %v1872_v29 = vadd.f32 %v1856_v13, %v1649_v50  ;;  %v1651_v54 = vadd.f32 %v6360_v44, %v5589_v25  ;;  %v6370_v5 = vld [vmem:[#allocation86_spill] sm:$0xff] }
 0x34c   : > { %3248 = vpow2.f32 %v3067_v48  ;;  %v2077_v12 = vmul.f32 %v6361_v49, %v5370_v55  ;;  %v2300_v16 = vmul.f32 %v6362_v57, %v5592_v40  ;;  %v3063_v31 = vmul.f32 -1.442695, %v2420_v20 }
 0x34d   : > { %v3231_v53 = vpop.eup %3230  ;;  %v3069_v37 = vmul.f32 -1.442695, %v2426_v38  ;;  %v2079_v27 = vmul.f32 %v6363_v51, %v5370_v55  ;;  %v2302_v42 = vmul.f32 %v6364_v23, %v5592_v40  ;;  %v1860_v6 = vmul.f32 %v6365_v9, %v6354_v43 }
 0x34e   : > { %v3233_v25 = vpop.eup %3232  ;;  %v2487_v0 = vadd.f32 1.0, %v3231_v53  ;;  %v2383_v15 = vpop.permute.xlu1 %2382  ;;  %v2093_v22 = vadd.f32 %v2077_v12, %v1870_v32  ;;  %3250 = vpow2.f32 %v3063_v31  ;;  %v1653_v34 = vadd.f32 %v6366_v3, %v1430_v59 }
 0x34f   : > { %v3235_v33 = vpop.eup %3234  ;;  %v2489_v60 = vadd.f32 1.0, %v3233_v25  ;;  %3252 = vpow2.f32 %v3069_v37  ;;  %v2095_v56 = vadd.f32 %v2079_v27, %v1872_v29  ;;  %v1874_v30 = vadd.f32 %v1858_v36, %v1651_v54 }
 0x350   : > { %v3237_v52 = vpop.eup %3236  ;;  %3254 = vrcp.f32 %v2487_v0  ;;  %v2491_v7 = vadd.f32 1.0, %v3235_v33  ;;  %v2316_v28 = vadd.f32 %v2300_v16, %v2093_v22  ;;  %v2081_v61 = vmul.f32 %v6367_v35, %v5370_v55 }
 0x351   : > { %v3239_v41 = vpop.eup %3238  ;;  %3256 = vrcp.f32 %v2489_v60  ;;  %v2493_v10 = vadd.f32 1.0, %v3237_v52  ;;  %v2318_v62 = vadd.f32 %v2302_v42, %v2095_v56  ;;  %v2304_v24 = vmul.f32 %v6368_v19, %v5592_v40 }
 0x352   : > { %v3241_v39 = vpop.eup %3240  ;;  %3258 = vrcp.f32 %v2491_v7  ;;  %v2495_v11 = vadd.f32 1.0, %v3239_v41  ;;  %v2428_v4 = vadd.f32 %v2383_v15, %v2316_v28  ;;  %v2393_v26 = vpop.permute.xlu1 %2392  ;;  %v1876_v8 = vadd.f32 %v1860_v6, %v1653_v34 }
 0x353   : > { %v3243_v21 = vpop.eup %3242  ;;  %3260 = vrcp.f32 %v2493_v10  ;;  %v2497_v17 = vadd.f32 1.0, %v3241_v39  ;;  %v2430_v47 = vadd.f32 %v2393_v26, %v2318_v62  ;;  %v2097_v50 = vadd.f32 %v2081_v61, %v1874_v30 }
 0x354   : > { %v3245_v43 = vpop.eup %3244  ;;  %3262 = vrcp.f32 %v2495_v11  ;;  %v2499_v46 = vadd.f32 1.0, %v3243_v21  ;;  %v2083_v58 = vmul.f32 %v6369_v45, %v5370_v55  ;;  %v2306_v18 = vmul.f32 %v6370_v5, %v5592_v40 }
 0x355   : > { %v3247_v13 = vpop.eup %3246  ;;  %3264 = vrcp.f32 %v2497_v17  ;;  %v2485_v2 = vadd.f32 1.0, %v3245_v43  ;;  %v2320_v48 = vadd.f32 %v2304_v24, %v2097_v50  ;;  %v3071_v59 = vmul.f32 -1.442695, %v2428_v4 }
 0x356   : > { %v3249_v36 = vpop.eup %3248  ;;  %3266 = vrcp.f32 %v2499_v46  ;;  %v2486_v1 = vadd.f32 1.0, %v3247_v13  ;;  %v2403_v14 = vpop.permute.xlu1 %2402  ;;  %v2099_v32 = vadd.f32 %v2083_v58, %v1876_v8  ;;  %v3073_v20 = vmul.f32 -1.442695, %v2430_v47  ;;  %v2550_v58 = vld [vmem:[%s3585_s28 + $0x10] sm:$0xff]  ;;  %v2551_v13 = vld [vmem:[%s3585_s28 + $0x18] sm:$0xff] }
 0x357   : > { %3268 = vrcp.f32 %v2485_v2  ;;  %v2488_v63 = vadd.f32 1.0, %v3249_v36  ;;  %v2432_v38 = vadd.f32 %v2403_v14, %v2320_v48  ;;  %v6371_v45 = vmov 1   ;;  %v2555_v36 = vld [vmem:[%s3585_s28 + $0x38] sm:$0xff] }
 0x358   : > { %v3251_v29 = vpop.eup %3250  ;;  %3270 = vrcp.f32 %v2486_v1  ;;  %v2322_v54 = vadd.f32 %v2306_v18, %v2099_v32  ;;  %v2554_v18 = vld [vmem:[%s3585_s28 + $0x30] sm:$0xff]  ;;  %v2548_v1 = vld [vmem:[%s3585_s28] sm:$0xff] }
 0x359   : > { %v3253_v55 = vpop.eup %3252  ;;  %3272 = vrcp.f32 %v2488_v63  ;;  %v2484_v44 = vadd.f32 1.0, %v3251_v29  ;;  %v3075_v40 = vmul.f32 -1.442695, %v2432_v38  ;;  %v2558_v38 = vld [vmem:[%s3585_s28 + $0x50] sm:$0xff]  ;;  %v2559_v29 = vld [vmem:[%s3585_s28 + $0x58] sm:$0xff] }
 0x35a   : > { %v3255_v49 = vpop.eup %3254  ;;  %v2490_v12 = vadd.f32 1.0, %v3253_v55  ;;  %3274 = vpow2.f32 %v3071_v59  ;;  %v2413_v57 = vpop.permute.xlu1 %2412  ;;  %v2549_v59 = vld [vmem:[%s3585_s28 + $0x8] sm:$0xff] }
 0x35b   : > { %v3257_v16 = vpop.eup %3256  ;;  %2535 = vst.msk [vmem:[#allocation2 + $0x18] sm:$0xff] %vm601_vm2, %v3255_v49  ;;  %3276 = vpow2.f32 %v3073_v20  ;;  %v2434_v31 = vadd.f32 %v2413_v57, %v2322_v54  ;;  %v2552_v54 = vld [vmem:[%s3585_s28 + $0x20] sm:$0xff]  ;;  %v2553_v49 = vld [vmem:[%s3585_s28 + $0x28] sm:$0xff] }
 0x35c   : > { %v3259_v53 = vpop.eup %3258  ;;  %2537 = vst.msk [vmem:[#allocation2 + $0x28] sm:$0xff] %vm601_vm2, %v3257_v16  ;;  %3278 = vrcp.f32 %v2490_v12 }
 0x35d   : > { %v3261_v37 = vpop.eup %3260  ;;  %2539 = vst.msk [vmem:[#allocation2 + $0x38] sm:$0xff] %vm601_vm2, %v3259_v53  ;;  %3280 = vrcp.f32 %v2484_v44  ;;  %v3077_v51 = vmul.f32 -1.442695, %v2434_v31  ;;  %v2562_v31 = vld [vmem:[%s3585_s28 + $0x70] sm:$0xff]  ;;  %v2563_v53 = vld [vmem:[%s3585_s28 + $0x78] sm:$0xff] }
 0x35e   : > { %v3263_v27 = vpop.eup %3262  ;;  %2541 = vst.msk [vmem:[#allocation2 + $0x48] sm:$0xff] %vm601_vm2, %v3261_v37  ;;  %3282 = vpow2.f32 %v3075_v40 }
 0x35f   : > { %v3265_v23 = vpop.eup %3264  ;;  %2543 = vst.msk [vmem:[#allocation2 + $0x58] sm:$0xff] %vm601_vm2, %v3263_v27  ;;  %3284 = vpow2.f32 %v3077_v51  ;;  %v2556_v27 = vld [vmem:[%s3585_s28 + $0x40] sm:$0xff] }
 0x360   : > { %v3267_v42 = vpop.eup %3266  ;;  %2545 = vst.msk [vmem:[#allocation2 + $0x68] sm:$0xff] %vm601_vm2, %v3265_v23  ;;  %v2557_v23 = vld [vmem:[%s3585_s28 + $0x48] sm:$0xff] }
 0x361   : > { %v3269_v9 = vpop.eup %3268  ;;  %2547 = vst.msk [vmem:[#allocation2 + $0x78] sm:$0xff] %vm601_vm2, %v3267_v42 }
 0x362   : > { %v3271_v6 = vpop.eup %3270  ;;  %2533 = vst.msk [vmem:[#allocation2 + $0x8] sm:$0xff] %vm601_vm2, %v3269_v9  ;;  %v2567_v28 = vld [vmem:[#allocation2 + $0x18] sm:$0xff] }
 0x363   : > { %v3273_v25 = vpop.eup %3272  ;;  %2534 = vst.msk [vmem:[#allocation2 + $0x10] sm:$0xff] %vm601_vm2, %v3271_v6  ;;  %v2569_v10 = vld [vmem:[#allocation2 + $0x28] sm:$0xff] }
 0x364   : > { %v3275_v0 = vpop.eup %3274  ;;  %2536 = vst.msk [vmem:[#allocation2 + $0x20] sm:$0xff] %vm601_vm2, %v3273_v25  ;;  %v2571_v39 = vld [vmem:[#allocation2 + $0x38] sm:$0xff] }
 0x365   : > { %v3277_v15 = vpop.eup %3276  ;;  %v2492_v22 = vadd.f32 1.0, %v3275_v0  ;;  %v2661_v26 = vld [vmem:[#allocation2 + $0x48] sm:$0xff]  ;;  %v2646_v0 = vld [vmem:[%s3585_s28 + $0x90] sm:$0xff] }
 0x366   : > { %v3279_v3 = vpop.eup %3278  ;;  %v2494_v34 = vadd.f32 1.0, %v3277_v15  ;;  %v2663_v21 = vld [vmem:[#allocation2 + $0x58] sm:$0xff] }
 0x367   : > { %v3281_v33 = vpop.eup %3280  ;;  %2538 = vst.msk [vmem:[#allocation2 + $0x30] sm:$0xff] %vm601_vm2, %v3279_v3  ;;  %3286 = vrcp.f32 %v2492_v22  ;;  %v2665_v47 = vld [vmem:[#allocation2 + $0x68] sm:$0xff]  ;;  %v2647_v15 = vld [vmem:[%s3585_s28 + $0x98] sm:$0xff] }
 0x368   : > { %v3283_v60 = vpop.eup %3282  ;;  %3288 = vrcp.f32 %v2494_v34  ;;  %2532 = vst.msk [vmem:[#allocation2] sm:$0xff] %vm601_vm2, %v3281_v33  ;;  %v2667_v43 = vld [vmem:[#allocation2 + $0x78] sm:$0xff]  ;;  %v2560_v34 = vld [vmem:[%s3585_s28 + $0x60] sm:$0xff]  ;;  %v2561_v33 = vld [vmem:[%s3585_s28 + $0x68] sm:$0xff] }
 0x369   : > { %v3285_v56 = vpop.eup %3284  ;;  %v2496_v30 = vadd.f32 1.0, %v3283_v60  ;;  %v2565_v52 = vld [vmem:[#allocation2 + $0x8] sm:$0xff] }
 0x36a   : > { %v2498_v7 = vadd.f32 1.0, %v3285_v56  ;;  %2579 = vperm.xlu0 %3226, %v2565_v52   ;;  %v2566_v41 = vld [vmem:[#allocation2 + $0x10] sm:$0xff] }
 0x36b   : > { %3290 = vrcp.f32 %v2496_v30  ;;  %v2568_v24 = vld [vmem:[#allocation2 + $0x20] sm:$0xff] }
 0x36c   : > { %3292 = vrcp.f32 %v2498_v7  ;;  %v2650_v7 = vld [vmem:[%s3585_s28 + $0xb0] sm:$0xff] }
 0x36e   : > { %2589 = vperm.xlu0 %3226, %v2567_v28   ;;  %v2570_v4 = vld [vmem:[#allocation2 + $0x30] sm:$0xff] }
 0x36f   : > { %v2564_v35 = vld [vmem:[#allocation2] sm:$0xff] }
 0x370   : > { %2574 = vperm.xlu1 %3227, %v2564_v35  }
 0x371   : > { %v3287_v61 = vpop.eup %3286 }
 0x372   : > { %v3289_v62 = vpop.eup %3288  ;;  %2540 = vst.msk [vmem:[#allocation2 + $0x40] sm:$0xff] %vm601_vm2, %v3287_v61  ;;  %2599 = vperm.xlu0 %3226, %v2569_v10  }
 0x373   : > { %2542 = vst.msk [vmem:[#allocation2 + $0x50] sm:$0xff] %vm601_vm2, %v3289_v62 }
 0x374   : > { %2584 = vperm.xlu1 %3227, %v2566_v41  }
 0x375   : > { %v3291_v19 = vpop.eup %3290 }
 0x376   : > { %v3293_v11 = vpop.eup %3292  ;;  %2544 = vst.msk [vmem:[#allocation2 + $0x60] sm:$0xff] %vm601_vm2, %v3291_v19  ;;  %2609 = vperm.xlu0 %3226, %v2571_v39  }
 0x377   : > { %2546 = vst.msk [vmem:[#allocation2 + $0x70] sm:$0xff] %vm601_vm2, %v3293_v11  ;;  %v2654_v11 = vld [vmem:[%s3585_s28 + $0xd0] sm:$0xff] }
 0x378   : > { %2594 = vperm.xlu1 %3227, %v2568_v24  }
 0x379   : > { %v2660_v8 = vld [vmem:[#allocation2 + $0x40] sm:$0xff] }
 0x37a   : > { %2675 = vperm.xlu0 %3226, %v2661_v26   ;;  %v2662_v17 = vld [vmem:[#allocation2 + $0x50] sm:$0xff] }
 0x37c   : > { %2604 = vperm.xlu1 %3227, %v2570_v4  }
 0x37d   : > { %v2664_v50 = vld [vmem:[#allocation2 + $0x60] sm:$0xff] }
 0x37e   : > { %2685 = vperm.xlu0 %3226, %v2663_v21   ;;  %v2666_v46 = vld [vmem:[#allocation2 + $0x70] sm:$0xff] }
 0x380   : > { %2670 = vperm.xlu1 %3227, %v2660_v8  }
 0x382   : > { %2695 = vperm.xlu0 %3226, %v2665_v47  }
 0x384   : > { %2680 = vperm.xlu1 %3227, %v2662_v17  }
 0x386   : > { %2705 = vperm.xlu0 %3226, %v2667_v43  }
 0x388   : > { %2690 = vperm.xlu1 %3227, %v2664_v50  }
 0x38a   : > { %3229 = vset.pattern.permute.xlu0 %v6371_v45 }
 0x38b   : > { %2771 = vperm.xlu0 %3229, %v2565_v52  }
 0x38c   : > { %2700 = vperm.xlu1 %3227, %v2666_v46  }
 0x38f   : > { %2786 = vperm.xlu0 %3229, %v2568_v24  }
 0x390   : > { %3228 = vset.pattern.permute.xlu1 %v6371_v45  ;;  %v2658_v45 = vld [vmem:[%s3585_s28 + $0xf0] sm:$0xff] }
 0x391   : > { %2766 = vperm.xlu1 %3228, %v2564_v35  }
 0x393   : > { %2796 = vperm.xlu0 %3229, %v2570_v4   ;;  %v2655_v4 = vld [vmem:[%s3585_s28 + $0xd8] sm:$0xff] }
 0x395   : > { %2776 = vperm.xlu1 %3228, %v2566_v41   ;;  %v2644_v41 = vld [vmem:[%s3585_s28 + $0x80] sm:$0xff] }
 0x397   : > { %2863 = vperm.xlu0 %3229, %v2660_v8  }
 0x399   : > { %2781 = vperm.xlu1 %3228, %v2567_v28   ;;  %v2651_v28 = vld [vmem:[%s3585_s28 + $0xb8] sm:$0xff] }
 0x39b   : > { %2873 = vperm.xlu0 %3229, %v2662_v17   ;;  %v2649_v17 = vld [vmem:[%s3585_s28 + $0xa8] sm:$0xff] }
 0x39d   : > { %2791 = vperm.xlu1 %3228, %v2569_v10   ;;  %v2645_v10 = vld [vmem:[%s3585_s28 + $0x88] sm:$0xff] }
 0x39f   : > { %2883 = vperm.xlu0 %3229, %v2664_v50  }
 0x3a1   : > { %2801 = vperm.xlu1 %3228, %v2571_v39  }
 0x3a3   : > { %2893 = vperm.xlu0 %3229, %v2666_v46  }
 0x3a5   : > { %2868 = vperm.xlu1 %3228, %v2661_v26  }
 0x3a9   : > { %2878 = vperm.xlu1 %3228, %v2663_v21   ;;  %v2648_v21 = vld [vmem:[%s3585_s28 + $0xa0] sm:$0xff] }
 0x3ad   : > { %2888 = vperm.xlu1 %3228, %v2665_v47  }
 0x3b1   : > { %2898 = vperm.xlu1 %3228, %v2667_v43  }
 0x3e9   : > { %v2580_v2 = vpop.permute.xlu0 %2579 }
 0x3ea   : > { %v2614_v48 = vmul.f32 %v2580_v2, %v2550_v58  ;;  %v2615_v5 = vmul.f32 %v2580_v2, %v2551_v13  ;;  %v2659_v58 = vld [vmem:[%s3585_s28 + $0xf8] sm:$0xff] }
 0x3ec   : > { %2630 = vst [vmem:[%s5688_s14 + $0x10] sm:$0xff] %v2614_v48  ;;  %2631 = vst [vmem:[%s5688_s14 + $0x18] sm:$0xff] %v2615_v5  ;;  %v2652_v48 = vld [vmem:[%s3585_s28 + $0xc0] sm:$0xff]  ;;  %v2653_v5 = vld [vmem:[%s3585_s28 + $0xc8] sm:$0xff] }
 0x3ed   : > { %v2590_v14 = vpop.permute.xlu0 %2589 }
 0x3ee   : > { %v2618_v32 = vmul.f32 %v2590_v14, %v2554_v18  ;;  %v2619_v63 = vmul.f32 %v2590_v14, %v2555_v36 }
 0x3ef   : > { %v2575_v20 = vpop.permute.xlu1 %2574 }
 0x3f0   : > { %v2612_v55 = vmul.f32 %v2575_v20, %v2548_v1  ;;  %v2613_v44 = vmul.f32 %v2575_v20, %v2549_v59  ;;  %2634 = vst [vmem:[%s5688_s14 + $0x30] sm:$0xff] %v2618_v32  ;;  %2635 = vst [vmem:[%s5688_s14 + $0x38] sm:$0xff] %v2619_v63  ;;  %v3081_v63 = vld [vmem:[%s3585_s28 + $0x110] sm:$0xff]  ;;  %v3082_v20 = vld [vmem:[%s3585_s28 + $0x118] sm:$0xff] }
 0x3f1   : > { %v2600_v12 = vpop.permute.xlu0 %2599 }
 0x3f2   : > { %2628 = vst [vmem:[%s5688_s14] sm:$0xff] %v2612_v55  ;;  %2629 = vst [vmem:[%s5688_s14 + $0x8] sm:$0xff] %v2613_v44  ;;  %v2622_v40 = vmul.f32 %v2600_v12, %v2558_v38  ;;  %v2623_v57 = vmul.f32 %v2600_v12, %v2559_v29  ;;  %v2656_v38 = vld [vmem:[%s3585_s28 + $0xe0] sm:$0xff]  ;;  %v2657_v29 = vld [vmem:[%s3585_s28 + $0xe8] sm:$0xff] }
 0x3f3   : > { %v2585_v16 = vpop.permute.xlu1 %2584 }
 0x3f4   : > { %v2616_v37 = vmul.f32 %v2585_v16, %v2552_v54  ;;  %v2617_v51 = vmul.f32 %v2585_v16, %v2553_v49  ;;  %2638 = vst [vmem:[%s5688_s14 + $0x50] sm:$0xff] %v2622_v40  ;;  %2639 = vst [vmem:[%s5688_s14 + $0x58] sm:$0xff] %v2623_v57  ;;  %v3087_v57 = vld [vmem:[%s3585_s28 + $0x140] sm:$0xff]  ;;  %v3088_v16 = vld [vmem:[%s3585_s28 + $0x148] sm:$0xff] }
 0x3f5   : > { %v2610_v42 = vpop.permute.xlu0 %2609 }
 0x3f6   : > { %2632 = vst [vmem:[%s5688_s14 + $0x20] sm:$0xff] %v2616_v37  ;;  %2633 = vst [vmem:[%s5688_s14 + $0x28] sm:$0xff] %v2617_v51  ;;  %v2626_v9 = vmul.f32 %v2610_v42, %v2562_v31  ;;  %v2627_v6 = vmul.f32 %v2610_v42, %v2563_v53  ;;  %v3079_v31 = vld [vmem:[%s3585_s28 + $0x100] sm:$0xff]  ;;  %v3080_v53 = vld [vmem:[%s3585_s28 + $0x108] sm:$0xff] }
 0x3f7   : > { %v2595_v25 = vpop.permute.xlu1 %2594  ;;  %v3091_v42 = vld [vmem:[%s3585_s28 + $0x160] sm:$0xff] }
 0x3f8   : > { %v2620_v22 = vmul.f32 %v2595_v25, %v2556_v27  ;;  %v2621_v3 = vmul.f32 %v2595_v25, %v2557_v23  ;;  %2642 = vst [vmem:[%s5688_s14 + $0x70] sm:$0xff] %v2626_v9  ;;  %2643 = vst [vmem:[%s5688_s14 + $0x78] sm:$0xff] %v2627_v6  ;;  %v3092_v9 = vld [vmem:[%s3585_s28 + $0x168] sm:$0xff] }
 0x3f9   : > { %v2676_v60 = vpop.permute.xlu0 %2675 }
 0x3fa   : > { %2636 = vst [vmem:[%s5688_s14 + $0x40] sm:$0xff] %v2620_v22  ;;  %2637 = vst [vmem:[%s5688_s14 + $0x48] sm:$0xff] %v2621_v3  ;;  %v2710_v56 = vmul.f32 %v2676_v60, %v2646_v0  ;;  %v2711_v30 = vmul.f32 %v2676_v60, %v2647_v15  ;;  %v3083_v0 = vld [vmem:[%s3585_s28 + $0x120] sm:$0xff]  ;;  %v3084_v15 = vld [vmem:[%s3585_s28 + $0x128] sm:$0xff] }
 0x3fb   : > { %v2605_v52 = vpop.permute.xlu1 %2604  ;;  %v3111_v60 = vld [vmem:[%s3585_s28 + $0x180] sm:$0xff] }
 0x3fc   : > { %v2624_v35 = vmul.f32 %v2605_v52, %v2560_v34  ;;  %v2625_v61 = vmul.f32 %v2605_v52, %v2561_v33  ;;  %2726 = vst [vmem:[%s5688_s14 + $0x90] sm:$0xff] %v2710_v56  ;;  %2727 = vst [vmem:[%s5688_s14 + $0x98] sm:$0xff] %v2711_v30  ;;  %v3112_v56 = vld [vmem:[%s3585_s28 + $0x188] sm:$0xff] }
 0x3fd   : > { %v2686_v62 = vpop.permute.xlu0 %2685 }
 0x3fe   : > { %2640 = vst [vmem:[%s5688_s14 + $0x60] sm:$0xff] %v2624_v35  ;;  %2641 = vst [vmem:[%s5688_s14 + $0x68] sm:$0xff] %v2625_v61  ;;  %v2714_v19 = vmul.f32 %v2686_v62, %v2650_v7  ;;  %v2715_v24 = vmul.f32 %v2686_v62, %v2651_v28  ;;  %v3085_v7 = vld [vmem:[%s3585_s28 + $0x130] sm:$0xff]  ;;  %v3086_v28 = vld [vmem:[%s3585_s28 + $0x138] sm:$0xff] }
 0x3ff   : > { %v2671_v39 = vpop.permute.xlu1 %2670  ;;  %v3115_v62 = vld [vmem:[%s3585_s28 + $0x1a0] sm:$0xff] }
 0x400   : > { %v2708_v26 = vmul.f32 %v2671_v39, %v2644_v41  ;;  %v2709_v8 = vmul.f32 %v2671_v39, %v2645_v10  ;;  %2730 = vst [vmem:[%s5688_s14 + $0xb0] sm:$0xff] %v2714_v19  ;;  %2731 = vst [vmem:[%s5688_s14 + $0xb8] sm:$0xff] %v2715_v24  ;;  %v3116_v19 = vld [vmem:[%s3585_s28 + $0x1a8] sm:$0xff] }
 0x401   : > { %v2696_v47 = vpop.permute.xlu0 %2695 }
 0x402   : > { %2724 = vst [vmem:[%s5688_s14 + $0x80] sm:$0xff] %v2708_v26  ;;  %2725 = vst [vmem:[%s5688_s14 + $0x88] sm:$0xff] %v2709_v8  ;;  %v2718_v50 = vmul.f32 %v2696_v47, %v2654_v11  ;;  %v2719_v43 = vmul.f32 %v2696_v47, %v2655_v4  ;;  %v3089_v11 = vld [vmem:[%s3585_s28 + $0x150] sm:$0xff]  ;;  %v3090_v4 = vld [vmem:[%s3585_s28 + $0x158] sm:$0xff] }
 0x403   : > { %v2681_v46 = vpop.permute.xlu1 %2680  ;;  %v3119_v47 = vld [vmem:[%s3585_s28 + $0x1c0] sm:$0xff] }
 0x404   : > { %v2712_v13 = vmul.f32 %v2681_v46, %v2648_v21  ;;  %v2713_v2 = vmul.f32 %v2681_v46, %v2649_v17  ;;  %2734 = vst [vmem:[%s5688_s14 + $0xd0] sm:$0xff] %v2718_v50  ;;  %2735 = vst [vmem:[%s5688_s14 + $0xd8] sm:$0xff] %v2719_v43  ;;  %v3120_v50 = vld [vmem:[%s3585_s28 + $0x1c8] sm:$0xff] }
 0x405   : > { %v2706_v18 = vpop.permute.xlu0 %2705 }
 0x406   : > { %2728 = vst [vmem:[%s5688_s14 + $0xa0] sm:$0xff] %v2712_v13  ;;  %2729 = vst [vmem:[%s5688_s14 + $0xa8] sm:$0xff] %v2713_v2  ;;  %v2722_v36 = vmul.f32 %v2706_v18, %v2658_v45  ;;  %v2723_v1 = vmul.f32 %v2706_v18, %v2659_v58  ;;  %v3093_v45 = vld [vmem:[%s3585_s28 + $0x170] sm:$0xff]  ;;  %v3094_v58 = vld [vmem:[%s3585_s28 + $0x178] sm:$0xff] }
 0x407   : > { %v2691_v59 = vpop.permute.xlu1 %2690  ;;  %v3123_v18 = vld [vmem:[%s3585_s28 + $0x1e0] sm:$0xff] }
 0x408   : > { %v2716_v14 = vmul.f32 %v2691_v59, %v2652_v48  ;;  %v2717_v32 = vmul.f32 %v2691_v59, %v2653_v5  ;;  %2738 = vst [vmem:[%s5688_s14 + $0xf0] sm:$0xff] %v2722_v36  ;;  %2739 = vst [vmem:[%s5688_s14 + $0xf8] sm:$0xff] %v2723_v1  ;;  %v3124_v36 = vld [vmem:[%s3585_s28 + $0x1e8] sm:$0xff] }
 0x40a   : > { %2732 = vst [vmem:[%s5688_s14 + $0xc0] sm:$0xff] %v2716_v14  ;;  %2733 = vst [vmem:[%s5688_s14 + $0xc8] sm:$0xff] %v2717_v32  ;;  %v2772_v55 = vpop.permute.xlu0 %2771  ;;  %v3113_v14 = vld [vmem:[%s3585_s28 + $0x190] sm:$0xff]  ;;  %v3114_v32 = vld [vmem:[%s3585_s28 + $0x198] sm:$0xff] }
 0x40b   : > { %v2701_v44 = vpop.permute.xlu1 %2700  ;;  %v2806_v54 = vmul.f32 %v3081_v63, %v2772_v55  ;;  %v2807_v49 = vmul.f32 %v3082_v20, %v2772_v55 }
 0x40c   : > { %v2720_v12 = vmul.f32 %v2701_v44, %v2656_v38  ;;  %v2721_v40 = vmul.f32 %v2701_v44, %v2657_v29 }
 0x40d   : > { %3097 = vst [vmem:[%s5688_s14 + $0x110] sm:$0xff] %v2806_v54  ;;  %3098 = vst [vmem:[%s5688_s14 + $0x118] sm:$0xff] %v2807_v49  ;;  %v3117_v54 = vld [vmem:[%s3585_s28 + $0x1b0] sm:$0xff]  ;;  %v3118_v49 = vld [vmem:[%s3585_s28 + $0x1b8] sm:$0xff] }
 0x40e   : > { %2736 = vst [vmem:[%s5688_s14 + $0xe0] sm:$0xff] %v2720_v12  ;;  %2737 = vst [vmem:[%s5688_s14 + $0xe8] sm:$0xff] %v2721_v40  ;;  %v2787_v37 = vpop.permute.xlu0 %2786 }
 0x40f   : > { %v2812_v51 = vmul.f32 %v3087_v57, %v2787_v37  ;;  %v2813_v27 = vmul.f32 %v3088_v16, %v2787_v37  ;;  %v3121_v16 = vld [vmem:[%s3585_s28 + $0x1d0] sm:$0xff] }
 0x410   : > { %v2767_v23 = vpop.permute.xlu1 %2766 }
 0x411   : > { %v2804_v6 = vmul.f32 %v3079_v31, %v2767_v23  ;;  %v2805_v25 = vmul.f32 %v3080_v53, %v2767_v23  ;;  %3103 = vst [vmem:[%s5688_s14 + $0x140] sm:$0xff] %v2812_v51  ;;  %3104 = vst [vmem:[%s5688_s14 + $0x148] sm:$0xff] %v2813_v27  ;;  %v3122_v31 = vld [vmem:[%s3585_s28 + $0x1d8] sm:$0xff]  ;;  %v3125_v27 = vld [vmem:[%s3585_s28 + $0x1f0] sm:$0xff] }
 0x412   : > { %v2797_v22 = vpop.permute.xlu0 %2796  ;;  %v3126_v23 = vld [vmem:[%s3585_s28 + $0x1f8] sm:$0xff]  ;;  %s3442_s28 = smov [#allocation6]  }
 0x413   : > { %3095 = vst [vmem:[%s5688_s14 + $0x100] sm:$0xff] %v2804_v6  ;;  %3096 = vst [vmem:[%s5688_s14 + $0x108] sm:$0xff] %v2805_v25  ;;  %v2816_v3 = vmul.f32 %v3091_v42, %v2797_v22  ;;  %v2817_v34 = vmul.f32 %v3092_v9, %v2797_v22  ;;  %s3367_s10 = sshll.u32 %s3442_s28, 4  ;;  %s3368_s10 = int_to_ptr.vmem [resolvable:$false] %s3367_s10 }
 0x414   : > { %v2777_v33 = vpop.permute.xlu1 %2776  ;;  %s3369_s11 = scalar_lea.vmem %s3368_s10, 16384  ;;  %p3370_p8 = scmp.lt.s32.totalorder %s5819_s15, %s3368_s10 }
 0x415   : > { %v2808_v30 = vmul.f32 %v3083_v0, %v2777_v33  ;;  %v2809_v52 = vmul.f32 %v3084_v15, %v2777_v33  ;;  %3107 = vst [vmem:[%s5688_s14 + $0x160] sm:$0xff] %v2816_v3  ;;  %3108 = vst [vmem:[%s5688_s14 + $0x168] sm:$0xff] %v2817_v34  ;;  %p3371_p10 = scmp.lt.s32.totalorder %s3369_s11, %s3363_s9 }
 0x416   : > { %v2864_v35 = vpop.permute.xlu0 %2863 }
 0x417   : > { %3099 = vst [vmem:[%s5688_s14 + $0x120] sm:$0xff] %v2808_v30  ;;  %3100 = vst [vmem:[%s5688_s14 + $0x128] sm:$0xff] %v2809_v52  ;;  %v2901_v61 = vmul.f32 %v3111_v60, %v2864_v35  ;;  %v2902_v41 = vmul.f32 %v3112_v56, %v2864_v35  ;;  %p3372_p0 = por %p3371_p10, %p3370_p8 }
 0x418   : > { %v2782_v10 = vpop.permute.xlu1 %2781 }
 0x419   : > { %v2810_v24 = vmul.f32 %v3085_v7, %v2782_v10  ;;  %v2811_v39 = vmul.f32 %v3086_v28, %v2782_v10  ;;  %3127 = vst [vmem:[%s5688_s14 + $0x180] sm:$0xff] %v2901_v61  ;;  %3128 = vst [vmem:[%s5688_s14 + $0x188] sm:$0xff] %v2902_v41  ;;  %p3373_p2 = pnand %p3372_p0, %p3366_p13 }
 0x41a   : > { %v2874_v26 = vpop.permute.xlu0 %2873 }
 0x41b   : > { %3101 = vst [vmem:[%s5688_s14 + $0x130] sm:$0xff] %v2810_v24  ;;  %3102 = vst [vmem:[%s5688_s14 + $0x138] sm:$0xff] %v2811_v39  ;;  %v2905_v8 = vmul.f32 %v3115_v62, %v2874_v26  ;;  %v2906_v21 = vmul.f32 %v3116_v19, %v2874_v26 }
 0x41c   : > { %v2792_v17 = vpop.permute.xlu1 %2791 }
 0x41d   : > { %v2814_v43 = vmul.f32 %v3089_v11, %v2792_v17  ;;  %v2815_v46 = vmul.f32 %v3090_v4, %v2792_v17  ;;  %3131 = vst [vmem:[%s5688_s14 + $0x1a0] sm:$0xff] %v2905_v8  ;;  %3132 = vst [vmem:[%s5688_s14 + $0x1a8] sm:$0xff] %v2906_v21 }
 0x41e   : > { %v2884_v13 = vpop.permute.xlu0 %2883 }
 0x41f   : > { %3105 = vst [vmem:[%s5688_s14 + $0x150] sm:$0xff] %v2814_v43  ;;  %3106 = vst [vmem:[%s5688_s14 + $0x158] sm:$0xff] %v2815_v46  ;;  %v2909_v2 = vmul.f32 %v3119_v47, %v2884_v13  ;;  %v2910_v48 = vmul.f32 %v3120_v50, %v2884_v13 }
 0x420   : > { %v2802_v5 = vpop.permute.xlu1 %2801 }
 0x421   : > { %v2818_v1 = vmul.f32 %v3093_v45, %v2802_v5  ;;  %v2819_v59 = vmul.f32 %v3094_v58, %v2802_v5  ;;  %3135 = vst [vmem:[%s5688_s14 + $0x1c0] sm:$0xff] %v2909_v2  ;;  %3136 = vst [vmem:[%s5688_s14 + $0x1c8] sm:$0xff] %v2910_v48 }
 0x422   : > { %v2894_v63 = vpop.permute.xlu0 %2893 }
 0x423   : > { %3109 = vst [vmem:[%s5688_s14 + $0x170] sm:$0xff] %v2818_v1  ;;  %3110 = vst [vmem:[%s5688_s14 + $0x178] sm:$0xff] %v2819_v59  ;;  %v2913_v20 = vmul.f32 %v3123_v18, %v2894_v63  ;;  %v2914_v38 = vmul.f32 %v3124_v36, %v2894_v63 }
 0x424   : > { %v2869_v29 = vpop.permute.xlu1 %2868 }
 0x425   : > { %v2903_v55 = vmul.f32 %v3113_v14, %v2869_v29  ;;  %v2904_v44 = vmul.f32 %v3114_v32, %v2869_v29  ;;  %3139 = vst [vmem:[%s5688_s14 + $0x1e0] sm:$0xff] %v2913_v20  ;;  %3140 = vst [vmem:[%s5688_s14 + $0x1e8] sm:$0xff] %v2914_v38 }
 0x427   : > { %3129 = vst [vmem:[%s5688_s14 + $0x190] sm:$0xff] %v2903_v55  ;;  %3130 = vst [vmem:[%s5688_s14 + $0x198] sm:$0xff] %v2904_v44 }
 0x428   : > { %v2879_v12 = vpop.permute.xlu1 %2878 }
 0x429   : > { %v2907_v40 = vmul.f32 %v3117_v54, %v2879_v12  ;;  %v2908_v57 = vmul.f32 %v3118_v49, %v2879_v12 }
 0x42b   : > { %3133 = vst [vmem:[%s5688_s14 + $0x1b0] sm:$0xff] %v2907_v40  ;;  %3134 = vst [vmem:[%s5688_s14 + $0x1b8] sm:$0xff] %v2908_v57 }
 0x42c   : > { %v2889_v53 = vpop.permute.xlu1 %2888 }
 0x42d   : > { %v2911_v37 = vmul.f32 %v3121_v16, %v2889_v53  ;;  %v2912_v51 = vmul.f32 %v3122_v31, %v2889_v53 }
 0x42f   : > { %3137 = vst [vmem:[%s5688_s14 + $0x1d0] sm:$0xff] %v2911_v37  ;;  %3138 = vst [vmem:[%s5688_s14 + $0x1d8] sm:$0xff] %v2912_v51 }
 0x430   : > { %v2899_v42 = vpop.permute.xlu1 %2898 }
 0x431   : > { %v2915_v9 = vmul.f32 %v3125_v27, %v2899_v42  ;;  %v2916_v6 = vmul.f32 %v3126_v23, %v2899_v42 }
 0x433   : > { %3141 = vst [vmem:[%s5688_s14 + $0x1f0] sm:$0xff] %v2915_v9  ;;  %3142 = vst [vmem:[%s5688_s14 + $0x1f8] sm:$0xff] %v2916_v6 }
 0x434   : > { %3376 = shalt.err (!%p3373_p2)
}
 0x435   : > { %s3377_s13 = scalar_lea.hbm %s5817_s7, 8192  ;;  %s3381_s29 = scalar_lea.hbm %s5870_s5, 16384 }
 0x436   : > { %p3378_p4 = scmp.ne.s32.totalorder %s5817_s7, %s3377_s13  ;;  %p3382_p9 = scmp.lt.u32.totalorder %s5817_s7, %s5870_s5 }
 0x437   : > { %p3383_p1 = scmp.lt.u32.totalorder %s3381_s29, %s3377_s13  ;;  %p3385_p6 = scmp.lt.u32.totalorder %s3377_s13, %s5817_s7 }
 0x438   : > { %p3379_p5 = pnand %p3378_p4, %p6372_p11 }
 0x439   : > { %p3384_p3 = por %p3383_p1, %p3382_p9 }
 0x43a   : > { %p3380_p7 = pneg %p3379_p5 }
 0x43b   : > { %p3386_p12 = por %p3385_p6, %p3384_p3 }
 0x43d   : > { %p3387_p13 = pnand %p3386_p12, %p3380_p7 }
 0x43f   : > { %3390 = shalt.err (!%p3387_p13)
}
 0x440   : > { %s3443_s25 = smov 256   ;;  %s3444_s16 = smov 16  }
 0x441   : > { %3155 = dma.vmem_to_hbm [thread:$0]  (%p6372_p11), %s5819_s15, 8192, %s5817_s7, %s2934_s22, %s3443_s25, %s3443_s25, %s3444_s16  }
 0x442 PF: > { %s2963_s8 = sand.u32 1, %s3417_s18   ;;  %p6373_p8 = scmp.ne.s32.totalorder %s5889_s6, 0 }
 0x443   : > { %p6374_p10 = scmp.ge.s32.totalorder %s3429_s21, 2  ;;  %s2964_s9 = scalar_lea.sflag [#allocation5], %s2963_s8 }
 0x445   : > { %p3162_p0 = pnand %p6374_p10, %p6373_p8 }
 0x447   : > { %3412 = dma.done.wait (!%p3162_p0), %s2964_s9, 8192  }
 0x448   : > { %3414 = vsyncadd (!%p3162_p0), %s2964_s9, 4294959104  ;;  %p18_p2 = scmp.ge.s32.totalorder %s3500_s24, 4   ;;  %s6375_s18 = smov %s3421_s19 }
 0x449   : > { %s6376_s19 = smov %s3425_s20  ;;  %s6377_s20 = smov %s3512_s27 }
 0x44a   : > { %s6378_s21 = smov %s3500_s24  ;;  %20 = sbr.rel (!%p18_p2) target bundleno = 5 (0x5), region = 87 }
 0x451   :  { %2969 = vsyncpa [#allocation4], 1 }
 0x452   :  { %2971 = vsyncpa [#allocation4 + $0x1], 1 }
 0x453   :  { %2972 = vsyncpa [#allocation5], 1 }
 0x454   :  { %2974 = vsyncpa [#allocation5 + $0x1], 1 }

</bundles_post_ra>
